<compile_context>
chip_gen: v6e
topology: v6e:2x2x1
jax: 0.10.0
libtpu: 0.0.40
codegen_flags: <defaults>
</compile_context>

<pallas_src>
import jax
import jax.numpy as jnp
import numpy as np
from jax import lax
from jax.experimental import pallas as pl
from jax.experimental.pallas import tpu as pltpu

BN_EPS = 1e-5  # torch.nn.BatchNorm2d default


def _round_up(x, m):
    return (x + m - 1) // m * m


# ---------------------------------------------------------------------------
# Kernel
# ---------------------------------------------------------------------------
def _conv_layer(src_ref, w_ref, sb_ref, dst_ref, acc_ref, tap_offsets, m_rows):
    """One conv + folded bias/BN + ReLU layer on row-flattened planes.

    src_ref: (>= max(tap_offsets)+m_rows, cin) bf16  flat input plane (row stride W0)
    w_ref:   (ntaps, cin, cout) bf16                 one (cin,cout) matrix per tap
    sb_ref:  (2, cout) f32                           row 0 = scale, row 1 = bias
    dst_ref: (m_rows, cout)                          flat output plane (full store)
    acc_ref: (>= m_rows, cout) f32                   shared VMEM accumulator
    """
    for t, off in enumerate(tap_offsets):
        lhs = src_ref[off:off + m_rows, :]                       # (M, cin) bf16
        p = jnp.dot(lhs, w_ref[t], preferred_element_type=jnp.float32)
        if t == 0:
            acc_ref[0:m_rows, :] = p
        else:
            acc_ref[0:m_rows, :] += p
    scale = sb_ref[0:1, :]                                       # hoisted, once/layer
    bias = sb_ref[1:2, :]
    y = jnp.maximum(acc_ref[0:m_rows, :] * scale + bias, 0.0)    # single f32 epilogue
    dst_ref[...] = y.astype(dst_ref.dtype)                       # single dense store


def _make_encoder_kernel(w0, rows):
    r1, r2, r3, r4 = rows[1:]
    # Static tap offsets (kh*kw <= 9, fixed-size Python loop is intentional).
    taps2 = tuple(di * w0 + dj for di in range(2) for dj in range(2))
    taps3 = tuple(di * w0 + dj for di in range(3) for dj in range(3))

    def kernel(x_ref, w1_ref, sb1_ref, w2_ref, sb2_ref, w3_ref, sb3_ref,
               w4_ref, sb4_ref, o_ref, a1_ref, a2_ref, a3_ref, acc_ref):
        # Whole encoder for one image; intermediates never leave VMEM.
        _conv_layer(x_ref, w1_ref, sb1_ref, a1_ref, acc_ref, taps2, r1)   # convnet1
        _conv_layer(a1_ref, w2_ref, sb2_ref, a2_ref, acc_ref, taps3, r2)  # convnet2
        _conv_layer(a2_ref, w3_ref, sb3_ref, a3_ref, acc_ref, taps3, r3)  # convnet[0:3]
        _conv_layer(a3_ref, w4_ref, sb4_ref, o_ref, acc_ref, taps3, r4)   # convnet[3:6]

    return kernel


# ---------------------------------------------------------------------------
# Wrapper glue (layout transforms + parameter folding, plain JAX)
# ---------------------------------------------------------------------------
def _oihw_to_hwio(w):
    return jnp.transpose(w, (2, 3, 1, 0)).astype(jnp.float32)


def _fold_bn(w_hwio, b, gamma, beta, mean, var, *, fold_preproc):
    """Fold conv bias + eval-mode BN (+ optional /255-0.5 preprocessing) into a
    per-output-channel (scale, bias) applied AFTER the raw convolution."""
    s = gamma / jnp.sqrt(var + BN_EPS)
    t = beta - s * mean
    if fold_preproc:
        # conv(x/255 - 0.5, W) = conv(x, W)/255 - 0.5 * sum(W)
        wsum = jnp.sum(w_hwio, axis=(0, 1, 2))
        scale = s / 255.0
        bias = s * (b - 0.5 * wsum) + t
    else:
        scale = s
        bias = s * b + t
    return jnp.stack([scale, bias]).astype(jnp.float32)  # (2, cout)


def _space_to_depth_weight(w_hwio):
    """(3,3,cin,cout) stride-2 weights -> (2,2,4*cin,cout) stride-1 weights."""
    kh, kw, cin, cout = w_hwio.shape
    assert kh == 3 and kw == 3
    wp = jnp.pad(w_hwio, ((0, 1), (0, 1), (0, 0), (0, 0)))        # (4,4,cin,cout)
    wp = wp.reshape(2, 2, 2, 2, cin, cout).transpose(0, 2, 1, 3, 4, 5)
    return wp.reshape(2, 2, 4 * cin, cout)


def _space_to_depth_input(x_nhwc, oh, ow):
    """NHWC pixels -> 2x2 space-to-depth, padded so a stride-1 2x2 conv gives
    exactly the stride-2 3x3 VALID conv output of size (oh, ow)."""
    n, h, w, c = x_nhwc.shape
    hp, wp = 2 * (oh + 1), 2 * (ow + 1)          # hp >= h, wp >= w always
    x = jnp.pad(x_nhwc, ((0, 0), (0, hp - h), (0, wp - w), (0, 0)))
    x = x.reshape(n, hp // 2, 2, wp // 2, 2, c).transpose(0, 1, 3, 2, 4, 5)
    return x.reshape(n, hp // 2, wp // 2, 4 * c)


@jax.jit
def encoder_forward(obs, params):
    """obs: (N, Cin, H, W) float32 pixel values in [0, 255].
    params: list of 4 tuples (w_oihw, conv_bias, gamma, beta, run_mean, run_var).
    Returns: (N, 32, H4, W4) float32 (NCHW, matching the PyTorch module)."""
    n, cin, h, w = obs.shape
    assert h >= 15 and w >= 15, "need >=15 spatial for 4 valid conv layers"

    # Output spatial sizes of the 4 conv layers.
    h1, w1 = (h - 3) // 2 + 1, (w - 3) // 2 + 1
    h2, w2 = h1 - 2, w1 - 2
    h3, w3 = h2 - 2, w2 - 2
    h4, w4 = h3 - 2, w3 - 2

    w0 = w1 + 1      # stored (padded) width / row stride of every flat plane
    hs = h1 + 1      # rows of the space-to-depth'd input

    # Flat-plane allocation rows: multiples of 8, with enough slack that every
    # tap's full-plane slice (offset up to (k-1)*(w0+1)) stays in bounds, and
    # enough rows to hold each layer's valid data.  Junk rows/cols only ever
    # feed other junk positions; valid outputs read valid inputs only.
    r4 = _round_up(h4 * w0, 8)
    r3 = _round_up(max(h3 * w0, r4 + 2 * (w0 + 1)), 8)
    r2 = _round_up(max(h2 * w0, r3 + 2 * (w0 + 1)), 8)
    r1 = _round_up(max(h1 * w0, r2 + 2 * (w0 + 1)), 8)
    r0 = _round_up(max(hs * w0, r1 + 1 * (w0 + 1)), 8)

    # Parameter folding (f32) then bf16 weights for the MXU.
    w_hwio = [_oihw_to_hwio(p[0]) for p in params]
    sb = [_fold_bn(w_hwio[l], *params[l][1:], fold_preproc=(l == 0))
          for l in range(4)]
    c1 = 4 * cin
    w1_flat = _space_to_depth_weight(w_hwio[0]).reshape(4, c1, 32).astype(jnp.bfloat16)
    w_flat = [w1_flat] + [wh.reshape(9, 32, 32).astype(jnp.bfloat16)
                          for wh in w_hwio[1:]]

    # Input: NCHW -> NHWC -> 2x2 space-to-depth -> row-flattened bf16 plane.
    x_nhwc = jnp.transpose(obs, (0, 2, 3, 1)).astype(jnp.float32)
    x_s2d = _space_to_depth_input(x_nhwc, h1, w1)          # (n, hs, w0, c1)
    x_flat = x_s2d.reshape(n, hs * w0, c1)
    x_flat = jnp.pad(x_flat, ((0, 0), (0, r0 - hs * w0), (0, 0))).astype(jnp.bfloat16)

    kernel = _make_encoder_kernel(w0, (r0, r1, r2, r3, r4))

    def const_spec(shape):
        zeros = (0,) * len(shape)
        return pl.BlockSpec(shape, lambda i, _z=zeros: _z)

    out_flat = pl.pallas_call(
        kernel,
        out_shape=jax.ShapeDtypeStruct((n, r4, 32), jnp.float32),
        grid_spec=pltpu.PrefetchScalarGridSpec(
            num_scalar_prefetch=0,
            grid=(n,),
            in_specs=[
                # one image's flat plane per grid step (leading dim squeezed)
                pl.BlockSpec((None, r0, c1), lambda i: (i, 0, 0)),
                # weights / scale-bias: whole-array, constant index -> resident
                const_spec((4, c1, 32)), const_spec((2, 32)),
                const_spec((9, 32, 32)), const_spec((2, 32)),
                const_spec((9, 32, 32)), const_spec((2, 32)),
                const_spec((9, 32, 32)), const_spec((2, 32)),
            ],
            out_specs=pl.BlockSpec((None, r4, 32), lambda i: (i, 0, 0)),
            scratch_shapes=[
                pltpu.VMEM((r1, 32), jnp.bfloat16),   # layer-1 activations
                pltpu.VMEM((r2, 32), jnp.bfloat16),   # layer-2 activations
                pltpu.VMEM((r3, 32), jnp.bfloat16),   # layer-3 activations
                pltpu.VMEM((r1, 32), jnp.float32),    # shared f32 accumulator
            ],
        ),
        compiler_params=pltpu.CompilerParams(
            dimension_semantics=("parallel",)),
    )(x_flat, w_flat[0], sb[0], w_flat[1], sb[1], w_flat[2], sb[2],
      w_flat[3], sb[3])

    # Un-flatten: take the valid rows/columns and go back to NCHW.
    out = out_flat[:, :h4 * w0, :].reshape(n, h4, w0, 32)[:, :, :w4, :]
    return jnp.transpose(out, (0, 3, 1, 2))


# ---------------------------------------------------------------------------
# Pure-JAX reference (follows the PyTorch module literally, eval-mode BN)
# ---------------------------------------------------------------------------
def ref_encoder(obs, params):
    x = obs / 255.0 - 0.5
    strides = (2, 1, 1, 1)
    for (wt, b, gamma, beta, mean, var), s in zip(params, strides):
        x = lax.conv_general_dilated(
            x, wt, window_strides=(s, s), padding="VALID",
            dimension_numbers=("NCHW", "OIHW", "NCHW"),
            precision=lax.Precision.HIGHEST)
        x = x + b[None, :, None, None]
        x = (x - mean[None, :, None, None]) * (
            gamma / jnp.sqrt(var + BN_EPS))[None, :, None, None] \
            + beta[None, :, None, None]
        x = jnp.maximum(x, 0.0)
    return x


# ---------------------------------------------------------------------------
if __name__ == "__main__":
    key = jax.random.PRNGKey(0)
    n, cin, h, w = 2, 4, 21, 21          # small shapes; forward implies h,w >= 15
    keys = jax.random.split(key, 8)
    obs = jax.random.uniform(keys[0], (n, cin, h, w), jnp.float32, 0.0, 255.0)

    params = []
    chans = [(cin, 32), (32, 32), (32, 32), (32, 32)]
    for layer, (ci, co) in enumerate(chans):
        kw_, kb, kg, kbe, km, kv = jax.random.split(keys[layer + 1], 6)
        w_oihw = 0.08 * jax.random.normal(kw_, (co, ci, 3, 3), jnp.float32)
        b = 0.05 * jax.random.normal(kb, (co,), jnp.float32)
        gamma = jax.random.uniform(kg, (co,), jnp.float32, 0.6, 1.4)
        beta = 0.05 * jax.random.normal(kbe, (co,), jnp.float32)
        mean = 0.05 * jax.random.normal(km, (co,), jnp.float32)
        var = jax.random.uniform(kv, (co,), jnp.float32, 0.5, 1.5)
        params.append((w_oihw, b, gamma, beta, mean, var))

    out = encoder_forward(obs, params)
    out = jax.block_until_ready(out)

    ref = ref_encoder(obs, params)
    assert out.shape == ref.shape == (n, 32, 4, 4), (out.shape, ref.shape)
    # bf16 matmul inputs (per perf review) vs the f32 reference -> widened tolerance.
    np.testing.assert_allclose(np.asarray(out), np.asarray(ref),
                               rtol=3e-2, atol=3e-2)
    print("KERNEL_OK")
</pallas_src>

<mosaic_0001>
module attributes {stable_mosaic.version = 11 : i64} {
  func.func @kernel(%arg0: i32, %arg1: memref<1x136x16xbf16, #tpu.memory_space<vmem>>, %arg2: memref<4x16x32xbf16, #tpu.memory_space<vmem>>, %arg3: memref<2x32xf32, #tpu.memory_space<vmem>>, %arg4: memref<9x32x32xbf16, #tpu.memory_space<vmem>>, %arg5: memref<2x32xf32, #tpu.memory_space<vmem>>, %arg6: memref<9x32x32xbf16, #tpu.memory_space<vmem>>, %arg7: memref<2x32xf32, #tpu.memory_space<vmem>>, %arg8: memref<9x32x32xbf16, #tpu.memory_space<vmem>>, %arg9: memref<2x32xf32, #tpu.memory_space<vmem>>, %arg10: memref<1x48x32xf32, #tpu.memory_space<vmem>>, %arg11: memref<120x32xbf16, #tpu.memory_space<vmem>>, %arg12: memref<96x32xbf16, #tpu.memory_space<vmem>>, %arg13: memref<72x32xbf16, #tpu.memory_space<vmem>>, %arg14: memref<120x32xf32, #tpu.memory_space<vmem>>) attributes {dimension_semantics = [#tpu.dimension_semantics<parallel>], iteration_bounds = array<i64: 2>, scalar_prefetch = 0 : i64, scratch_operands = 4 : i64, tpu.core_type = #tpu.core_type<tc>, window_params = [{transform_indices = @transform_0, window_bounds = array<i64: 1, 136, 16>}, {pipeline_mode = #tpu.pipeline_mode<synchronous>, transform_indices = @transform_1, window_bounds = array<i64: 4, 16, 32>}, {pipeline_mode = #tpu.pipeline_mode<synchronous>, transform_indices = @transform_2, window_bounds = array<i64: 2, 32>}, {pipeline_mode = #tpu.pipeline_mode<synchronous>, transform_indices = @transform_3, window_bounds = array<i64: 9, 32, 32>}, {pipeline_mode = #tpu.pipeline_mode<synchronous>, transform_indices = @transform_4, window_bounds = array<i64: 2, 32>}, {pipeline_mode = #tpu.pipeline_mode<synchronous>, transform_indices = @transform_5, window_bounds = array<i64: 9, 32, 32>}, {pipeline_mode = #tpu.pipeline_mode<synchronous>, transform_indices = @transform_6, window_bounds = array<i64: 2, 32>}, {pipeline_mode = #tpu.pipeline_mode<synchronous>, transform_indices = @transform_7, window_bounds = array<i64: 9, 32, 32>}, {pipeline_mode = #tpu.pipeline_mode<synchronous>, transform_indices = @transform_8, window_bounds = array<i64: 2, 32>}, {transform_indices = @transform_9, window_bounds = array<i64: 1, 48, 32>}]} {
    %c0 = arith.constant 0 : index
    %c0_0 = arith.constant 0 : index
    %c0_1 = arith.constant 0 : index
    %0 = vector.load %arg1[%c0, %c0_0, %c0_1] : memref<1x136x16xbf16, #tpu.memory_space<vmem>>, vector<1x120x16xbf16>
    %1 = vector.shape_cast %0 : vector<1x120x16xbf16> to vector<120x16xbf16>
    %c0_2 = arith.constant 0 : index
    %c0_3 = arith.constant 0 : index
    %c0_4 = arith.constant 0 : index
    %2 = vector.load %arg2[%c0_2, %c0_3, %c0_4] : memref<4x16x32xbf16, #tpu.memory_space<vmem>>, vector<1x16x32xbf16>
    %3 = vector.shape_cast %2 : vector<1x16x32xbf16> to vector<16x32xbf16>
    %cst = arith.constant dense<0.000000e+00> : vector<120x32xf32>
    %4 = tpu.matmul %1, %3, %cst {dimension_numbers = #tpu.dot_dimension_numbers<[1], [0], [0], [1], [0, 0, 1, 1], [], []>} : vector<120x16xbf16>, vector<16x32xbf16>, vector<120x32xf32> -> vector<120x32xf32>
    %c0_5 = arith.constant 0 : index
    %c0_6 = arith.constant 0 : index
    %5 = vector.load %arg14[%c0_5, %c0_6] : memref<120x32xf32, #tpu.memory_space<vmem>>, vector<120x32xf32>
    tpu.vector_store %arg14[%c0_5, %c0_6], %4 {strides = array<i32>} : memref<120x32xf32, #tpu.memory_space<vmem>>, vector<120x32xf32>,
    %c0_7 = arith.constant 0 : index
    %c1 = arith.constant 1 : index
    %c0_8 = arith.constant 0 : index
    %6 = vector.load %arg1[%c0_7, %c1, %c0_8] : memref<1x136x16xbf16, #tpu.memory_space<vmem>>, vector<1x120x16xbf16>
    %7 = vector.shape_cast %6 : vector<1x120x16xbf16> to vector<120x16xbf16>
    %c1_9 = arith.constant 1 : index
    %c0_10 = arith.constant 0 : index
    %c0_11 = arith.constant 0 : index
    %8 = vector.load %arg2[%c1_9, %c0_10, %c0_11] : memref<4x16x32xbf16, #tpu.memory_space<vmem>>, vector<1x16x32xbf16>
    %9 = vector.shape_cast %8 : vector<1x16x32xbf16> to vector<16x32xbf16>
    %cst_12 = arith.constant dense<0.000000e+00> : vector<120x32xf32>
    %10 = tpu.matmul %7, %9, %cst_12 {dimension_numbers = #tpu.dot_dimension_numbers<[1], [0], [0], [1], [0, 0, 1, 1], [], []>} : vector<120x16xbf16>, vector<16x32xbf16>, vector<120x32xf32> -> vector<120x32xf32>
    %c0_13 = arith.constant 0 : index
    %c0_14 = arith.constant 0 : index
    %11 = vector.load %arg14[%c0_13, %c0_14] : memref<120x32xf32, #tpu.memory_space<vmem>>, vector<120x32xf32>
    %12 = arith.addf %11, %10 : vector<120x32xf32>
    %c0_15 = arith.constant 0 : index
    %c0_16 = arith.constant 0 : index
    %13 = vector.load %arg14[%c0_15, %c0_16] : memref<120x32xf32, #tpu.memory_space<vmem>>, vector<120x32xf32>
    tpu.vector_store %arg14[%c0_15, %c0_16], %12 {strides = array<i32>} : memref<120x32xf32, #tpu.memory_space<vmem>>, vector<120x32xf32>,
    %c0_17 = arith.constant 0 : index
    %c11 = arith.constant 11 : index
    %c0_18 = arith.constant 0 : index
    %14 = vector.load %arg1[%c0_17, %c11, %c0_18] : memref<1x136x16xbf16, #tpu.memory_space<vmem>>, vector<1x120x16xbf16>
    %15 = vector.shape_cast %14 : vector<1x120x16xbf16> to vector<120x16xbf16>
    %c2 = arith.constant 2 : index
    %c0_19 = arith.constant 0 : index
    %c0_20 = arith.constant 0 : index
    %16 = vector.load %arg2[%c2, %c0_19, %c0_20] : memref<4x16x32xbf16, #tpu.memory_space<vmem>>, vector<1x16x32xbf16>
    %17 = vector.shape_cast %16 : vector<1x16x32xbf16> to vector<16x32xbf16>
    %cst_21 = arith.constant dense<0.000000e+00> : vector<120x32xf32>
    %18 = tpu.matmul %15, %17, %cst_21 {dimension_numbers = #tpu.dot_dimension_numbers<[1], [0], [0], [1], [0, 0, 1, 1], [], []>} : vector<120x16xbf16>, vector<16x32xbf16>, vector<120x32xf32> -> vector<120x32xf32>
    %c0_22 = arith.constant 0 : index
    %c0_23 = arith.constant 0 : index
    %19 = vector.load %arg14[%c0_22, %c0_23] : memref<120x32xf32, #tpu.memory_space<vmem>>, vector<120x32xf32>
    %20 = arith.addf %19, %18 : vector<120x32xf32>
    %c0_24 = arith.constant 0 : index
    %c0_25 = arith.constant 0 : index
    %21 = vector.load %arg14[%c0_24, %c0_25] : memref<120x32xf32, #tpu.memory_space<vmem>>, vector<120x32xf32>
    tpu.vector_store %arg14[%c0_24, %c0_25], %20 {strides = array<i32>} : memref<120x32xf32, #tpu.memory_space<vmem>>, vector<120x32xf32>,
    %c0_26 = arith.constant 0 : index
    %c12 = arith.constant 12 : index
    %c0_27 = arith.constant 0 : index
    %22 = vector.load %arg1[%c0_26, %c12, %c0_27] : memref<1x136x16xbf16, #tpu.memory_space<vmem>>, vector<1x120x16xbf16>
    %23 = vector.shape_cast %22 : vector<1x120x16xbf16> to vector<120x16xbf16>
    %c3 = arith.constant 3 : index
    %c0_28 = arith.constant 0 : index
    %c0_29 = arith.constant 0 : index
    %24 = vector.load %arg2[%c3, %c0_28, %c0_29] : memref<4x16x32xbf16, #tpu.memory_space<vmem>>, vector<1x16x32xbf16>
    %25 = vector.shape_cast %24 : vector<1x16x32xbf16> to vector<16x32xbf16>
    %cst_30 = arith.constant dense<0.000000e+00> : vector<120x32xf32>
    %26 = tpu.matmul %23, %25, %cst_30 {dimension_numbers = #tpu.dot_dimension_numbers<[1], [0], [0], [1], [0, 0, 1, 1], [], []>} : vector<120x16xbf16>, vector<16x32xbf16>, vector<120x32xf32> -> vector<120x32xf32>
    %c0_31 = arith.constant 0 : index
    %c0_32 = arith.constant 0 : index
    %27 = vector.load %arg14[%c0_31, %c0_32] : memref<120x32xf32, #tpu.memory_space<vmem>>, vector<120x32xf32>
    %28 = arith.addf %27, %26 : vector<120x32xf32>
    %c0_33 = arith.constant 0 : index
    %c0_34 = arith.constant 0 : index
    %29 = vector.load %arg14[%c0_33, %c0_34] : memref<120x32xf32, #tpu.memory_space<vmem>>, vector<120x32xf32>
    tpu.vector_store %arg14[%c0_33, %c0_34], %28 {strides = array<i32>} : memref<120x32xf32, #tpu.memory_space<vmem>>, vector<120x32xf32>,
    %c0_35 = arith.constant 0 : index
    %c0_36 = arith.constant 0 : index
    %30 = vector.load %arg3[%c0_35, %c0_36] : memref<2x32xf32, #tpu.memory_space<vmem>>, vector<1x32xf32>
    %c1_37 = arith.constant 1 : index
    %c0_38 = arith.constant 0 : index
    %31 = vector.load %arg3[%c1_37, %c0_38] : memref<2x32xf32, #tpu.memory_space<vmem>>, vector<1x32xf32>
    %c0_39 = arith.constant 0 : index
    %c0_40 = arith.constant 0 : index
    %32 = vector.load %arg14[%c0_39, %c0_40] : memref<120x32xf32, #tpu.memory_space<vmem>>, vector<120x32xf32>
    %33 = vector.broadcast %30 : vector<1x32xf32> to vector<120x32xf32>
    %34 = arith.mulf %32, %33 : vector<120x32xf32>
    %35 = vector.broadcast %31 : vector<1x32xf32> to vector<120x32xf32>
    %36 = arith.addf %34, %35 : vector<120x32xf32>
    %cst_41 = arith.constant 0.000000e+00 : f32
    %37 = vector.broadcast %cst_41 : f32 to vector<120x32xf32>
    %38 = arith.maximumf %36, %37 : vector<120x32xf32>
    %39 = arith.truncf %38 : vector<120x32xf32> to vector<120x32xbf16>
    %c0_42 = arith.constant 0 : index
    %c0_43 = arith.constant 0 : index
    %40 = vector.load %arg11[%c0_42, %c0_43] : memref<120x32xbf16, #tpu.memory_space<vmem>>, vector<120x32xbf16>
    tpu.vector_store %arg11[%c0_42, %c0_43], %39 {strides = array<i32>} : memref<120x32xbf16, #tpu.memory_space<vmem>>, vector<120x32xbf16>,
    %c0_44 = arith.constant 0 : index
    %c0_45 = arith.constant 0 : index
    %41 = vector.load %arg11[%c0_44, %c0_45] : memref<120x32xbf16, #tpu.memory_space<vmem>>, vector<96x32xbf16>
    %c0_46 = arith.constant 0 : index
    %c0_47 = arith.constant 0 : index
    %c0_48 = arith.constant 0 : index
    %42 = vector.load %arg4[%c0_46, %c0_47, %c0_48] : memref<9x32x32xbf16, #tpu.memory_space<vmem>>, vector<1x32x32xbf16>
    %43 = vector.shape_cast %42 : vector<1x32x32xbf16> to vector<32x32xbf16>
    %cst_49 = arith.constant dense<0.000000e+00> : vector<96x32xf32>
    %44 = tpu.matmul %41, %43, %cst_49 {dimension_numbers = #tpu.dot_dimension_numbers<[1], [0], [0], [1], [0, 0, 1, 1], [], []>} : vector<96x32xbf16>, vector<32x32xbf16>, vector<96x32xf32> -> vector<96x32xf32>
    %c0_50 = arith.constant 0 : index
    %c0_51 = arith.constant 0 : index
    %45 = vector.load %arg14[%c0_50, %c0_51] : memref<120x32xf32, #tpu.memory_space<vmem>>, vector<96x32xf32>
    tpu.vector_store %arg14[%c0_50, %c0_51], %44 {strides = array<i32>} : memref<120x32xf32, #tpu.memory_space<vmem>>, vector<96x32xf32>,
    %c1_52 = arith.constant 1 : index
    %c0_53 = arith.constant 0 : index
    %46 = vector.load %arg11[%c1_52, %c0_53] : memref<120x32xbf16, #tpu.memory_space<vmem>>, vector<96x32xbf16>
    %c1_54 = arith.constant 1 : index
    %c0_55 = arith.constant 0 : index
    %c0_56 = arith.constant 0 : index
    %47 = vector.load %arg4[%c1_54, %c0_55, %c0_56] : memref<9x32x32xbf16, #tpu.memory_space<vmem>>, vector<1x32x32xbf16>
    %48 = vector.shape_cast %47 : vector<1x32x32xbf16> to vector<32x32xbf16>
    %cst_57 = arith.constant dense<0.000000e+00> : vector<96x32xf32>
    %49 = tpu.matmul %46, %48, %cst_57 {dimension_numbers = #tpu.dot_dimension_numbers<[1], [0], [0], [1], [0, 0, 1, 1], [], []>} : vector<96x32xbf16>, vector<32x32xbf16>, vector<96x32xf32> -> vector<96x32xf32>
    %c0_58 = arith.constant 0 : index
    %c0_59 = arith.constant 0 : index
    %50 = vector.load %arg14[%c0_58, %c0_59] : memref<120x32xf32, #tpu.memory_space<vmem>>, vector<96x32xf32>
    %51 = arith.addf %50, %49 : vector<96x32xf32>
    %c0_60 = arith.constant 0 : index
    %c0_61 = arith.constant 0 : index
    %52 = vector.load %arg14[%c0_60, %c0_61] : memref<120x32xf32, #tpu.memory_space<vmem>>, vector<96x32xf32>
    tpu.vector_store %arg14[%c0_60, %c0_61], %51 {strides = array<i32>} : memref<120x32xf32, #tpu.memory_space<vmem>>, vector<96x32xf32>,
    %c2_62 = arith.constant 2 : index
    %c0_63 = arith.constant 0 : index
    %53 = vector.load %arg11[%c2_62, %c0_63] : memref<120x32xbf16, #tpu.memory_space<vmem>>, vector<96x32xbf16>
    %c2_64 = arith.constant 2 : index
    %c0_65 = arith.constant 0 : index
    %c0_66 = arith.constant 0 : index
    %54 = vector.load %arg4[%c2_64, %c0_65, %c0_66] : memref<9x32x32xbf16, #tpu.memory_space<vmem>>, vector<1x32x32xbf16>
    %55 = vector.shape_cast %54 : vector<1x32x32xbf16> to vector<32x32xbf16>
    %cst_67 = arith.constant dense<0.000000e+00> : vector<96x32xf32>
    %56 = tpu.matmul %53, %55, %cst_67 {dimension_numbers = #tpu.dot_dimension_numbers<[1], [0], [0], [1], [0, 0, 1, 1], [], []>} : vector<96x32xbf16>, vector<32x32xbf16>, vector<96x32xf32> -> vector<96x32xf32>
    %c0_68 = arith.constant 0 : index
    %c0_69 = arith.constant 0 : index
    %57 = vector.load %arg14[%c0_68, %c0_69] : memref<120x32xf32, #tpu.memory_space<vmem>>, vector<96x32xf32>
    %58 = arith.addf %57, %56 : vector<96x32xf32>
    %c0_70 = arith.constant 0 : index
    %c0_71 = arith.constant 0 : index
    %59 = vector.load %arg14[%c0_70, %c0_71] : memref<120x32xf32, #tpu.memory_space<vmem>>, vector<96x32xf32>
    tpu.vector_store %arg14[%c0_70, %c0_71], %58 {strides = array<i32>} : memref<120x32xf32, #tpu.memory_space<vmem>>, vector<96x32xf32>,
    %c11_72 = arith.constant 11 : index
    %c0_73 = arith.constant 0 : index
    %60 = vector.load %arg11[%c11_72, %c0_73] : memref<120x32xbf16, #tpu.memory_space<vmem>>, vector<96x32xbf16>
    %c3_74 = arith.constant 3 : index
    %c0_75 = arith.constant 0 : index
    %c0_76 = arith.constant 0 : index
    %61 = vector.load %arg4[%c3_74, %c0_75, %c0_76] : memref<9x32x32xbf16, #tpu.memory_space<vmem>>, vector<1x32x32xbf16>
    %62 = vector.shape_cast %61 : vector<1x32x32xbf16> to vector<32x32xbf16>
    %cst_77 = arith.constant dense<0.000000e+00> : vector<96x32xf32>
    %63 = tpu.matmul %60, %62, %cst_77 {dimension_numbers = #tpu.dot_dimension_numbers<[1], [0], [0], [1], [0, 0, 1, 1], [], []>} : vector<96x32xbf16>, vector<32x32xbf16>, vector<96x32xf32> -> vector<96x32xf32>
    %c0_78 = arith.constant 0 : index
    %c0_79 = arith.constant 0 : index
    %64 = vector.load %arg14[%c0_78, %c0_79] : memref<120x32xf32, #tpu.memory_space<vmem>>, vector<96x32xf32>
    %65 = arith.addf %64, %63 : vector<96x32xf32>
    %c0_80 = arith.constant 0 : index
    %c0_81 = arith.constant 0 : index
    %66 = vector.load %arg14[%c0_80, %c0_81] : memref<120x32xf32, #tpu.memory_space<vmem>>, vector<96x32xf32>
    tpu.vector_store %arg14[%c0_80, %c0_81], %65 {strides = array<i32>} : memref<120x32xf32, #tpu.memory_space<vmem>>, vector<96x32xf32>,
    %c12_82 = arith.constant 12 : index
    %c0_83 = arith.constant 0 : index
    %67 = vector.load %arg11[%c12_82, %c0_83] : memref<120x32xbf16, #tpu.memory_space<vmem>>, vector<96x32xbf16>
    %c4 = arith.constant 4 : index
    %c0_84 = arith.constant 0 : index
    %c0_85 = arith.constant 0 : index
    %68 = vector.load %arg4[%c4, %c0_84, %c0_85] : memref<9x32x32xbf16, #tpu.memory_space<vmem>>, vector<1x32x32xbf16>
    %69 = vector.shape_cast %68 : vector<1x32x32xbf16> to vector<32x32xbf16>
    %cst_86 = arith.constant dense<0.000000e+00> : vector<96x32xf32>
    %70 = tpu.matmul %67, %69, %cst_86 {dimension_numbers = #tpu.dot_dimension_numbers<[1], [0], [0], [1], [0, 0, 1, 1], [], []>} : vector<96x32xbf16>, vector<32x32xbf16>, vector<96x32xf32> -> vector<96x32xf32>
    %c0_87 = arith.constant 0 : index
    %c0_88 = arith.constant 0 : index
    %71 = vector.load %arg14[%c0_87, %c0_88] : memref<120x32xf32, #tpu.memory_space<vmem>>, vector<96x32xf32>
    %72 = arith.addf %71, %70 : vector<96x32xf32>
    %c0_89 = arith.constant 0 : index
    %c0_90 = arith.constant 0 : index
    %73 = vector.load %arg14[%c0_89, %c0_90] : memref<120x32xf32, #tpu.memory_space<vmem>>, vector<96x32xf32>
    tpu.vector_store %arg14[%c0_89, %c0_90], %72 {strides = array<i32>} : memref<120x32xf32, #tpu.memory_space<vmem>>, vector<96x32xf32>,
    %c13 = arith.constant 13 : index
    %c0_91 = arith.constant 0 : index
    %74 = vector.load %arg11[%c13, %c0_91] : memref<120x32xbf16, #tpu.memory_space<vmem>>, vector<96x32xbf16>
    %c5 = arith.constant 5 : index
    %c0_92 = arith.constant 0 : index
    %c0_93 = arith.constant 0 : index
    %75 = vector.load %arg4[%c5, %c0_92, %c0_93] : memref<9x32x32xbf16, #tpu.memory_space<vmem>>, vector<1x32x32xbf16>
    %76 = vector.shape_cast %75 : vector<1x32x32xbf16> to vector<32x32xbf16>
    %cst_94 = arith.constant dense<0.000000e+00> : vector<96x32xf32>
    %77 = tpu.matmul %74, %76, %cst_94 {dimension_numbers = #tpu.dot_dimension_numbers<[1], [0], [0], [1], [0, 0, 1, 1], [], []>} : vector<96x32xbf16>, vector<32x32xbf16>, vector<96x32xf32> -> vector<96x32xf32>
    %c0_95 = arith.constant 0 : index
    %c0_96 = arith.constant 0 : index
    %78 = vector.load %arg14[%c0_95, %c0_96] : memref<120x32xf32, #tpu.memory_space<vmem>>, vector<96x32xf32>
    %79 = arith.addf %78, %77 : vector<96x32xf32>
    %c0_97 = arith.constant 0 : index
    %c0_98 = arith.constant 0 : index
    %80 = vector.load %arg14[%c0_97, %c0_98] : memref<120x32xf32, #tpu.memory_space<vmem>>, vector<96x32xf32>
    tpu.vector_store %arg14[%c0_97, %c0_98], %79 {strides = array<i32>} : memref<120x32xf32, #tpu.memory_space<vmem>>, vector<96x32xf32>,
    %c22 = arith.constant 22 : index
    %c0_99 = arith.constant 0 : index
    %81 = vector.load %arg11[%c22, %c0_99] : memref<120x32xbf16, #tpu.memory_space<vmem>>, vector<96x32xbf16>
    %c6 = arith.constant 6 : index
    %c0_100 = arith.constant 0 : index
    %c0_101 = arith.constant 0 : index
    %82 = vector.load %arg4[%c6, %c0_100, %c0_101] : memref<9x32x32xbf16, #tpu.memory_space<vmem>>, vector<1x32x32xbf16>
    %83 = vector.shape_cast %82 : vector<1x32x32xbf16> to vector<32x32xbf16>
    %cst_102 = arith.constant dense<0.000000e+00> : vector<96x32xf32>
    %84 = tpu.matmul %81, %83, %cst_102 {dimension_numbers = #tpu.dot_dimension_numbers<[1], [0], [0], [1], [0, 0, 1, 1], [], []>} : vector<96x32xbf16>, vector<32x32xbf16>, vector<96x32xf32> -> vector<96x32xf32>
    %c0_103 = arith.constant 0 : index
    %c0_104 = arith.constant 0 : index
    %85 = vector.load %arg14[%c0_103, %c0_104] : memref<120x32xf32, #tpu.memory_space<vmem>>, vector<96x32xf32>
    %86 = arith.addf %85, %84 : vector<96x32xf32>
    %c0_105 = arith.constant 0 : index
    %c0_106 = arith.constant 0 : index
    %87 = vector.load %arg14[%c0_105, %c0_106] : memref<120x32xf32, #tpu.memory_space<vmem>>, vector<96x32xf32>
    tpu.vector_store %arg14[%c0_105, %c0_106], %86 {strides = array<i32>} : memref<120x32xf32, #tpu.memory_space<vmem>>, vector<96x32xf32>,
    %c23 = arith.constant 23 : index
    %c0_107 = arith.constant 0 : index
    %88 = vector.load %arg11[%c23, %c0_107] : memref<120x32xbf16, #tpu.memory_space<vmem>>, vector<96x32xbf16>
    %c7 = arith.constant 7 : index
    %c0_108 = arith.constant 0 : index
    %c0_109 = arith.constant 0 : index
    %89 = vector.load %arg4[%c7, %c0_108, %c0_109] : memref<9x32x32xbf16, #tpu.memory_space<vmem>>, vector<1x32x32xbf16>
    %90 = vector.shape_cast %89 : vector<1x32x32xbf16> to vector<32x32xbf16>
    %cst_110 = arith.constant dense<0.000000e+00> : vector<96x32xf32>
    %91 = tpu.matmul %88, %90, %cst_110 {dimension_numbers = #tpu.dot_dimension_numbers<[1], [0], [0], [1], [0, 0, 1, 1], [], []>} : vector<96x32xbf16>, vector<32x32xbf16>, vector<96x32xf32> -> vector<96x32xf32>
    %c0_111 = arith.constant 0 : index
    %c0_112 = arith.constant 0 : index
    %92 = vector.load %arg14[%c0_111, %c0_112] : memref<120x32xf32, #tpu.memory_space<vmem>>, vector<96x32xf32>
    %93 = arith.addf %92, %91 : vector<96x32xf32>
    %c0_113 = arith.constant 0 : index
    %c0_114 = arith.constant 0 : index
    %94 = vector.load %arg14[%c0_113, %c0_114] : memref<120x32xf32, #tpu.memory_space<vmem>>, vector<96x32xf32>
    tpu.vector_store %arg14[%c0_113, %c0_114], %93 {strides = array<i32>} : memref<120x32xf32, #tpu.memory_space<vmem>>, vector<96x32xf32>,
    %c24 = arith.constant 24 : index
    %c0_115 = arith.constant 0 : index
    %95 = vector.load %arg11[%c24, %c0_115] : memref<120x32xbf16, #tpu.memory_space<vmem>>, vector<96x32xbf16>
    %c8 = arith.constant 8 : index
    %c0_116 = arith.constant 0 : index
    %c0_117 = arith.constant 0 : index
    %96 = vector.load %arg4[%c8, %c0_116, %c0_117] : memref<9x32x32xbf16, #tpu.memory_space<vmem>>, vector<1x32x32xbf16>
    %97 = vector.shape_cast %96 : vector<1x32x32xbf16> to vector<32x32xbf16>
    %cst_118 = arith.constant dense<0.000000e+00> : vector<96x32xf32>
    %98 = tpu.matmul %95, %97, %cst_118 {dimension_numbers = #tpu.dot_dimension_numbers<[1], [0], [0], [1], [0, 0, 1, 1], [], []>} : vector<96x32xbf16>, vector<32x32xbf16>, vector<96x32xf32> -> vector<96x32xf32>
    %c0_119 = arith.constant 0 : index
    %c0_120 = arith.constant 0 : index
    %99 = vector.load %arg14[%c0_119, %c0_120] : memref<120x32xf32, #tpu.memory_space<vmem>>, vector<96x32xf32>
    %100 = arith.addf %99, %98 : vector<96x32xf32>
    %c0_121 = arith.constant 0 : index
    %c0_122 = arith.constant 0 : index
    %101 = vector.load %arg14[%c0_121, %c0_122] : memref<120x32xf32, #tpu.memory_space<vmem>>, vector<96x32xf32>
    tpu.vector_store %arg14[%c0_121, %c0_122], %100 {strides = array<i32>} : memref<120x32xf32, #tpu.memory_space<vmem>>, vector<96x32xf32>,
    %c0_123 = arith.constant 0 : index
    %c0_124 = arith.constant 0 : index
    %102 = vector.load %arg5[%c0_123, %c0_124] : memref<2x32xf32, #tpu.memory_space<vmem>>, vector<1x32xf32>
    %c1_125 = arith.constant 1 : index
    %c0_126 = arith.constant 0 : index
    %103 = vector.load %arg5[%c1_125, %c0_126] : memref<2x32xf32, #tpu.memory_space<vmem>>, vector<1x32xf32>
    %c0_127 = arith.constant 0 : index
    %c0_128 = arith.constant 0 : index
    %104 = vector.load %arg14[%c0_127, %c0_128] : memref<120x32xf32, #tpu.memory_space<vmem>>, vector<96x32xf32>
    %105 = vector.broadcast %102 : vector<1x32xf32> to vector<96x32xf32>
    %106 = arith.mulf %104, %105 : vector<96x32xf32>
    %107 = vector.broadcast %103 : vector<1x32xf32> to vector<96x32xf32>
    %108 = arith.addf %106, %107 : vector<96x32xf32>
    %cst_129 = arith.constant 0.000000e+00 : f32
    %109 = vector.broadcast %cst_129 : f32 to vector<96x32xf32>
    %110 = arith.maximumf %108, %109 : vector<96x32xf32>
    %111 = arith.truncf %110 : vector<96x32xf32> to vector<96x32xbf16>
    %c0_130 = arith.constant 0 : index
    %c0_131 = arith.constant 0 : index
    %112 = vector.load %arg12[%c0_130, %c0_131] : memref<96x32xbf16, #tpu.memory_space<vmem>>, vector<96x32xbf16>
    tpu.vector_store %arg12[%c0_130, %c0_131], %111 {strides = array<i32>} : memref<96x32xbf16, #tpu.memory_space<vmem>>, vector<96x32xbf16>,
    %c0_132 = arith.constant 0 : index
    %c0_133 = arith.constant 0 : index
    %113 = vector.load %arg12[%c0_132, %c0_133] : memref<96x32xbf16, #tpu.memory_space<vmem>>, vector<72x32xbf16>
    %c0_134 = arith.constant 0 : index
    %c0_135 = arith.constant 0 : index
    %c0_136 = arith.constant 0 : index
    %114 = vector.load %arg6[%c0_134, %c0_135, %c0_136] : memref<9x32x32xbf16, #tpu.memory_space<vmem>>, vector<1x32x32xbf16>
    %115 = vector.shape_cast %114 : vector<1x32x32xbf16> to vector<32x32xbf16>
    %cst_137 = arith.constant dense<0.000000e+00> : vector<72x32xf32>
    %116 = tpu.matmul %113, %115, %cst_137 {dimension_numbers = #tpu.dot_dimension_numbers<[1], [0], [0], [1], [0, 0, 1, 1], [], []>} : vector<72x32xbf16>, vector<32x32xbf16>, vector<72x32xf32> -> vector<72x32xf32>
    %c0_138 = arith.constant 0 : index
    %c0_139 = arith.constant 0 : index
    %117 = vector.load %arg14[%c0_138, %c0_139] : memref<120x32xf32, #tpu.memory_space<vmem>>, vector<72x32xf32>
    tpu.vector_store %arg14[%c0_138, %c0_139], %116 {strides = array<i32>} : memref<120x32xf32, #tpu.memory_space<vmem>>, vector<72x32xf32>,
    %c1_140 = arith.constant 1 : index
    %c0_141 = arith.constant 0 : index
    %118 = vector.load %arg12[%c1_140, %c0_141] : memref<96x32xbf16, #tpu.memory_space<vmem>>, vector<72x32xbf16>
    %c1_142 = arith.constant 1 : index
    %c0_143 = arith.constant 0 : index
    %c0_144 = arith.constant 0 : index
    %119 = vector.load %arg6[%c1_142, %c0_143, %c0_144] : memref<9x32x32xbf16, #tpu.memory_space<vmem>>, vector<1x32x32xbf16>
    %120 = vector.shape_cast %119 : vector<1x32x32xbf16> to vector<32x32xbf16>
    %cst_145 = arith.constant dense<0.000000e+00> : vector<72x32xf32>
    %121 = tpu.matmul %118, %120, %cst_145 {dimension_numbers = #tpu.dot_dimension_numbers<[1], [0], [0], [1], [0, 0, 1, 1], [], []>} : vector<72x32xbf16>, vector<32x32xbf16>, vector<72x32xf32> -> vector<72x32xf32>
    %c0_146 = arith.constant 0 : index
    %c0_147 = arith.constant 0 : index
    %122 = vector.load %arg14[%c0_146, %c0_147] : memref<120x32xf32, #tpu.memory_space<vmem>>, vector<72x32xf32>
    %123 = arith.addf %122, %121 : vector<72x32xf32>
    %c0_148 = arith.constant 0 : index
    %c0_149 = arith.constant 0 : index
    %124 = vector.load %arg14[%c0_148, %c0_149] : memref<120x32xf32, #tpu.memory_space<vmem>>, vector<72x32xf32>
    tpu.vector_store %arg14[%c0_148, %c0_149], %123 {strides = array<i32>} : memref<120x32xf32, #tpu.memory_space<vmem>>, vector<72x32xf32>,
    %c2_150 = arith.constant 2 : index
    %c0_151 = arith.constant 0 : index
    %125 = vector.load %arg12[%c2_150, %c0_151] : memref<96x32xbf16, #tpu.memory_space<vmem>>, vector<72x32xbf16>
    %c2_152 = arith.constant 2 : index
    %c0_153 = arith.constant 0 : index
    %c0_154 = arith.constant 0 : index
    %126 = vector.load %arg6[%c2_152, %c0_153, %c0_154] : memref<9x32x32xbf16, #tpu.memory_space<vmem>>, vector<1x32x32xbf16>
    %127 = vector.shape_cast %126 : vector<1x32x32xbf16> to vector<32x32xbf16>
    %cst_155 = arith.constant dense<0.000000e+00> : vector<72x32xf32>
    %128 = tpu.matmul %125, %127, %cst_155 {dimension_numbers = #tpu.dot_dimension_numbers<[1], [0], [0], [1], [0, 0, 1, 1], [], []>} : vector<72x32xbf16>, vector<32x32xbf16>, vector<72x32xf32> -> vector<72x32xf32>
    %c0_156 = arith.constant 0 : index
    %c0_157 = arith.constant 0 : index
    %129 = vector.load %arg14[%c0_156, %c0_157] : memref<120x32xf32, #tpu.memory_space<vmem>>, vector<72x32xf32>
    %130 = arith.addf %129, %128 : vector<72x32xf32>
    %c0_158 = arith.constant 0 : index
    %c0_159 = arith.constant 0 : index
    %131 = vector.load %arg14[%c0_158, %c0_159] : memref<120x32xf32, #tpu.memory_space<vmem>>, vector<72x32xf32>
    tpu.vector_store %arg14[%c0_158, %c0_159], %130 {strides = array<i32>} : memref<120x32xf32, #tpu.memory_space<vmem>>, vector<72x32xf32>,
    %c11_160 = arith.constant 11 : index
    %c0_161 = arith.constant 0 : index
    %132 = vector.load %arg12[%c11_160, %c0_161] : memref<96x32xbf16, #tpu.memory_space<vmem>>, vector<72x32xbf16>
    %c3_162 = arith.constant 3 : index
    %c0_163 = arith.constant 0 : index
    %c0_164 = arith.constant 0 : index
    %133 = vector.load %arg6[%c3_162, %c0_163, %c0_164] : memref<9x32x32xbf16, #tpu.memory_space<vmem>>, vector<1x32x32xbf16>
    %134 = vector.shape_cast %133 : vector<1x32x32xbf16> to vector<32x32xbf16>
    %cst_165 = arith.constant dense<0.000000e+00> : vector<72x32xf32>
    %135 = tpu.matmul %132, %134, %cst_165 {dimension_numbers = #tpu.dot_dimension_numbers<[1], [0], [0], [1], [0, 0, 1, 1], [], []>} : vector<72x32xbf16>, vector<32x32xbf16>, vector<72x32xf32> -> vector<72x32xf32>
    %c0_166 = arith.constant 0 : index
    %c0_167 = arith.constant 0 : index
    %136 = vector.load %arg14[%c0_166, %c0_167] : memref<120x32xf32, #tpu.memory_space<vmem>>, vector<72x32xf32>
    %137 = arith.addf %136, %135 : vector<72x32xf32>
    %c0_168 = arith.constant 0 : index
    %c0_169 = arith.constant 0 : index
    %138 = vector.load %arg14[%c0_168, %c0_169] : memref<120x32xf32, #tpu.memory_space<vmem>>, vector<72x32xf32>
    tpu.vector_store %arg14[%c0_168, %c0_169], %137 {strides = array<i32>} : memref<120x32xf32, #tpu.memory_space<vmem>>, vector<72x32xf32>,
    %c12_170 = arith.constant 12 : index
    %c0_171 = arith.constant 0 : index
    %139 = vector.load %arg12[%c12_170, %c0_171] : memref<96x32xbf16, #tpu.memory_space<vmem>>, vector<72x32xbf16>
    %c4_172 = arith.constant 4 : index
    %c0_173 = arith.constant 0 : index
    %c0_174 = arith.constant 0 : index
    %140 = vector.load %arg6[%c4_172, %c0_173, %c0_174] : memref<9x32x32xbf16, #tpu.memory_space<vmem>>, vector<1x32x32xbf16>
    %141 = vector.shape_cast %140 : vector<1x32x32xbf16> to vector<32x32xbf16>
    %cst_175 = arith.constant dense<0.000000e+00> : vector<72x32xf32>
    %142 = tpu.matmul %139, %141, %cst_175 {dimension_numbers = #tpu.dot_dimension_numbers<[1], [0], [0], [1], [0, 0, 1, 1], [], []>} : vector<72x32xbf16>, vector<32x32xbf16>, vector<72x32xf32> -> vector<72x32xf32>
    %c0_176 = arith.constant 0 : index
    %c0_177 = arith.constant 0 : index
    %143 = vector.load %arg14[%c0_176, %c0_177] : memref<120x32xf32, #tpu.memory_space<vmem>>, vector<72x32xf32>
    %144 = arith.addf %143, %142 : vector<72x32xf32>
    %c0_178 = arith.constant 0 : index
    %c0_179 = arith.constant 0 : index
    %145 = vector.load %arg14[%c0_178, %c0_179] : memref<120x32xf32, #tpu.memory_space<vmem>>, vector<72x32xf32>
    tpu.vector_store %arg14[%c0_178, %c0_179], %144 {strides = array<i32>} : memref<120x32xf32, #tpu.memory_space<vmem>>, vector<72x32xf32>,
    %c13_180 = arith.constant 13 : index
    %c0_181 = arith.constant 0 : index
    %146 = vector.load %arg12[%c13_180, %c0_181] : memref<96x32xbf16, #tpu.memory_space<vmem>>, vector<72x32xbf16>
    %c5_182 = arith.constant 5 : index
    %c0_183 = arith.constant 0 : index
    %c0_184 = arith.constant 0 : index
    %147 = vector.load %arg6[%c5_182, %c0_183, %c0_184] : memref<9x32x32xbf16, #tpu.memory_space<vmem>>, vector<1x32x32xbf16>
    %148 = vector.shape_cast %147 : vector<1x32x32xbf16> to vector<32x32xbf16>
    %cst_185 = arith.constant dense<0.000000e+00> : vector<72x32xf32>
    %149 = tpu.matmul %146, %148, %cst_185 {dimension_numbers = #tpu.dot_dimension_numbers<[1], [0], [0], [1], [0, 0, 1, 1], [], []>} : vector<72x32xbf16>, vector<32x32xbf16>, vector<72x32xf32> -> vector<72x32xf32>
    %c0_186 = arith.constant 0 : index
    %c0_187 = arith.constant 0 : index
    %150 = vector.load %arg14[%c0_186, %c0_187] : memref<120x32xf32, #tpu.memory_space<vmem>>, vector<72x32xf32>
    %151 = arith.addf %150, %149 : vector<72x32xf32>
    %c0_188 = arith.constant 0 : index
    %c0_189 = arith.constant 0 : index
    %152 = vector.load %arg14[%c0_188, %c0_189] : memref<120x32xf32, #tpu.memory_space<vmem>>, vector<72x32xf32>
    tpu.vector_store %arg14[%c0_188, %c0_189], %151 {strides = array<i32>} : memref<120x32xf32, #tpu.memory_space<vmem>>, vector<72x32xf32>,
    %c22_190 = arith.constant 22 : index
    %c0_191 = arith.constant 0 : index
    %153 = vector.load %arg12[%c22_190, %c0_191] : memref<96x32xbf16, #tpu.memory_space<vmem>>, vector<72x32xbf16>
    %c6_192 = arith.constant 6 : index
    %c0_193 = arith.constant 0 : index
    %c0_194 = arith.constant 0 : index
    %154 = vector.load %arg6[%c6_192, %c0_193, %c0_194] : memref<9x32x32xbf16, #tpu.memory_space<vmem>>, vector<1x32x32xbf16>
    %155 = vector.shape_cast %154 : vector<1x32x32xbf16> to vector<32x32xbf16>
    %cst_195 = arith.constant dense<0.000000e+00> : vector<72x32xf32>
    %156 = tpu.matmul %153, %155, %cst_195 {dimension_numbers = #tpu.dot_dimension_numbers<[1], [0], [0], [1], [0, 0, 1, 1], [], []>} : vector<72x32xbf16>, vector<32x32xbf16>, vector<72x32xf32> -> vector<72x32xf32>
    %c0_196 = arith.constant 0 : index
    %c0_197 = arith.constant 0 : index
    %157 = vector.load %arg14[%c0_196, %c0_197] : memref<120x32xf32, #tpu.memory_space<vmem>>, vector<72x32xf32>
    %158 = arith.addf %157, %156 : vector<72x32xf32>
    %c0_198 = arith.constant 0 : index
    %c0_199 = arith.constant 0 : index
    %159 = vector.load %arg14[%c0_198, %c0_199] : memref<120x32xf32, #tpu.memory_space<vmem>>, vector<72x32xf32>
    tpu.vector_store %arg14[%c0_198, %c0_199], %158 {strides = array<i32>} : memref<120x32xf32, #tpu.memory_space<vmem>>, vector<72x32xf32>,
    %c23_200 = arith.constant 23 : index
    %c0_201 = arith.constant 0 : index
    %160 = vector.load %arg12[%c23_200, %c0_201] : memref<96x32xbf16, #tpu.memory_space<vmem>>, vector<72x32xbf16>
    %c7_202 = arith.constant 7 : index
    %c0_203 = arith.constant 0 : index
    %c0_204 = arith.constant 0 : index
    %161 = vector.load %arg6[%c7_202, %c0_203, %c0_204] : memref<9x32x32xbf16, #tpu.memory_space<vmem>>, vector<1x32x32xbf16>
    %162 = vector.shape_cast %161 : vector<1x32x32xbf16> to vector<32x32xbf16>
    %cst_205 = arith.constant dense<0.000000e+00> : vector<72x32xf32>
    %163 = tpu.matmul %160, %162, %cst_205 {dimension_numbers = #tpu.dot_dimension_numbers<[1], [0], [0], [1], [0, 0, 1, 1], [], []>} : vector<72x32xbf16>, vector<32x32xbf16>, vector<72x32xf32> -> vector<72x32xf32>
    %c0_206 = arith.constant 0 : index
    %c0_207 = arith.constant 0 : index
    %164 = vector.load %arg14[%c0_206, %c0_207] : memref<120x32xf32, #tpu.memory_space<vmem>>, vector<72x32xf32>
    %165 = arith.addf %164, %163 : vector<72x32xf32>
    %c0_208 = arith.constant 0 : index
    %c0_209 = arith.constant 0 : index
    %166 = vector.load %arg14[%c0_208, %c0_209] : memref<120x32xf32, #tpu.memory_space<vmem>>, vector<72x32xf32>
    tpu.vector_store %arg14[%c0_208, %c0_209], %165 {strides = array<i32>} : memref<120x32xf32, #tpu.memory_space<vmem>>, vector<72x32xf32>,
    %c24_210 = arith.constant 24 : index
    %c0_211 = arith.constant 0 : index
    %167 = vector.load %arg12[%c24_210, %c0_211] : memref<96x32xbf16, #tpu.memory_space<vmem>>, vector<72x32xbf16>
    %c8_212 = arith.constant 8 : index
    %c0_213 = arith.constant 0 : index
    %c0_214 = arith.constant 0 : index
    %168 = vector.load %arg6[%c8_212, %c0_213, %c0_214] : memref<9x32x32xbf16, #tpu.memory_space<vmem>>, vector<1x32x32xbf16>
    %169 = vector.shape_cast %168 : vector<1x32x32xbf16> to vector<32x32xbf16>
    %cst_215 = arith.constant dense<0.000000e+00> : vector<72x32xf32>
    %170 = tpu.matmul %167, %169, %cst_215 {dimension_numbers = #tpu.dot_dimension_numbers<[1], [0], [0], [1], [0, 0, 1, 1], [], []>} : vector<72x32xbf16>, vector<32x32xbf16>, vector<72x32xf32> -> vector<72x32xf32>
    %c0_216 = arith.constant 0 : index
    %c0_217 = arith.constant 0 : index
    %171 = vector.load %arg14[%c0_216, %c0_217] : memref<120x32xf32, #tpu.memory_space<vmem>>, vector<72x32xf32>
    %172 = arith.addf %171, %170 : vector<72x32xf32>
    %c0_218 = arith.constant 0 : index
    %c0_219 = arith.constant 0 : index
    %173 = vector.load %arg14[%c0_218, %c0_219] : memref<120x32xf32, #tpu.memory_space<vmem>>, vector<72x32xf32>
    tpu.vector_store %arg14[%c0_218, %c0_219], %172 {strides = array<i32>} : memref<120x32xf32, #tpu.memory_space<vmem>>, vector<72x32xf32>,
    %c0_220 = arith.constant 0 : index
    %c0_221 = arith.constant 0 : index
    %174 = vector.load %arg7[%c0_220, %c0_221] : memref<2x32xf32, #tpu.memory_space<vmem>>, vector<1x32xf32>
    %c1_222 = arith.constant 1 : index
    %c0_223 = arith.constant 0 : index
    %175 = vector.load %arg7[%c1_222, %c0_223] : memref<2x32xf32, #tpu.memory_space<vmem>>, vector<1x32xf32>
    %c0_224 = arith.constant 0 : index
    %c0_225 = arith.constant 0 : index
    %176 = vector.load %arg14[%c0_224, %c0_225] : memref<120x32xf32, #tpu.memory_space<vmem>>, vector<72x32xf32>
    %177 = vector.broadcast %174 : vector<1x32xf32> to vector<72x32xf32>
    %178 = arith.mulf %176, %177 : vector<72x32xf32>
    %179 = vector.broadcast %175 : vector<1x32xf32> to vector<72x32xf32>
    %180 = arith.addf %178, %179 : vector<72x32xf32>
    %cst_226 = arith.constant 0.000000e+00 : f32
    %181 = vector.broadcast %cst_226 : f32 to vector<72x32xf32>
    %182 = arith.maximumf %180, %181 : vector<72x32xf32>
    %183 = arith.truncf %182 : vector<72x32xf32> to vector<72x32xbf16>
    %c0_227 = arith.constant 0 : index
    %c0_228 = arith.constant 0 : index
    %184 = vector.load %arg13[%c0_227, %c0_228] : memref<72x32xbf16, #tpu.memory_space<vmem>>, vector<72x32xbf16>
    tpu.vector_store %arg13[%c0_227, %c0_228], %183 {strides = array<i32>} : memref<72x32xbf16, #tpu.memory_space<vmem>>, vector<72x32xbf16>,
    %c0_229 = arith.constant 0 : index
    %c0_230 = arith.constant 0 : index
    %185 = vector.load %arg13[%c0_229, %c0_230] : memref<72x32xbf16, #tpu.memory_space<vmem>>, vector<48x32xbf16>
    %c0_231 = arith.constant 0 : index
    %c0_232 = arith.constant 0 : index
    %c0_233 = arith.constant 0 : index
    %186 = vector.load %arg8[%c0_231, %c0_232, %c0_233] : memref<9x32x32xbf16, #tpu.memory_space<vmem>>, vector<1x32x32xbf16>
    %187 = vector.shape_cast %186 : vector<1x32x32xbf16> to vector<32x32xbf16>
    %cst_234 = arith.constant dense<0.000000e+00> : vector<48x32xf32>
    %188 = tpu.matmul %185, %187, %cst_234 {dimension_numbers = #tpu.dot_dimension_numbers<[1], [0], [0], [1], [0, 0, 1, 1], [], []>} : vector<48x32xbf16>, vector<32x32xbf16>, vector<48x32xf32> -> vector<48x32xf32>
    %c0_235 = arith.constant 0 : index
    %c0_236 = arith.constant 0 : index
    %189 = vector.load %arg14[%c0_235, %c0_236] : memref<120x32xf32, #tpu.memory_space<vmem>>, vector<48x32xf32>
    tpu.vector_store %arg14[%c0_235, %c0_236], %188 {strides = array<i32>} : memref<120x32xf32, #tpu.memory_space<vmem>>, vector<48x32xf32>,
    %c1_237 = arith.constant 1 : index
    %c0_238 = arith.constant 0 : index
    %190 = vector.load %arg13[%c1_237, %c0_238] : memref<72x32xbf16, #tpu.memory_space<vmem>>, vector<48x32xbf16>
    %c1_239 = arith.constant 1 : index
    %c0_240 = arith.constant 0 : index
    %c0_241 = arith.constant 0 : index
    %191 = vector.load %arg8[%c1_239, %c0_240, %c0_241] : memref<9x32x32xbf16, #tpu.memory_space<vmem>>, vector<1x32x32xbf16>
    %192 = vector.shape_cast %191 : vector<1x32x32xbf16> to vector<32x32xbf16>
    %cst_242 = arith.constant dense<0.000000e+00> : vector<48x32xf32>
    %193 = tpu.matmul %190, %192, %cst_242 {dimension_numbers = #tpu.dot_dimension_numbers<[1], [0], [0], [1], [0, 0, 1, 1], [], []>} : vector<48x32xbf16>, vector<32x32xbf16>, vector<48x32xf32> -> vector<48x32xf32>
    %c0_243 = arith.constant 0 : index
    %c0_244 = arith.constant 0 : index
    %194 = vector.load %arg14[%c0_243, %c0_244] : memref<120x32xf32, #tpu.memory_space<vmem>>, vector<48x32xf32>
    %195 = arith.addf %194, %193 : vector<48x32xf32>
    %c0_245 = arith.constant 0 : index
    %c0_246 = arith.constant 0 : index
    %196 = vector.load %arg14[%c0_245, %c0_246] : memref<120x32xf32, #tpu.memory_space<vmem>>, vector<48x32xf32>
    tpu.vector_store %arg14[%c0_245, %c0_246], %195 {strides = array<i32>} : memref<120x32xf32, #tpu.memory_space<vmem>>, vector<48x32xf32>,
    %c2_247 = arith.constant 2 : index
    %c0_248 = arith.constant 0 : index
    %197 = vector.load %arg13[%c2_247, %c0_248] : memref<72x32xbf16, #tpu.memory_space<vmem>>, vector<48x32xbf16>
    %c2_249 = arith.constant 2 : index
    %c0_250 = arith.constant 0 : index
    %c0_251 = arith.constant 0 : index
    %198 = vector.load %arg8[%c2_249, %c0_250, %c0_251] : memref<9x32x32xbf16, #tpu.memory_space<vmem>>, vector<1x32x32xbf16>
    %199 = vector.shape_cast %198 : vector<1x32x32xbf16> to vector<32x32xbf16>
    %cst_252 = arith.constant dense<0.000000e+00> : vector<48x32xf32>
    %200 = tpu.matmul %197, %199, %cst_252 {dimension_numbers = #tpu.dot_dimension_numbers<[1], [0], [0], [1], [0, 0, 1, 1], [], []>} : vector<48x32xbf16>, vector<32x32xbf16>, vector<48x32xf32> -> vector<48x32xf32>
    %c0_253 = arith.constant 0 : index
    %c0_254 = arith.constant 0 : index
    %201 = vector.load %arg14[%c0_253, %c0_254] : memref<120x32xf32, #tpu.memory_space<vmem>>, vector<48x32xf32>
    %202 = arith.addf %201, %200 : vector<48x32xf32>
    %c0_255 = arith.constant 0 : index
    %c0_256 = arith.constant 0 : index
    %203 = vector.load %arg14[%c0_255, %c0_256] : memref<120x32xf32, #tpu.memory_space<vmem>>, vector<48x32xf32>
    tpu.vector_store %arg14[%c0_255, %c0_256], %202 {strides = array<i32>} : memref<120x32xf32, #tpu.memory_space<vmem>>, vector<48x32xf32>,
    %c11_257 = arith.constant 11 : index
    %c0_258 = arith.constant 0 : index
    %204 = vector.load %arg13[%c11_257, %c0_258] : memref<72x32xbf16, #tpu.memory_space<vmem>>, vector<48x32xbf16>
    %c3_259 = arith.constant 3 : index
    %c0_260 = arith.constant 0 : index
    %c0_261 = arith.constant 0 : index
    %205 = vector.load %arg8[%c3_259, %c0_260, %c0_261] : memref<9x32x32xbf16, #tpu.memory_space<vmem>>, vector<1x32x32xbf16>
    %206 = vector.shape_cast %205 : vector<1x32x32xbf16> to vector<32x32xbf16>
    %cst_262 = arith.constant dense<0.000000e+00> : vector<48x32xf32>
    %207 = tpu.matmul %204, %206, %cst_262 {dimension_numbers = #tpu.dot_dimension_numbers<[1], [0], [0], [1], [0, 0, 1, 1], [], []>} : vector<48x32xbf16>, vector<32x32xbf16>, vector<48x32xf32> -> vector<48x32xf32>
    %c0_263 = arith.constant 0 : index
    %c0_264 = arith.constant 0 : index
    %208 = vector.load %arg14[%c0_263, %c0_264] : memref<120x32xf32, #tpu.memory_space<vmem>>, vector<48x32xf32>
    %209 = arith.addf %208, %207 : vector<48x32xf32>
    %c0_265 = arith.constant 0 : index
    %c0_266 = arith.constant 0 : index
    %210 = vector.load %arg14[%c0_265, %c0_266] : memref<120x32xf32, #tpu.memory_space<vmem>>, vector<48x32xf32>
    tpu.vector_store %arg14[%c0_265, %c0_266], %209 {strides = array<i32>} : memref<120x32xf32, #tpu.memory_space<vmem>>, vector<48x32xf32>,
    %c12_267 = arith.constant 12 : index
    %c0_268 = arith.constant 0 : index
    %211 = vector.load %arg13[%c12_267, %c0_268] : memref<72x32xbf16, #tpu.memory_space<vmem>>, vector<48x32xbf16>
    %c4_269 = arith.constant 4 : index
    %c0_270 = arith.constant 0 : index
    %c0_271 = arith.constant 0 : index
    %212 = vector.load %arg8[%c4_269, %c0_270, %c0_271] : memref<9x32x32xbf16, #tpu.memory_space<vmem>>, vector<1x32x32xbf16>
    %213 = vector.shape_cast %212 : vector<1x32x32xbf16> to vector<32x32xbf16>
    %cst_272 = arith.constant dense<0.000000e+00> : vector<48x32xf32>
    %214 = tpu.matmul %211, %213, %cst_272 {dimension_numbers = #tpu.dot_dimension_numbers<[1], [0], [0], [1], [0, 0, 1, 1], [], []>} : vector<48x32xbf16>, vector<32x32xbf16>, vector<48x32xf32> -> vector<48x32xf32>
    %c0_273 = arith.constant 0 : index
    %c0_274 = arith.constant 0 : index
    %215 = vector.load %arg14[%c0_273, %c0_274] : memref<120x32xf32, #tpu.memory_space<vmem>>, vector<48x32xf32>
    %216 = arith.addf %215, %214 : vector<48x32xf32>
    %c0_275 = arith.constant 0 : index
    %c0_276 = arith.constant 0 : index
    %217 = vector.load %arg14[%c0_275, %c0_276] : memref<120x32xf32, #tpu.memory_space<vmem>>, vector<48x32xf32>
    tpu.vector_store %arg14[%c0_275, %c0_276], %216 {strides = array<i32>} : memref<120x32xf32, #tpu.memory_space<vmem>>, vector<48x32xf32>,
    %c13_277 = arith.constant 13 : index
    %c0_278 = arith.constant 0 : index
    %218 = vector.load %arg13[%c13_277, %c0_278] : memref<72x32xbf16, #tpu.memory_space<vmem>>, vector<48x32xbf16>
    %c5_279 = arith.constant 5 : index
    %c0_280 = arith.constant 0 : index
    %c0_281 = arith.constant 0 : index
    %219 = vector.load %arg8[%c5_279, %c0_280, %c0_281] : memref<9x32x32xbf16, #tpu.memory_space<vmem>>, vector<1x32x32xbf16>
    %220 = vector.shape_cast %219 : vector<1x32x32xbf16> to vector<32x32xbf16>
    %cst_282 = arith.constant dense<0.000000e+00> : vector<48x32xf32>
    %221 = tpu.matmul %218, %220, %cst_282 {dimension_numbers = #tpu.dot_dimension_numbers<[1], [0], [0], [1], [0, 0, 1, 1], [], []>} : vector<48x32xbf16>, vector<32x32xbf16>, vector<48x32xf32> -> vector<48x32xf32>
    %c0_283 = arith.constant 0 : index
    %c0_284 = arith.constant 0 : index
    %222 = vector.load %arg14[%c0_283, %c0_284] : memref<120x32xf32, #tpu.memory_space<vmem>>, vector<48x32xf32>
    %223 = arith.addf %222, %221 : vector<48x32xf32>
    %c0_285 = arith.constant 0 : index
    %c0_286 = arith.constant 0 : index
    %224 = vector.load %arg14[%c0_285, %c0_286] : memref<120x32xf32, #tpu.memory_space<vmem>>, vector<48x32xf32>
    tpu.vector_store %arg14[%c0_285, %c0_286], %223 {strides = array<i32>} : memref<120x32xf32, #tpu.memory_space<vmem>>, vector<48x32xf32>,
    %c22_287 = arith.constant 22 : index
    %c0_288 = arith.constant 0 : index
    %225 = vector.load %arg13[%c22_287, %c0_288] : memref<72x32xbf16, #tpu.memory_space<vmem>>, vector<48x32xbf16>
    %c6_289 = arith.constant 6 : index
    %c0_290 = arith.constant 0 : index
    %c0_291 = arith.constant 0 : index
    %226 = vector.load %arg8[%c6_289, %c0_290, %c0_291] : memref<9x32x32xbf16, #tpu.memory_space<vmem>>, vector<1x32x32xbf16>
    %227 = vector.shape_cast %226 : vector<1x32x32xbf16> to vector<32x32xbf16>
    %cst_292 = arith.constant dense<0.000000e+00> : vector<48x32xf32>
    %228 = tpu.matmul %225, %227, %cst_292 {dimension_numbers = #tpu.dot_dimension_numbers<[1], [0], [0], [1], [0, 0, 1, 1], [], []>} : vector<48x32xbf16>, vector<32x32xbf16>, vector<48x32xf32> -> vector<48x32xf32>
    %c0_293 = arith.constant 0 : index
    %c0_294 = arith.constant 0 : index
    %229 = vector.load %arg14[%c0_293, %c0_294] : memref<120x32xf32, #tpu.memory_space<vmem>>, vector<48x32xf32>
    %230 = arith.addf %229, %228 : vector<48x32xf32>
    %c0_295 = arith.constant 0 : index
    %c0_296 = arith.constant 0 : index
    %231 = vector.load %arg14[%c0_295, %c0_296] : memref<120x32xf32, #tpu.memory_space<vmem>>, vector<48x32xf32>
    tpu.vector_store %arg14[%c0_295, %c0_296], %230 {strides = array<i32>} : memref<120x32xf32, #tpu.memory_space<vmem>>, vector<48x32xf32>,
    %c23_297 = arith.constant 23 : index
    %c0_298 = arith.constant 0 : index
    %232 = vector.load %arg13[%c23_297, %c0_298] : memref<72x32xbf16, #tpu.memory_space<vmem>>, vector<48x32xbf16>
    %c7_299 = arith.constant 7 : index
    %c0_300 = arith.constant 0 : index
    %c0_301 = arith.constant 0 : index
    %233 = vector.load %arg8[%c7_299, %c0_300, %c0_301] : memref<9x32x32xbf16, #tpu.memory_space<vmem>>, vector<1x32x32xbf16>
    %234 = vector.shape_cast %233 : vector<1x32x32xbf16> to vector<32x32xbf16>
    %cst_302 = arith.constant dense<0.000000e+00> : vector<48x32xf32>
    %235 = tpu.matmul %232, %234, %cst_302 {dimension_numbers = #tpu.dot_dimension_numbers<[1], [0], [0], [1], [0, 0, 1, 1], [], []>} : vector<48x32xbf16>, vector<32x32xbf16>, vector<48x32xf32> -> vector<48x32xf32>
    %c0_303 = arith.constant 0 : index
    %c0_304 = arith.constant 0 : index
    %236 = vector.load %arg14[%c0_303, %c0_304] : memref<120x32xf32, #tpu.memory_space<vmem>>, vector<48x32xf32>
    %237 = arith.addf %236, %235 : vector<48x32xf32>
    %c0_305 = arith.constant 0 : index
    %c0_306 = arith.constant 0 : index
    %238 = vector.load %arg14[%c0_305, %c0_306] : memref<120x32xf32, #tpu.memory_space<vmem>>, vector<48x32xf32>
    tpu.vector_store %arg14[%c0_305, %c0_306], %237 {strides = array<i32>} : memref<120x32xf32, #tpu.memory_space<vmem>>, vector<48x32xf32>,
    %c24_307 = arith.constant 24 : index
    %c0_308 = arith.constant 0 : index
    %239 = vector.load %arg13[%c24_307, %c0_308] : memref<72x32xbf16, #tpu.memory_space<vmem>>, vector<48x32xbf16>
    %c8_309 = arith.constant 8 : index
    %c0_310 = arith.constant 0 : index
    %c0_311 = arith.constant 0 : index
    %240 = vector.load %arg8[%c8_309, %c0_310, %c0_311] : memref<9x32x32xbf16, #tpu.memory_space<vmem>>, vector<1x32x32xbf16>
    %241 = vector.shape_cast %240 : vector<1x32x32xbf16> to vector<32x32xbf16>
    %cst_312 = arith.constant dense<0.000000e+00> : vector<48x32xf32>
    %242 = tpu.matmul %239, %241, %cst_312 {dimension_numbers = #tpu.dot_dimension_numbers<[1], [0], [0], [1], [0, 0, 1, 1], [], []>} : vector<48x32xbf16>, vector<32x32xbf16>, vector<48x32xf32> -> vector<48x32xf32>
    %c0_313 = arith.constant 0 : index
    %c0_314 = arith.constant 0 : index
    %243 = vector.load %arg14[%c0_313, %c0_314] : memref<120x32xf32, #tpu.memory_space<vmem>>, vector<48x32xf32>
    %244 = arith.addf %243, %242 : vector<48x32xf32>
    %c0_315 = arith.constant 0 : index
    %c0_316 = arith.constant 0 : index
    %245 = vector.load %arg14[%c0_315, %c0_316] : memref<120x32xf32, #tpu.memory_space<vmem>>, vector<48x32xf32>
    tpu.vector_store %arg14[%c0_315, %c0_316], %244 {strides = array<i32>} : memref<120x32xf32, #tpu.memory_space<vmem>>, vector<48x32xf32>,
    %c0_317 = arith.constant 0 : index
    %c0_318 = arith.constant 0 : index
    %246 = vector.load %arg9[%c0_317, %c0_318] : memref<2x32xf32, #tpu.memory_space<vmem>>, vector<1x32xf32>
    %c1_319 = arith.constant 1 : index
    %c0_320 = arith.constant 0 : index
    %247 = vector.load %arg9[%c1_319, %c0_320] : memref<2x32xf32, #tpu.memory_space<vmem>>, vector<1x32xf32>
    %c0_321 = arith.constant 0 : index
    %c0_322 = arith.constant 0 : index
    %248 = vector.load %arg14[%c0_321, %c0_322] : memref<120x32xf32, #tpu.memory_space<vmem>>, vector<48x32xf32>
    %249 = vector.broadcast %246 : vector<1x32xf32> to vector<48x32xf32>
    %250 = arith.mulf %248, %249 : vector<48x32xf32>
    %251 = vector.broadcast %247 : vector<1x32xf32> to vector<48x32xf32>
    %252 = arith.addf %250, %251 : vector<48x32xf32>
    %cst_323 = arith.constant 0.000000e+00 : f32
    %253 = vector.broadcast %cst_323 : f32 to vector<48x32xf32>
    %254 = arith.maximumf %252, %253 : vector<48x32xf32>
    %c0_324 = arith.constant 0 : index
    %c0_325 = arith.constant 0 : index
    %c0_326 = arith.constant 0 : index
    %255 = vector.load %arg10[%c0_324, %c0_325, %c0_326] : memref<1x48x32xf32, #tpu.memory_space<vmem>>, vector<1x48x32xf32>
    %256 = vector.shape_cast %255 : vector<1x48x32xf32> to vector<48x32xf32>
    %257 = vector.shape_cast %254 : vector<48x32xf32> to vector<1x48x32xf32>
    tpu.vector_store %arg10[%c0_324, %c0_325, %c0_326], %257 {strides = array<i32>} : memref<1x48x32xf32, #tpu.memory_space<vmem>>, vector<1x48x32xf32>,
    return
  }
  func.func @transform_0(%arg0: i32) -> (i32, i32, i32) {
    %c0_i32 = arith.constant 0 : i32
    %c0_i32_0 = arith.constant 0 : i32
    %c0_i32_1 = arith.constant 0 : i32
    return %arg0, %c0_i32, %c0_i32_0 : i32, i32, i32
  }
  func.func @transform_1(%arg0: i32) -> (i32, i32, i32) {
    %c0_i32 = arith.constant 0 : i32
    %c0_i32_0 = arith.constant 0 : i32
    %c0_i32_1 = arith.constant 0 : i32
    %c0_i32_2 = arith.constant 0 : i32
    return %c0_i32, %c0_i32_0, %c0_i32_1 : i32, i32, i32
  }
  func.func @transform_2(%arg0: i32) -> (i32, i32) {
    %c0_i32 = arith.constant 0 : i32
    %c0_i32_0 = arith.constant 0 : i32
    %c0_i32_1 = arith.constant 0 : i32
    return %c0_i32, %c0_i32_0 : i32, i32
  }
  func.func @transform_3(%arg0: i32) -> (i32, i32, i32) {
    %c0_i32 = arith.constant 0 : i32
    %c0_i32_0 = arith.constant 0 : i32
    %c0_i32_1 = arith.constant 0 : i32
    %c0_i32_2 = arith.constant 0 : i32
    return %c0_i32, %c0_i32_0, %c0_i32_1 : i32, i32, i32
  }
  func.func @transform_4(%arg0: i32) -> (i32, i32) {
    %c0_i32 = arith.constant 0 : i32
    %c0_i32_0 = arith.constant 0 : i32
    %c0_i32_1 = arith.constant 0 : i32
    return %c0_i32, %c0_i32_0 : i32, i32
  }
  func.func @transform_5(%arg0: i32) -> (i32, i32, i32) {
    %c0_i32 = arith.constant 0 : i32
    %c0_i32_0 = arith.constant 0 : i32
    %c0_i32_1 = arith.constant 0 : i32
    %c0_i32_2 = arith.constant 0 : i32
    return %c0_i32, %c0_i32_0, %c0_i32_1 : i32, i32, i32
  }
  func.func @transform_6(%arg0: i32) -> (i32, i32) {
    %c0_i32 = arith.constant 0 : i32
    %c0_i32_0 = arith.constant 0 : i32
    %c0_i32_1 = arith.constant 0 : i32
    return %c0_i32, %c0_i32_0 : i32, i32
  }
  func.func @transform_7(%arg0: i32) -> (i32, i32, i32) {
    %c0_i32 = arith.constant 0 : i32
    %c0_i32_0 = arith.constant 0 : i32
    %c0_i32_1 = arith.constant 0 : i32
    %c0_i32_2 = arith.constant 0 : i32
    return %c0_i32, %c0_i32_0, %c0_i32_1 : i32, i32, i32
  }
  func.func @transform_8(%arg0: i32) -> (i32, i32) {
    %c0_i32 = arith.constant 0 : i32
    %c0_i32_0 = arith.constant 0 : i32
    %c0_i32_1 = arith.constant 0 : i32
    return %c0_i32, %c0_i32_0 : i32, i32
  }
  func.func @transform_9(%arg0: i32) -> (i32, i32, i32) {
    %c0_i32 = arith.constant 0 : i32
    %c0_i32_0 = arith.constant 0 : i32
    %c0_i32_1 = arith.constant 0 : i32
    return %arg0, %c0_i32, %c0_i32_0 : i32, i32, i32
  }
}

</mosaic_0001>

<bundles_post_ra>
// kernel: encoder_forward.1
= control target key start
LH: loop header
LB: loop body
LE: loop exit
PB: predicated region body
PF: predicated region fallthrough
CT: control target
= control target key end

     0   :  { %s8463_s30 = smov 0   ;;  %s9658_s0 = inlined_call_operand.vmem [shape: bf16[2,136,16], index: 0, kind: input, shape index: {}]   ;;  %s9659_s1 = inlined_call_operand.vmem [shape: bf16[4,16,32], index: 1, kind: input, shape index: {}]   ;;  %s9660_s2 = inlined_call_operand.vmem [shape: f32[2,32], index: 2, kind: input, shape index: {}]   ;;  %s9661_s3 = inlined_call_operand.vmem [shape: bf16[9,32,32], index: 3, kind: input, shape index: {}]   ;;  %s9662_s4 = inlined_call_operand.vmem [shape: f32[2,32], index: 4, kind: input, shape index: {}]   ;;  %s9663_s5 = inlined_call_operand.vmem [shape: bf16[9,32,32], index: 5, kind: input, shape index: {}]   ;;  %s9664_s6 = inlined_call_operand.vmem [shape: f32[2,32], index: 6, kind: input, shape index: {}]   ;;  %s9665_s7 = inlined_call_operand.vmem [shape: bf16[9,32,32], index: 7, kind: input, shape index: {}]   ;;  %s9666_s8 = inlined_call_operand.vmem [shape: f32[2,32], index: 8, kind: input, shape index: {}]   ;;  %s9667_s9 = inlined_call_operand.vmem [shape: f32[2,48,32], index: 9, kind: output, shape index: {}]  }
   0x1 LB: > { %s6790_s10 = sadd.s32 4294967295, %s8409_s30   ;;  %p6794_p0 = scmp.ge.s32.totalorder %s8409_s30, 1  ;;  %s8409_s30 = sphi %s8463_s30, %s19_s30  }
   0x2   : > { %p287_p1 = scmp.lt.s32.totalorder %s8409_s30, 3 }
   0x4   : > { %p288_p2 = pnand %p6794_p0, %p287_p1 }
   0x5   : > { %p323_p3 = scmp.lt.s32.totalorder (!%p288_p2), %s6790_s10, 1 }
   0x6   : > { %291 = sbr.rel (%p288_p2) target bundleno = 1317 (0x525), region = 56 }
   0xb   : > { %v8173_v0 = vld [vmem:[%s9659_s1] sm:$0xff]   ;;  %v8175_v1 = vld [vmem:[%s9659_s1 + $0x10] sm:$0xff]   ;;  %s9669_s10 = smov (!%p323_p3, %s6790_s10), 1  ;;  %v8177_v2 = vld [vmem:[%s9659_s1 + $0x8] sm:$0xff]   ;;  %vm395_vm0 = vcmask 130048   ;;  %vm1187_vm3 = vcmask 1045504  }
   0xc   : > { %7585 = vmatprep.subr.bf16.mxu0 %v8173_v0  ;;  %s8161_s17 = smul.u32 68, %s9669_s10  ;;  %7603 = vmatprep.subr.bf16.mxu1 %v8177_v2  ;;  %v8183_v3 = vld [vmem:[%s9659_s1 + $0x18] sm:$0xff]   ;;  %vm591_vm1 = vsmask.f32 7424  ;;  %vm885_vm2 = vsmask.f32 6400 }
   0xd   : > { %7586 = vmatpush3.bf16.msra.mxu0 %v8173_v0  ;;  %7604 = vmatpush3.bf16.msra.mxu1 %v8177_v2  ;;  %vm516_vm4 = vcmask 261120   ;;  %vm1505_vm5 = vcmask 257024   ;;  %vm1991_vm6 = vcmask 1046528   ;;  %vm2674_vm7 = vsmask.f32 5376  ;;  %s8162_s12 = smul.u32 48, %s9669_s10 }
   0xe   : > { %7621 = vmatprep.subr.bf16.mxu0 %v8175_v1  ;;  %s8489_s22 = scalar_lea.vmem %s9658_s0, %s8161_s17  ;;  %7639 = vmatprep.subr.bf16.mxu1 %v8183_v3  ;;  %vm2935_vm8 = vcmask 1044480   ;;  %vm3147_vm9 = vsmask.f32 4352  ;;  %vm8412_vm10 = vmmov 0  }
   0xf   : > { %v8174_v4 = vld [vmem:[%s8489_s22] sm:$0xff]   ;;  %v8176_v5 = vld [vmem:[%s8489_s22 + $0x8] sm:$0xff]   ;;  %v8180_v8 = vld [vmem:[%s8489_s22 + $0x10] sm:$0xff]   ;;  %s9638_s16 = scalar_lea.vmem %s9667_s9, %s8162_s12 }
  0x10   : > { %7587 = vmatprep.mubr.msk.bf16.mxu0 %vm395_vm0, %v8174_v4  ;;  %v8178_v6 = vld [vmem:[%s8489_s22] sm:$0xff]   ;;  %v8179_v7 = vld [vmem:[%s8489_s22 + $0x8] sm:$0xff]   ;;  %v8181_v13 = vld [vmem:[%s8489_s22 + $0x10] sm:$0xff]  }
  0x11   : > { %7588 = vmatmul.mubr.msk.bf16.vlgmr.msra.gmra.mxu0 %vm395_vm0, %v8176_v5  ;;  %v593_v9 = vshrl.u32 %v8178_v6, 16  ;;  %v595_v10 = vshll.u32 %v8178_v6, 16  ;;  %v600_v11 = vshll.u32 %v8179_v7, 16  ;;  %v604_v12 = vshrl.u32 %v8179_v7, 16  ;;  %v8182_v16 = vld [vmem:[%s8489_s22 + $0x18] sm:$0xff]   ;;  %v8185_v23 = vld [vmem:[%s8489_s22 + $0x20] sm:$0xff]  }
  0x12   : > { %7622 = vmatpush3.bf16.msra.mxu0 %v8175_v1  ;;  %7591 = vmatprep.mubr.msk.bf16.mxu0 %vm395_vm0, %v8180_v8  ;;  %v8184_v17 = vld [vmem:[%s8489_s22 + $0x18] sm:$0xff]   ;;  %v608_v18 = vshll.u32 %v8181_v13, 16  ;;  %v612_v19 = vshrl.u32 %v8181_v13, 16  ;;  %v8186_v25 = vld [vmem:[%s8489_s22 + $0x20] sm:$0xff]   ;;  %v8188_v32 = vld [vmem:[%s8489_s22 + $0x28] sm:$0xff]  }
  0x13   : > { %v597_v14 = vrot.slane %v595_v10, 1  ;;  %v602_v15 = vrot.slane %v600_v11, 1  ;;  %v616_v22 = vshll.u32 %v8184_v17, 16  ;;  %v620_v28 = vshrl.u32 %v8184_v17, 16  ;;  %v8187_v37 = vld [vmem:[%s8489_s22 + $0x28] sm:$0xff]   ;;  %v8190_v39 = vld [vmem:[%s8489_s22 + $0x30] sm:$0xff]  }
  0x14   : > { %v610_v24 = vrot.slane %v608_v18, 1  ;;  %v624_v31 = vshll.u32 %v8186_v25, 16  ;;  %v628_v33 = vshrl.u32 %v8186_v25, 16  ;;  %v632_v38 = vshll.u32 %v8188_v32, 16  ;;  %v8194_v40 = vld [vmem:[%s8489_s22 + $0xc] sm:$0xff]   ;;  %v8195_v57 = vld [vmem:[%s8489_s22 + $0x14] sm:$0xff]  }
  0x15   : > { %v598_v20 = vor.u32 %v597_v14, %v593_v9  ;;  %v606_v21 = vor.u32 %v604_v12, %v602_v15  ;;  %v618_v27 = vrot.slane %v616_v22, 1  ;;  %v8189_v42 = vld [vmem:[%s8489_s22 + $0x30] sm:$0xff]   ;;  %v636_v43 = vshrl.u32 %v8188_v32, 16  ;;  %v8518_v46 = vld [vmem:[%s8489_s22 + $0x38] sm:$0x1f]  }
  0x16   : > { %v614_v30 = vor.u32 %v612_v19, %v610_v24  ;;  %v626_v36 = vrot.slane %v624_v31, 1  ;;  %v634_v44 = vrot.slane %v632_v38, 1  ;;  %v640_v45 = vshll.u32 %v8190_v39, 16  ;;  %v8193_v53 = vld [vmem:[%s8489_s22 + $0x4] sm:$0xfe]   ;;  %v8532_v4 = vld [vmem:[%s8489_s22 + $0xc] sm:$0xff]  }
  0x17   : > { %v603_v26 = vsel %vm591_vm1, %v598_v20, %v602_v15  ;;  %v611_v29 = vsel %vm591_vm1, %v606_v21, %v610_v24  ;;  %v622_v35 = vor.u32 %v620_v28, %v618_v27  ;;  %v644_v47 = vshrl.u32 %v8190_v39, 16  ;;  %v8191_v59 = vld [vmem:[%s8489_s22 + $0x38] ss:$0 sps:$4 sm:$0xff]   ;;  %v8198_v9 = vld [vmem:[%s8489_s22 + $0x1c] sm:$0xff]   ;;  %v8196_v10 = vld [vmem:[%s8489_s22 + $0x4] sm:$0xfc]  }
  0x18   : > { %7605 = vmatprep.mubr.msk.bf16.mxu1 %vm395_vm0, %v603_v26  ;;  %v619_v34 = vsel %vm591_vm1, %v614_v30, %v618_v27  ;;  %v630_v41 = vor.u32 %v628_v33, %v626_v36  ;;  %v895_v48 = vshrl.u32 %v8194_v40, 16  ;;  %v642_v51 = vrot.slane %v640_v45, 1  ;;  %v8199_v18 = vld [vmem:[%s8489_s22 + $0x14] sm:$0xff]   ;;  %v8200_v21 = vld [vmem:[%s8489_s22 + $0x24] sm:$0xff]   ;;  %v8202_v26 = vld [vmem:[%s8489_s22 + $0x2c] sm:$0xff]  }
  0x19   : > { %7592 = vmatmul.mubr.msk.bf16.gmra.mxu0 %vm395_vm0, %v8182_v16  ;;  %7606 = vmatmul.mubr.msk.bf16.vlgmr.msra.gmra.mxu1 %vm395_vm0, %v611_v29  ;;  %v627_v49 = vsel %vm591_vm1, %v622_v35, %v626_v36  ;;  %v648_v52 = vshll.u32 %v8518_v46, 16  ;;  %v652_v54 = vshrl.u32 %v8518_v46, 16  ;;  %v898_v56 = vshll.u32 %v8194_v40, 16  ;;  %v8203_v27 = vld [vmem:[%s8489_s22 + $0x24] sm:$0xff]   ;;  %v8204_v31 = vld [vmem:[%s8489_s22 + $0x34] sm:$0xff]  }
  0x1a   : > { %7595 = vmatprep.mubr.msk.bf16.mxu0 %vm395_vm0, %v8185_v23  ;;  %7640 = vmatpush3.bf16.msra.mxu1 %v8183_v3  ;;  %v635_v50 = vsel %vm591_vm1, %v630_v41, %v634_v44  ;;  %v897_v55 = vrot.slane %v895_v48, 1  ;;  %v638_v58 = vor.u32 %v636_v43, %v634_v44  ;;  %v887_v61 = vshrl.u32 %v8193_v53, 16  ;;  %v8201_v23 = vld [vmem:[%s8489_s22 + $0x1c] sm:$0xff]   ;;  %v8205_v43 = vld [vmem:[%s8489_s22 + $0x2c] sm:$0xff]  }
  0x1b   : > { %7609 = vmatprep.mubr.msk.bf16.mxu1 %vm395_vm0, %v619_v34  ;;  %v650_v60 = vrot.slane %v648_v52, 1  ;;  %v890_v62 = vshll.u32 %v8193_v53, 16  ;;  %v900_v63 = vrot.slane %v898_v56, 2  ;;  %v904_v0 = vshrl.u32 %v8195_v57, 16  ;;  %v8206_v46 = vld [vmem:[%s8489_s22 + $0x3c] sm:$0x3f]  }
  0x1c   : > { %v907_v1 = vshll.u32 %v8195_v57, 16  ;;  %v646_v2 = vor.u32 %v644_v47, %v642_v51  ;;  %v889_v3 = vrot.slane %v887_v61, 1  ;;  %v643_v11 = vsel %vm591_vm1, %v638_v58, %v642_v51  ;;  %v8207_v47 = vld [vmem:[%s8489_s22 + $0x34] sm:$0xff]   ;;  %v8208_v56 = vld [vmem:[%s8489_s22 + $0x3c] sm:$0x3f]  }
  0x1d   : > { %v892_v5 = vrot.slane %v890_v62, 2  ;;  %v901_v6 = vor.u32 %v900_v63, %v897_v55  ;;  %v906_v7 = vrot.slane %v904_v0, 1  ;;  %v1189_v13 = vrot.slane %v8532_v4, 2 }
  0x1e   : > { %v909_v8 = vrot.slane %v907_v1, 2  ;;  %v913_v14 = vshrl.u32 %v8198_v9, 16  ;;  %v651_v15 = vsel %vm591_vm1, %v646_v2, %v650_v60  ;;  %v916_v17 = vshll.u32 %v8198_v9, 16  ;;  %v8209_v9 = vld [vmem:[%s9661_s3 + $0x8] sm:$0xff]  }
  0x1f   : > { %v893_v12 = vor.u32 %v892_v5, %v889_v3  ;;  %v922_v24 = vshrl.u32 %v8200_v21, 16  ;;  %v925_v25 = vshll.u32 %v8200_v21, 16  ;;  %v1188_v29 = vrot.slane %v8196_v10, 2  ;;  %7657 = vmatprep.subr.bf16.mxu0 %v8209_v9  ;;  %v8211_v10 = vld [vmem:[%s9661_s3] sm:$0xff]  }
  0x20   : > { %v910_v16 = vor.u32 %v909_v8, %v906_v7  ;;  %v915_v20 = vrot.slane %v913_v14, 1  ;;  %v918_v22 = vrot.slane %v916_v17, 2  ;;  %v931_v34 = vshrl.u32 %v8202_v26, 16  ;;  %v8603_v14 = vld [vmem:[%s9661_s3 + $0x38] sm:$0xff]  }
  0x21   : > { %7596 = vmatmul.mubr.msk.bf16.gmra.mxu0 %vm395_vm0, %v8187_v37  ;;  %7610 = vmatmul.mubr.msk.bf16.gmra.mxu1 %vm395_vm0, %v627_v49  ;;  %v902_v19 = vsel %vm885_vm2, %v893_v12, %v901_v6  ;;  %v924_v32 = vrot.slane %v922_v24, 1  ;;  %v927_v33 = vrot.slane %v925_v25, 2  ;;  %v934_v35 = vshll.u32 %v8202_v26, 16  ;;  %v8212_v12 = vld [vmem:[%s9661_s3 + $0x10] sm:$0xff]  }
  0x22   : > { %7599 = vmatprep.mubr.msk.bf16.mxu0 %vm395_vm0, %v8189_v42  ;;  %7613 = vmatprep.mubr.msk.bf16.mxu1 %vm395_vm0, %v635_v50  ;;  %v911_v28 = vsel %vm885_vm2, %v901_v6, %v910_v16  ;;  %v919_v30 = vor.u32 %v918_v22, %v915_v20  ;;  %v654_v36 = vor.u32 %v652_v54, %v650_v60  ;;  %v1191_v38 = vrot.slane %v8199_v18, 2 }
  0x23   : > { %v940_v39 = vshrl.u32 %v8204_v31, 16  ;;  %v933_v40 = vrot.slane %v931_v34, 1  ;;  %v936_v41 = vrot.slane %v934_v35, 2  ;;  %v943_v42 = vshll.u32 %v8204_v31, 16 }
  0x24   : > { %v920_v37 = vsel %vm885_vm2, %v910_v16, %v919_v30  ;;  %v1190_v44 = vsel %vm1187_vm3, %v1188_v29, %v1189_v13  ;;  %v1193_v45 = vrot.slane %v8201_v23, 2  ;;  %v928_v48 = vor.u32 %v927_v33, %v924_v32 }
  0x25   : > { %v937_v49 = vor.u32 %v936_v41, %v933_v40  ;;  %v1195_v50 = vrot.slane %v8203_v27, 2  ;;  %v942_v51 = vrot.slane %v940_v39, 1  ;;  %v945_v52 = vrot.slane %v943_v42, 2 }
  0x26   : > { %v1197_v53 = vrot.slane %v8205_v43, 2  ;;  %v949_v54 = vshrl.u32 %v8206_v46, 16  ;;  %v952_v55 = vshll.u32 %v8206_v46, 16  ;;  %v1199_v58 = vrot.slane %v8207_v47, 2 }
  0x27   : > { %v1201_v61 = vrot.slane %v8208_v56, 2  ;;  %v938_v62 = vsel %vm885_vm2, %v928_v48, %v937_v49  ;;  %v1192_v63 = vsel %vm1187_vm3, %v1189_v13, %v1191_v38  ;;  %v1194_v0 = vsel %vm1187_vm3, %v1191_v38, %v1193_v45  ;;  %v8598_v13 = vld [vmem:[%s9661_s3 + $0x28] sm:$0xff]  }
  0x28   : > { %v951_v57 = vrot.slane %v949_v54, 1  ;;  %v954_v60 = vrot.slane %v952_v55, 2  ;;  %v946_v1 = vor.u32 %v945_v52, %v942_v51  ;;  %v1196_v5 = vsel %vm1187_vm3, %v1193_v45, %v1195_v50 }
  0x29   : > { %7600 = vmatmul.mubr.msk.bf16.gmra.mxu0 %vm395_vm0, %v8191_v59  ;;  %7614 = vmatmul.mubr.msk.bf16.gmra.mxu1 %vm395_vm0, %v643_v11  ;;  %v929_v59 = vsel %vm885_vm2, %v919_v30, %v928_v48  ;;  %v1198_v6 = vsel %vm1187_vm3, %v1195_v50, %v1197_v53  ;;  %v1200_v7 = vsel %vm1187_vm3, %v1197_v53, %v1199_v58  ;;  %v8210_v11 = vld [vmem:[%s9661_s3 + $0x18] sm:$0xff]  }
  0x2a   : > { %7623 = vmatprep.mubr.msk.bf16.mxu0 %vm395_vm0, %v902_v19  ;;  %7617 = vmatprep.mubr.msk.bf16.mxu1 %vm395_vm0, %v651_v15  ;;  %v955_v2 = vor.u32 %v954_v60, %v951_v57  ;;  %v947_v3 = vsel %vm885_vm2, %v937_v49, %v946_v1  ;;  %v1202_v8 = vsel %vm1187_vm3, %v1199_v58, %v1201_v61 }
  0x2b   : > { %7673 = vmatprep.subr.bf16.mxu1 %v8210_v11 }
  0x2c   : > { %v956_v4 = vsel %vm885_vm2, %v946_v1, %v955_v2 }
  0x31   : > { %7624 = vmatmul.mubr.msk.bf16.vlgmr.msra.gmra.mxu0 %vm395_vm0, %v911_v28  ;;  %7618 = vmatmul.mubr.msk.bf16.gmra.mxu1 %vm395_vm0, %v654_v36 }
  0x32   : > { %7627 = vmatprep.mubr.msk.bf16.mxu0 %vm395_vm0, %v920_v37  ;;  %7641 = vmatprep.mubr.msk.bf16.mxu1 %vm395_vm0, %v1190_v44 }
  0x33   : > { %7658 = vmatpush3.bf16.msra.mxu0 %v8209_v9 }
  0x34   : > { %7659 = vmatprep.subr.bf16.mxu0 %v8211_v10 }
  0x37   : > { %7660 = vmatpush3.bf16.msra.mxu0 %v8211_v10 }
  0x38   : > { %7689 = vmatprep.subr.bf16.mxu0 %v8598_v13 }
  0x39   : > { %7628 = vmatmul.mubr.msk.bf16.gmra.mxu0 %vm395_vm0, %v929_v59  ;;  %7642 = vmatmul.mubr.msk.bf16.vlgmr.msra.gmra.mxu1 %vm395_vm0, %v1192_v63 }
  0x3a   : > { %7631 = vmatprep.mubr.msk.bf16.mxu0 %vm395_vm0, %v938_v62  ;;  %7645 = vmatprep.mubr.msk.bf16.mxu1 %vm395_vm0, %v1194_v0 }
  0x3b   : > { %7674 = vmatpush3.bf16.msra.mxu1 %v8210_v11 }
  0x3c   : > { %7675 = vmatprep.subr.bf16.mxu1 %v8212_v12 }
  0x3f   : > { %7676 = vmatpush3.bf16.msra.mxu1 %v8212_v12 }
  0x40   : > { %7705 = vmatprep.subr.bf16.mxu1 %v8603_v14 }
  0x41   : > { %7632 = vmatmul.mubr.msk.bf16.gmra.mxu0 %vm395_vm0, %v947_v3  ;;  %7646 = vmatmul.mubr.msk.bf16.gmra.mxu1 %vm395_vm0, %v1196_v5 }
  0x42   : > { %7635 = vmatprep.mubr.msk.bf16.mxu0 %vm395_vm0, %v956_v4  ;;  %7649 = vmatprep.mubr.msk.bf16.mxu1 %vm395_vm0, %v1198_v6 }
  0x49   : > { %7636 = vmatmul.mubr.msk.bf16.gmra.mxu0 %vm395_vm0, %v955_v2  ;;  %7650 = vmatmul.mubr.msk.bf16.gmra.mxu1 %vm395_vm0, %v1200_v7 }
  0x4a   : > { %7653 = vmatprep.mubr.msk.bf16.mxu1 %vm395_vm0, %v1202_v8 }
  0x51   : > { %7654 = vmatmul.mubr.msk.bf16.gmra.mxu1 %vm395_vm0, %v1201_v61 }
  0xd1   : > { %v7589_v15 = vpop.f32.mrf.mxu0 }
  0xd2   : > { %519 = vst.msk [vmem:[#allocation5 + $0x10] sm:$0xff] %vm516_vm4, %v7589_v15 }
  0xd3   : > { %v454_v16 = vpop.f32.mrf.mxu0 }
  0xd4   : > { %517 = vst.msk [vmem:[#allocation5] sm:$0xff] %vm516_vm4, %v454_v16 }
  0xd5   : > { %v7590_v17 = vpop.f32.mrf.mxu0 }
  0xd6   : > { %520 = vst.msk [vmem:[#allocation5 + $0x18] sm:$0xff] %vm516_vm4, %v7590_v17 }
  0xd7   : > { %v457_v18 = vpop.f32.mrf.mxu0 }
  0xd8   : > { %518 = vst.msk [vmem:[#allocation5 + $0x8] sm:$0xff] %vm516_vm4, %v457_v18 }
  0xd9   : > { %v783_v19 = vld [vmem:[#allocation5 + $0x10] sm:$0xff]  ;;  %v7593_v20 = vpop.f32.mrf.mxu0  ;;  %v7607_v21 = vpop.f32.mrf.mxu1 }
  0xda   : > { %523 = vst.msk [vmem:[#allocation5 + $0x30] sm:$0xff] %vm516_vm4, %v7593_v20  ;;  %v798_v24 = vadd.f32 %v7607_v21, %v783_v19 }
  0xdb   : > { %v781_v22 = vld [vmem:[#allocation5] sm:$0xff]  ;;  %v470_v23 = vpop.f32.mrf.mxu0  ;;  %v719_v25 = vpop.f32.mrf.mxu1 }
  0xdc   : > { %521 = vst.msk [vmem:[#allocation5 + $0x20] sm:$0xff] %vm516_vm4, %v470_v23  ;;  %813 = vst.msk [vmem:[#allocation5 + $0x10] sm:$0xff] %vm516_vm4, %v798_v24  ;;  %v796_v28 = vadd.f32 %v781_v22, %v719_v25 }
  0xdd   : > { %v784_v26 = vld [vmem:[#allocation5 + $0x18] sm:$0xff]  ;;  %v7594_v27 = vpop.f32.mrf.mxu0  ;;  %v7608_v29 = vpop.f32.mrf.mxu1 }
  0xde   : > { %524 = vst.msk [vmem:[#allocation5 + $0x38] sm:$0xff] %vm516_vm4, %v7594_v27  ;;  %811 = vst.msk [vmem:[#allocation5] sm:$0xff] %vm516_vm4, %v796_v28  ;;  %v799_v32 = vadd.f32 %v7608_v29, %v784_v26 }
  0xdf   : > { %v782_v30 = vld [vmem:[#allocation5 + $0x8] sm:$0xff]  ;;  %v473_v31 = vpop.f32.mrf.mxu0  ;;  %v722_v33 = vpop.f32.mrf.mxu1 }
  0xe0   : > { %522 = vst.msk [vmem:[#allocation5 + $0x28] sm:$0xff] %vm516_vm4, %v473_v31  ;;  %814 = vst.msk [vmem:[#allocation5 + $0x18] sm:$0xff] %vm516_vm4, %v799_v32  ;;  %v797_v36 = vadd.f32 %v782_v30, %v722_v33 }
  0xe1   : > { %v787_v34 = vld [vmem:[#allocation5 + $0x30] sm:$0xff]  ;;  %v7597_v35 = vpop.f32.mrf.mxu0  ;;  %v7611_v37 = vpop.f32.mrf.mxu1 }
  0xe2   : > { %527 = vst.msk [vmem:[#allocation5 + $0x50] sm:$0xff] %vm516_vm4, %v7597_v35  ;;  %812 = vst.msk [vmem:[#allocation5 + $0x8] sm:$0xff] %vm516_vm4, %v797_v36  ;;  %v802_v40 = vadd.f32 %v7611_v37, %v787_v34 }
  0xe3   : > { %v785_v38 = vld [vmem:[#allocation5 + $0x20] sm:$0xff]  ;;  %v486_v39 = vpop.f32.mrf.mxu0  ;;  %v735_v41 = vpop.f32.mrf.mxu1  ;;  %v1085_v4 = vld [vmem:[#allocation5 + $0x10] sm:$0xff] }
  0xe4   : > { %525 = vst.msk [vmem:[#allocation5 + $0x40] sm:$0xff] %vm516_vm4, %v486_v39  ;;  %817 = vst.msk [vmem:[#allocation5 + $0x30] sm:$0xff] %vm516_vm4, %v802_v40  ;;  %v800_v44 = vadd.f32 %v785_v38, %v735_v41 }
  0xe5   : > { %v788_v42 = vld [vmem:[#allocation5 + $0x38] sm:$0xff]  ;;  %v7598_v43 = vpop.f32.mrf.mxu0  ;;  %v7612_v45 = vpop.f32.mrf.mxu1  ;;  %v1083_v10 = vld [vmem:[#allocation5] sm:$0xff] }
  0xe6   : > { %528 = vst.msk [vmem:[#allocation5 + $0x58] sm:$0xff] %vm516_vm4, %v7598_v43  ;;  %815 = vst.msk [vmem:[#allocation5 + $0x20] sm:$0xff] %vm516_vm4, %v800_v44  ;;  %v803_v48 = vadd.f32 %v7612_v45, %v788_v42 }
  0xe7   : > { %v786_v46 = vld [vmem:[#allocation5 + $0x28] sm:$0xff]  ;;  %v489_v47 = vpop.f32.mrf.mxu0  ;;  %v738_v49 = vpop.f32.mrf.mxu1  ;;  %v1086_v17 = vld [vmem:[#allocation5 + $0x18] sm:$0xff] }
  0xe8   : > { %526 = vst.msk [vmem:[#allocation5 + $0x48] sm:$0xff] %vm516_vm4, %v489_v47  ;;  %818 = vst.msk [vmem:[#allocation5 + $0x38] sm:$0xff] %vm516_vm4, %v803_v48  ;;  %v801_v52 = vadd.f32 %v786_v46, %v738_v49 }
  0xe9   : > { %v791_v50 = vld [vmem:[#allocation5 + $0x50] sm:$0xff]  ;;  %v7601_v51 = vpop.f32.mrf.mxu0  ;;  %v7615_v53 = vpop.f32.mrf.mxu1  ;;  %v1084_v23 = vld [vmem:[#allocation5 + $0x8] sm:$0xff] }
  0xea   : > { %531 = vst.msk [vmem:[#allocation5 + $0x70] sm:$0xff] %vm516_vm4, %v7601_v51  ;;  %816 = vst.msk [vmem:[#allocation5 + $0x28] sm:$0xff] %vm516_vm4, %v801_v52  ;;  %v806_v56 = vadd.f32 %v7615_v53, %v791_v50 }
  0xeb   : > { %v789_v54 = vld [vmem:[#allocation5 + $0x40] sm:$0xff]  ;;  %v502_v55 = vpop.f32.mrf.mxu0  ;;  %v751_v57 = vpop.f32.mrf.mxu1  ;;  %v1089_v27 = vld [vmem:[#allocation5 + $0x30] sm:$0xff] }
  0xec   : > { %529 = vst.msk [vmem:[#allocation5 + $0x60] sm:$0xff] %vm516_vm4, %v502_v55  ;;  %821 = vst.msk [vmem:[#allocation5 + $0x50] sm:$0xff] %vm516_vm4, %v806_v56  ;;  %v804_v60 = vadd.f32 %v789_v54, %v751_v57  ;;  %v8651_v54 = vld [vmem:[%s9660_s2] ss:$0 sm:$0xff] }
  0xed   : > { %v792_v58 = vld [vmem:[#allocation5 + $0x58] sm:$0xff]  ;;  %v7602_v59 = vpop.f32.mrf.mxu0  ;;  %v7616_v61 = vpop.f32.mrf.mxu1  ;;  %v1087_v33 = vld [vmem:[#allocation5 + $0x20] sm:$0xff] }
  0xee   : > { %819 = vst.msk [vmem:[#allocation5 + $0x40] sm:$0xff] %vm516_vm4, %v804_v60  ;;  %v807_v0 = vadd.f32 %v7616_v61, %v792_v58  ;;  %v8656_v59 = vld [vmem:[%s9660_s2 + $0x1] ss:$0 sm:$0xff] }
  0xef   : > { %v790_v62 = vld [vmem:[#allocation5 + $0x48] sm:$0xff]  ;;  %v505_v63 = vpop.f32.mrf.mxu0  ;;  %v754_v1 = vpop.f32.mrf.mxu1  ;;  %v1090_v39 = vld [vmem:[#allocation5 + $0x38] sm:$0xff] }
  0xf0   : > { %530 = vst.msk [vmem:[#allocation5 + $0x68] sm:$0xff] %vm516_vm4, %v505_v63  ;;  %822 = vst.msk [vmem:[#allocation5 + $0x58] sm:$0xff] %vm516_vm4, %v807_v0  ;;  %v805_v5 = vadd.f32 %v790_v62, %v754_v1 }
  0xf1   : > { %v795_v2 = vld [vmem:[#allocation5 + $0x70] sm:$0xff]  ;;  %v7625_v3 = vpop.f32.mrf.mxu0  ;;  %v7619_v7 = vpop.f32.mrf.mxu1  ;;  %v1088_v45 = vld [vmem:[#allocation5 + $0x28] sm:$0xff] }
  0xf2   : > { %v1100_v6 = vadd.f32 %v7625_v3, %v1085_v4  ;;  %820 = vst.msk [vmem:[#allocation5 + $0x48] sm:$0xff] %vm516_vm4, %v805_v5  ;;  %v810_v11 = vadd.f32 %v7619_v7, %v795_v2 }
  0xf3   : > { %v793_v8 = vld [vmem:[#allocation5 + $0x60] sm:$0xff]  ;;  %v1021_v9 = vpop.f32.mrf.mxu0  ;;  %v767_v15 = vpop.f32.mrf.mxu1  ;;  %v1093_v51 = vld [vmem:[#allocation5 + $0x50] sm:$0xff] }
  0xf4   : > { %1115 = vst.msk [vmem:[#allocation5 + $0x10] sm:$0xff] %vm516_vm4, %v1100_v6  ;;  %v1098_v12 = vadd.f32 %v1083_v10, %v1021_v9  ;;  %825 = vst.msk [vmem:[#allocation5 + $0x70] sm:$0xff] %vm516_vm4, %v810_v11  ;;  %v808_v18 = vadd.f32 %v793_v8, %v767_v15 }
  0xf5   : > { %v7626_v16 = vpop.f32.mrf.mxu0  ;;  %v7620_v20 = vpop.f32.mrf.mxu1  ;;  %v1091_v58 = vld [vmem:[#allocation5 + $0x40] sm:$0xff] }
  0xf6   : > { %1113 = vst.msk [vmem:[#allocation5] sm:$0xff] %vm516_vm4, %v1098_v12  ;;  %v1101_v19 = vadd.f32 %v7626_v16, %v1086_v17  ;;  %823 = vst.msk [vmem:[#allocation5 + $0x60] sm:$0xff] %vm516_vm4, %v808_v18 }
  0xf7   : > { %v794_v21 = vld [vmem:[#allocation5 + $0x68] sm:$0xff]  ;;  %v1024_v22 = vpop.f32.mrf.mxu0  ;;  %v770_v25 = vpop.f32.mrf.mxu1  ;;  %v1094_v2 = vld [vmem:[#allocation5 + $0x58] sm:$0xff] }
  0xf8   : > { %1116 = vst.msk [vmem:[#allocation5 + $0x18] sm:$0xff] %vm516_vm4, %v1101_v19  ;;  %v1099_v24 = vadd.f32 %v1084_v23, %v1024_v22  ;;  %v809_v28 = vadd.f32 %v794_v21, %v770_v25 }
  0xf9   : > { %v7629_v26 = vpop.f32.mrf.mxu0  ;;  %v7643_v30 = vpop.f32.mrf.mxu1  ;;  %v1092_v10 = vld [vmem:[#allocation5 + $0x48] sm:$0xff] }
  0xfa   : > { %1114 = vst.msk [vmem:[#allocation5 + $0x8] sm:$0xff] %vm516_vm4, %v1099_v24  ;;  %v1104_v29 = vadd.f32 %v7629_v26, %v1089_v27  ;;  %824 = vst.msk [vmem:[#allocation5 + $0x68] sm:$0xff] %vm516_vm4, %v809_v28 }
  0xfb   : > { %v1331_v31 = vld [vmem:[#allocation5 + $0x10] sm:$0xff]  ;;  %v1037_v32 = vpop.f32.mrf.mxu0  ;;  %v1267_v36 = vpop.f32.mrf.mxu1 }
  0xfc   : > { %v1346_v34 = vadd.f32 %v7643_v30, %v1331_v31  ;;  %1119 = vst.msk [vmem:[#allocation5 + $0x30] sm:$0xff] %vm516_vm4, %v1104_v29  ;;  %v1102_v35 = vadd.f32 %v1087_v33, %v1037_v32  ;;  %v1097_v25 = vld [vmem:[#allocation5 + $0x70] sm:$0xff] }
  0xfd   : > { %v1329_v37 = vld [vmem:[#allocation5] sm:$0xff]  ;;  %v7630_v38 = vpop.f32.mrf.mxu0  ;;  %v7644_v42 = vpop.f32.mrf.mxu1 }
  0xfe   : > { %1361 = vst.msk [vmem:[#allocation5 + $0x10] sm:$0xff] %vm516_vm4, %v1346_v34  ;;  %v1344_v40 = vadd.f32 %v1329_v37, %v1267_v36  ;;  %1117 = vst.msk [vmem:[#allocation5 + $0x20] sm:$0xff] %vm516_vm4, %v1102_v35  ;;  %v1105_v41 = vadd.f32 %v7630_v38, %v1090_v39  ;;  %v1095_v35 = vld [vmem:[#allocation5 + $0x60] sm:$0xff] }
  0xff   : > { %v1332_v43 = vld [vmem:[#allocation5 + $0x18] sm:$0xff]  ;;  %v1040_v44 = vpop.f32.mrf.mxu0  ;;  %v1270_v48 = vpop.f32.mrf.mxu1 }
 0x100   : > { %1359 = vst.msk [vmem:[#allocation5] sm:$0xff] %vm516_vm4, %v1344_v40  ;;  %v1347_v46 = vadd.f32 %v7644_v42, %v1332_v43  ;;  %1120 = vst.msk [vmem:[#allocation5 + $0x38] sm:$0xff] %vm516_vm4, %v1105_v41  ;;  %v1103_v47 = vadd.f32 %v1088_v45, %v1040_v44 }
 0x101   : > { %v1330_v49 = vld [vmem:[#allocation5 + $0x8] sm:$0xff]  ;;  %v7633_v50 = vpop.f32.mrf.mxu0  ;;  %v7647_v55 = vpop.f32.mrf.mxu1 }
 0x102   : > { %1362 = vst.msk [vmem:[#allocation5 + $0x18] sm:$0xff] %vm516_vm4, %v1347_v46  ;;  %v1345_v52 = vadd.f32 %v1330_v49, %v1270_v48  ;;  %1118 = vst.msk [vmem:[#allocation5 + $0x28] sm:$0xff] %vm516_vm4, %v1103_v47  ;;  %v1108_v53 = vadd.f32 %v7633_v50, %v1093_v51 }
 0x103   : > { %v1335_v56 = vld [vmem:[#allocation5 + $0x30] sm:$0xff]  ;;  %v1053_v57 = vpop.f32.mrf.mxu0  ;;  %v1283_v63 = vpop.f32.mrf.mxu1 }
 0x104   : > { %1360 = vst.msk [vmem:[#allocation5 + $0x8] sm:$0xff] %vm516_vm4, %v1345_v52  ;;  %v1350_v60 = vadd.f32 %v7647_v55, %v1335_v56  ;;  %1123 = vst.msk [vmem:[#allocation5 + $0x50] sm:$0xff] %vm516_vm4, %v1108_v53  ;;  %v1106_v61 = vadd.f32 %v1091_v58, %v1053_v57  ;;  %v1096_v56 = vld [vmem:[#allocation5 + $0x68] sm:$0xff] }
 0x105   : > { %v1378_v62 = vld [vmem:[#allocation5 + $0x10] sm:$0xff]  ;;  %v1333_v0 = vld [vmem:[#allocation5 + $0x20] sm:$0xff]  ;;  %v7634_v1 = vpop.f32.mrf.mxu0  ;;  %v7648_v7 = vpop.f32.mrf.mxu1 }
 0x106   : > { %v1397_v3 = vmul.f32 %v8651_v54, %v1378_v62  ;;  %1365 = vst.msk [vmem:[#allocation5 + $0x30] sm:$0xff] %vm516_vm4, %v1350_v60  ;;  %v1348_v4 = vadd.f32 %v1333_v0, %v1283_v63  ;;  %1121 = vst.msk [vmem:[#allocation5 + $0x40] sm:$0xff] %vm516_vm4, %v1106_v61  ;;  %v1109_v5 = vadd.f32 %v7634_v1, %v1094_v2 }
 0x107   : > { %v1376_v6 = vld [vmem:[#allocation5] sm:$0xff]  ;;  %v1336_v8 = vld [vmem:[#allocation5 + $0x38] sm:$0xff]  ;;  %v1056_v9 = vpop.f32.mrf.mxu0  ;;  %v1286_v18 = vpop.f32.mrf.mxu1 }
 0x108   : > { %v1416_v11 = vadd.f32 %v8656_v59, %v1397_v3  ;;  %v1395_v12 = vmul.f32 %v8651_v54, %v1376_v6  ;;  %1363 = vst.msk [vmem:[#allocation5 + $0x20] sm:$0xff] %vm516_vm4, %v1348_v4  ;;  %v1351_v15 = vadd.f32 %v7648_v7, %v1336_v8  ;;  %1124 = vst.msk [vmem:[#allocation5 + $0x58] sm:$0xff] %vm516_vm4, %v1109_v5 }
 0x109   : > { %v1107_v16 = vadd.f32 %v1092_v10, %v1056_v9  ;;  %v1379_v17 = vld [vmem:[#allocation5 + $0x18] sm:$0xff]  ;;  %v1334_v19 = vld [vmem:[#allocation5 + $0x28] sm:$0xff]  ;;  %v7637_v20 = vpop.f32.mrf.mxu0  ;;  %v7651_v27 = vpop.f32.mrf.mxu1 }
 0x10a   : > { %v1431_v21 = vmax.f32 %v1416_v11, 0.0  ;;  %v1414_v22 = vadd.f32 %v8656_v59, %v1395_v12  ;;  %v1398_v23 = vmul.f32 %v8651_v54, %v1379_v17  ;;  %1366 = vst.msk [vmem:[#allocation5 + $0x38] sm:$0xff] %vm516_vm4, %v1351_v15  ;;  %v1349_v24 = vadd.f32 %v1334_v19, %v1286_v18 }
 0x10b   : > { %1122 = vst.msk [vmem:[#allocation5 + $0x48] sm:$0xff] %vm516_vm4, %v1107_v16  ;;  %v1377_v26 = vld [vmem:[#allocation5 + $0x8] sm:$0xff]  ;;  %v1339_v28 = vld [vmem:[#allocation5 + $0x50] sm:$0xff]  ;;  %v1112_v29 = vadd.f32 %v7637_v20, %v1097_v25  ;;  %v1069_v30 = vpop.f32.mrf.mxu0  ;;  %v1299_v38 = vpop.f32.mrf.mxu1 }
 0x10c   : > { %v7335_v31 = vpack.c.bf16 %v1431_v21, %v1431_v21  ;;  %v1429_v32 = vmax.f32 %v1414_v22, 0.0  ;;  %v1417_v33 = vadd.f32 %v8656_v59, %v1398_v23  ;;  %v1396_v34 = vmul.f32 %v8651_v54, %v1377_v26  ;;  %1364 = vst.msk [vmem:[#allocation5 + $0x28] sm:$0xff] %vm516_vm4, %v1349_v24 }
 0x10d   : > { %v1382_v36 = vld [vmem:[#allocation5 + $0x30] sm:$0xff]  ;;  %v1354_v37 = vadd.f32 %v7651_v27, %v1339_v28  ;;  %1127 = vst.msk [vmem:[#allocation5 + $0x70] sm:$0xff] %vm516_vm4, %v1112_v29  ;;  %v1337_v39 = vld [vmem:[#allocation5 + $0x40] sm:$0xff]  ;;  %v1110_v40 = vadd.f32 %v1095_v35, %v1069_v30  ;;  %v7638_v41 = vpop.f32.mrf.mxu0  ;;  %v7652_v48 = vpop.f32.mrf.mxu1 }
 0x10e   : > { %1508 = vst.msk [vmem:[#allocation2 + $0x8] sm:$0xf] %vm1505_vm5, %v7335_v31  ;;  %v7333_v42 = vpack.c.bf16 %v1429_v32, %v1429_v32  ;;  %v1432_v43 = vmax.f32 %v1417_v33, 0.0  ;;  %v1415_v44 = vadd.f32 %v8656_v59, %v1396_v34  ;;  %v1401_v45 = vmul.f32 %v8651_v54, %v1382_v36 }
 0x10f   : > { %v1380_v46 = vld [vmem:[#allocation5 + $0x20] sm:$0xff]  ;;  %1369 = vst.msk [vmem:[#allocation5 + $0x50] sm:$0xff] %vm516_vm4, %v1354_v37  ;;  %v1352_v47 = vadd.f32 %v1337_v39, %v1299_v38  ;;  %1125 = vst.msk [vmem:[#allocation5 + $0x60] sm:$0xff] %vm516_vm4, %v1110_v40  ;;  %v1340_v49 = vld [vmem:[#allocation5 + $0x58] sm:$0xff]  ;;  %v1072_v50 = vpop.f32.mrf.mxu0  ;;  %v1302_v60 = vpop.f32.mrf.mxu1 }
 0x110   : > { %1506 = vst.msk [vmem:[#allocation2] sm:$0xf] %vm1505_vm5, %v7333_v42  ;;  %v7336_v51 = vpack.c.bf16 %v1432_v43, %v1432_v43  ;;  %v1430_v52 = vmax.f32 %v1415_v44, 0.0  ;;  %v1420_v53 = vadd.f32 %v8656_v59, %v1401_v45  ;;  %v1399_v55 = vmul.f32 %v8651_v54, %v1380_v46  ;;  %v8220_v38 = vld [vmem:[%s9661_s3 + $0x20] sm:$0xff]  }
 0x111   : > { %v1383_v57 = vld [vmem:[#allocation5 + $0x38] sm:$0xff]  ;;  %1367 = vst.msk [vmem:[#allocation5 + $0x40] sm:$0xff] %vm516_vm4, %v1352_v47  ;;  %v1355_v58 = vadd.f32 %v7652_v48, %v1340_v49  ;;  %v1111_v62 = vadd.f32 %v1096_v56, %v1072_v50  ;;  %v7655_v4 = vpop.f32.mrf.mxu1 }
 0x112   : > { %v1338_v61 = vld [vmem:[#allocation5 + $0x48] sm:$0xff]  ;;  %1509 = vst.msk [vmem:[#allocation2 + $0xc] sm:$0xf] %vm1505_vm5, %v7336_v51  ;;  %v1435_v63 = vmax.f32 %v1420_v53, 0.0  ;;  %v1418_v0 = vadd.f32 %v8656_v59, %v1399_v55  ;;  %v1402_v1 = vmul.f32 %v8651_v54, %v1383_v57  ;;  %v7334_v5 = vpack.c.bf16 %v1430_v52, %v1430_v52 }
 0x113   : > { %v1353_v2 = vadd.f32 %v1338_v61, %v1302_v60  ;;  %v1381_v3 = vld [vmem:[#allocation5 + $0x28] sm:$0xff]  ;;  %1370 = vst.msk [vmem:[#allocation5 + $0x58] sm:$0xff] %vm516_vm4, %v1355_v58  ;;  %1126 = vst.msk [vmem:[#allocation5 + $0x68] sm:$0xff] %vm516_vm4, %v1111_v62  ;;  %v1315_v12 = vpop.f32.mrf.mxu1  ;;  %v8726_v60 = vld [vmem:[%s9661_s3 + $0x48] sm:$0xff]  }
 0x114   : > { %v7339_v6 = vpack.c.bf16 %v1435_v63, %v1435_v63  ;;  %v1433_v7 = vmax.f32 %v1418_v0, 0.0  ;;  %v1421_v8 = vadd.f32 %v8656_v59, %v1402_v1  ;;  %v1400_v9 = vmul.f32 %v8651_v54, %v1381_v3  ;;  %v1343_v10 = vld [vmem:[#allocation5 + $0x70] sm:$0xff]  ;;  %1507 = vst.msk [vmem:[#allocation2 + $0x4] sm:$0xf] %vm1505_vm5, %v7334_v5 }
 0x115   : > { %1368 = vst.msk [vmem:[#allocation5 + $0x48] sm:$0xff] %vm516_vm4, %v1353_v2  ;;  %v1358_v11 = vadd.f32 %v7655_v4, %v1343_v10  ;;  %v7656_v22 = vpop.f32.mrf.mxu1 }
 0x116   : > { %1512 = vst.msk [vmem:[#allocation2 + $0x18] sm:$0xf] %vm1505_vm5, %v7339_v6  ;;  %v7337_v15 = vpack.c.bf16 %v1433_v7, %v1433_v7  ;;  %v1436_v16 = vmax.f32 %v1421_v8, 0.0  ;;  %v1419_v17 = vadd.f32 %v8656_v59, %v1400_v9  ;;  %v1386_v18 = vld [vmem:[#allocation5 + $0x50] sm:$0xff]  ;;  %v1341_v19 = vld [vmem:[#allocation5 + $0x60] sm:$0xff] }
 0x117   : > { %v1405_v20 = vmul.f32 %v8651_v54, %v1386_v18  ;;  %1373 = vst.msk [vmem:[#allocation5 + $0x70] sm:$0xff] %vm516_vm4, %v1358_v11  ;;  %v1356_v21 = vadd.f32 %v1341_v19, %v1315_v12  ;;  %v1318_v28 = vpop.f32.mrf.mxu1 }
 0x118   : > { %1510 = vst.msk [vmem:[#allocation2 + $0x10] sm:$0xf] %vm1505_vm5, %v7337_v15  ;;  %v7340_v23 = vpack.c.bf16 %v1436_v16, %v1436_v16  ;;  %v1434_v24 = vmax.f32 %v1419_v17, 0.0  ;;  %v1384_v25 = vld [vmem:[#allocation5 + $0x40] sm:$0xff] }
 0x119   : > { %v1424_v26 = vadd.f32 %v8656_v59, %v1405_v20  ;;  %v1403_v27 = vmul.f32 %v8651_v54, %v1384_v25  ;;  %1371 = vst.msk [vmem:[#allocation5 + $0x60] sm:$0xff] %vm516_vm4, %v1356_v21  ;;  %v8704_v37 = vld [vmem:[#allocation2 + $0x8] sm:$0xff]  }
 0x11a   : > { %1513 = vst.msk [vmem:[#allocation2 + $0x1c] sm:$0xf] %vm1505_vm5, %v7340_v23  ;;  %v1387_v29 = vld [vmem:[#allocation5 + $0x58] sm:$0xff]  ;;  %v1342_v30 = vld [vmem:[#allocation5 + $0x68] sm:$0xff]  ;;  %v7338_v31 = vpack.c.bf16 %v1434_v24, %v1434_v24  ;;  %v1749_v55 = vshll.u32 %v8704_v37, 16  ;;  %v1753_v15 = vshrl.u32 %v8704_v37, 16 }
 0x11b   : > { %v1439_v32 = vmax.f32 %v1424_v26, 0.0  ;;  %v1422_v33 = vadd.f32 %v8656_v59, %v1403_v27  ;;  %v1406_v34 = vmul.f32 %v8651_v54, %v1387_v29  ;;  %v1357_v36 = vadd.f32 %v1342_v30, %v1318_v28  ;;  %v8213_v40 = vld [vmem:[#allocation2] sm:$0xff]   ;;  %v8215_v44 = vld [vmem:[#allocation2 + $0x8] sm:$0xff]   ;;  %v8233_v24 = vld [vmem:[%s9661_s3 + $0x30] sm:$0xff]  }
 0x11c   : > { %v1385_v35 = vld [vmem:[#allocation5 + $0x48] sm:$0xff]  ;;  %1511 = vst.msk [vmem:[#allocation2 + $0x14] sm:$0xf] %vm1505_vm5, %v7338_v31  ;;  %v8216_v45 = vld [vmem:[#allocation2] sm:$0xff]   ;;  %7661 = vmatprep.mubr.msk.bf16.mxu0 %vm516_vm4, %v8213_v40  ;;  %v1751_v6 = vrot.slane %v1749_v55, 1  ;;  %v8739_v18 = vld [vmem:[#allocation2 + $0x8] sm:$0xff]  }
 0x11d   : > { %v1404_v39 = vmul.f32 %v8651_v54, %v1385_v35  ;;  %v7343_v41 = vpack.c.bf16 %v1439_v32, %v1439_v32  ;;  %v1437_v42 = vmax.f32 %v1422_v33, 0.0  ;;  %v1425_v43 = vadd.f32 %v8656_v59, %v1406_v34  ;;  %1372 = vst.msk [vmem:[#allocation5 + $0x68] sm:$0xff] %vm516_vm4, %v1357_v36  ;;  %7662 = vmatmul.mubr.msk.bf16.vlgmr.msra.gmra.mxu0 %vm516_vm4, %v8215_v44  ;;  %v8226_v3 = vld [vmem:[#allocation2] sm:$0xfe]   ;;  %v8754_v33 = vld [vmem:[%s9661_s3 + $0x58] sm:$0xff]  }
 0x11e   : > { %v1390_v47 = vld [vmem:[#allocation5 + $0x70] sm:$0xff]  ;;  %7690 = vmatpush3.bf16.msra.mxu0 %v8598_v13  ;;  %v1744_v53 = vshll.u32 %v8216_v45, 16  ;;  %v1742_v61 = vshrl.u32 %v8216_v45, 16  ;;  %v1755_v21 = vor.u32 %v1753_v15, %v1751_v6  ;;  %v1992_v26 = vrot.slane %v8226_v3, 1  ;;  %v8780_v15 = vld [vmem:[%s9661_s3 + $0x68] sm:$0xff]  }
 0x11f   : > { %v1423_v46 = vadd.f32 %v8656_v59, %v1404_v39  ;;  %1516 = vst.msk [vmem:[#allocation2 + $0x28] sm:$0xf] %vm1505_vm5, %v7343_v41  ;;  %v7341_v48 = vpack.c.bf16 %v1437_v42, %v1437_v42  ;;  %v1440_v49 = vmax.f32 %v1425_v43, 0.0  ;;  %v1409_v50 = vmul.f32 %v8651_v54, %v1390_v47  ;;  %7691 = vmatprep.subr.bf16.mxu0 %v8220_v38  ;;  %v8235_v40 = vld [vmem:[#allocation2 + $0x4] sm:$0xfe]  }
 0x120   : > { %v1388_v52 = vld [vmem:[#allocation5 + $0x60] sm:$0xff]  ;;  %v1746_v62 = vrot.slane %v1744_v53, 1  ;;  %v1993_v36 = vrot.slane %v8739_v18, 1 }
 0x121   : > { %v1438_v51 = vmax.f32 %v1423_v46, 0.0  ;;  %1514 = vst.msk [vmem:[#allocation2 + $0x20] sm:$0xf] %vm1505_vm5, %v7341_v48  ;;  %v7344_v56 = vpack.c.bf16 %v1440_v49, %v1440_v49  ;;  %v1428_v57 = vadd.f32 %v8656_v59, %v1409_v50  ;;  %v1407_v58 = vmul.f32 %v8651_v54, %v1388_v52  ;;  %v8728_v63 = vld [vmem:[#allocation2 + $0x18] sm:$0xff]  }
 0x122   : > { %v1747_v5 = vor.u32 %v1746_v62, %v1742_v61  ;;  %7692 = vmatpush3.bf16.msra.mxu0 %v8220_v38  ;;  %v8219_v11 = vld [vmem:[#allocation2 + $0x18] sm:$0xff]   ;;  %v1765_v17 = vshll.u32 %v8728_v63, 16  ;;  %v1769_v41 = vshrl.u32 %v8728_v63, 16  ;;  %v2207_v52 = vshll.u32 %v8235_v40, 16 }
 0x123   : > { %v7342_v13 = vpack.c.bf16 %v1438_v51, %v1438_v51  ;;  %1517 = vst.msk [vmem:[#allocation2 + $0x2c] sm:$0xf] %vm1505_vm5, %v7344_v56  ;;  %v1443_v0 = vmax.f32 %v1428_v57, 0.0  ;;  %v1426_v1 = vadd.f32 %v8656_v59, %v1407_v58  ;;  %v8218_v2 = vld [vmem:[#allocation2 + $0x10] sm:$0xff]   ;;  %7721 = vmatprep.subr.bf16.mxu0 %v8726_v60  ;;  %v8232_v45 = vld [vmem:[#allocation2 + $0x18] sm:$0xff]   ;;  %v2204_v51 = vshrl.u32 %v8235_v40, 16 }
 0x124   : > { %v1389_v4 = vld [vmem:[#allocation5 + $0x68] sm:$0xff]  ;;  %v8221_v7 = vld [vmem:[#allocation2 + $0x10] sm:$0xff]   ;;  %7665 = vmatprep.mubr.msk.bf16.mxu0 %vm516_vm4, %v8218_v2  ;;  %v1752_v12 = vsel %vm591_vm1, %v1747_v5, %v1751_v6  ;;  %v2209_v3 = vrot.slane %v2207_v52, 2 }
 0x125   : > { %1515 = vst.msk [vmem:[#allocation2 + $0x24] sm:$0xf] %vm1505_vm5, %v7342_v13  ;;  %v7347_v8 = vpack.c.bf16 %v1443_v0, %v1443_v0  ;;  %v1441_v9 = vmax.f32 %v1426_v1, 0.0  ;;  %v1408_v10 = vmul.f32 %v8651_v54, %v1389_v4  ;;  %v1757_v16 = vshll.u32 %v8221_v7, 16  ;;  %7677 = vmatprep.mubr.msk.bf16.mxu1 %vm516_vm4, %v1752_v12  ;;  %7666 = vmatmul.mubr.msk.bf16.gmra.mxu0 %vm516_vm4, %v8219_v11  ;;  %v8236_v54 = vld [vmem:[#allocation2 + $0xc] sm:$0xff]   ;;  %v8240_v58 = vld [vmem:[#allocation2 + $0x14] sm:$0xff]  }
 0x126   : > { %v1761_v23 = vshrl.u32 %v8221_v7, 16  ;;  %v8231_v29 = vld [vmem:[#allocation2 + $0x10] sm:$0xff]   ;;  %v2212_v32 = vshrl.u32 %v8236_v54, 16  ;;  %v2215_v39 = vshll.u32 %v8236_v54, 16  ;;  %v8239_v13 = vld [vmem:[%s9661_s3 + $0x40] sm:$0xff]   ;;  %v1997_v1 = vrot.slane %v8232_v45, 1 }
 0x127   : > { %1520 = vst.msk [vmem:[#allocation2 + $0x38] sm:$0xf] %vm1505_vm5, %v7347_v8  ;;  %v7345_v19 = vpack.c.bf16 %v1441_v9, %v1441_v9  ;;  %v1427_v20 = vadd.f32 %v8656_v59, %v1408_v10  ;;  %v1759_v22 = vrot.slane %v1757_v16, 1  ;;  %v1767_v59 = vrot.slane %v1765_v17, 1 }
 0x128   : > { %v1995_v44 = vrot.slane %v8231_v29, 1  ;;  %v2214_v46 = vrot.slane %v2212_v32, 1  ;;  %v2217_v53 = vrot.slane %v2215_v39, 2  ;;  %v8241_v62 = vld [vmem:[#allocation2 + $0x1c] sm:$0xff]   ;;  %v2206_v2 = vrot.slane %v2204_v51, 1  ;;  %v8790_v29 = vld [vmem:[#allocation2 + $0xc] sm:$0xff]  }
 0x129   : > { %1518 = vst.msk [vmem:[#allocation2 + $0x30] sm:$0xf] %vm1505_vm5, %v7345_v19  ;;  %v1442_v25 = vmax.f32 %v1427_v20, 0.0  ;;  %v1760_v27 = vsel %vm591_vm1, %v1755_v21, %v1759_v22  ;;  %v1763_v28 = vor.u32 %v1761_v23, %v1759_v22  ;;  %v1771_v47 = vor.u32 %v1769_v41, %v1767_v59  ;;  %v8244_v39 = vld [vmem:[#allocation2 + $0x4] sm:$0xfc]   ;;  %v8804_v51 = vld [vmem:[#allocation2 + $0x1c] sm:$0xff]  }
 0x12a   : > { %7678 = vmatmul.mubr.msk.bf16.vlgmr.msra.gmra.mxu1 %vm516_vm4, %v1760_v27  ;;  %v8225_v35 = vld [vmem:[#allocation2 + $0x28] sm:$0xff]   ;;  %v1996_v0 = vsel %vm1991_vm6, %v1993_v36, %v1995_v44  ;;  %v2221_v7 = vshrl.u32 %v8240_v58, 16  ;;  %v2224_v8 = vshll.u32 %v8240_v58, 16  ;;  %v1998_v9 = vsel %vm1991_vm6, %v1995_v44, %v1997_v1 }
 0x12b   : > { %v7346_v30 = vpack.c.bf16 %v1442_v25, %v1442_v25  ;;  %v1768_v34 = vsel %vm591_vm1, %v1763_v28, %v1767_v59  ;;  %7706 = vmatpush3.bf16.msra.mxu1 %v8603_v14  ;;  %v8229_v38 = vld [vmem:[#allocation2 + $0x28] sm:$0xff]   ;;  %v1994_v14 = vsel %vm1991_vm6, %v1992_v26, %v1993_v36  ;;  %v2218_v10 = vor.u32 %v2217_v53, %v2214_v46  ;;  %v8809_v53 = vld [vmem:[%s9661_s3 + $0x78] sm:$0xff]  }
 0x12c   : > { %v8224_v31 = vld [vmem:[#allocation2 + $0x20] sm:$0xff]   ;;  %7681 = vmatprep.mubr.msk.bf16.mxu1 %vm516_vm4, %v1768_v34  ;;  %v1781_v43 = vshll.u32 %v8229_v38, 16  ;;  %7707 = vmatprep.subr.bf16.mxu1 %v8233_v24  ;;  %v1785_v5 = vshrl.u32 %v8229_v38, 16  ;;  %v2230_v11 = vshrl.u32 %v8241_v62, 16  ;;  %v2233_v12 = vshll.u32 %v8241_v62, 16  ;;  %v8238_v17 = vld [vmem:[#allocation2 + $0x28] sm:$0xff]  }
 0x12d   : > { %v8228_v37 = vld [vmem:[#allocation2 + $0x20] sm:$0xff]   ;;  %1519 = vst.msk [vmem:[#allocation2 + $0x34] sm:$0xf] %vm1505_vm5, %v7346_v30  ;;  %7669 = vmatprep.mubr.msk.bf16.mxu0 %vm516_vm4, %v8224_v31  ;;  %v2210_v18 = vor.u32 %v2209_v3, %v2206_v2  ;;  %v2223_v21 = vrot.slane %v2221_v7, 1  ;;  %v2226_v22 = vrot.slane %v2224_v8, 2  ;;  %v2464_v45 = vrot.slane %v8790_v29, 2 }
 0x12e   : > { %v1773_v42 = vshll.u32 %v8228_v37, 16  ;;  %7670 = vmatmul.mubr.msk.bf16.gmra.mxu0 %vm516_vm4, %v8225_v35  ;;  %v1777_v49 = vshrl.u32 %v8228_v37, 16  ;;  %v1783_v57 = vrot.slane %v1781_v43, 1  ;;  %v8237_v4 = vld [vmem:[#allocation2 + $0x20] sm:$0xff]   ;;  %v2235_v25 = vrot.slane %v2233_v12, 2  ;;  %v8251_v37 = vld [vmem:[%s9661_s3 + $0x50] sm:$0xff]  }
 0x12f   : > { %7693 = vmatprep.mubr.msk.bf16.mxu0 %vm516_vm4, %v1994_v14  ;;  %7708 = vmatpush3.bf16.msra.mxu1 %v8233_v24  ;;  %v1999_v19 = vrot.slane %v8237_v4, 1  ;;  %v8246_v20 = vld [vmem:[#allocation2 + $0x24] sm:$0xff]   ;;  %v2219_v23 = vsel %vm885_vm2, %v2210_v18, %v2218_v10  ;;  %v2232_v24 = vrot.slane %v2230_v11, 1  ;;  %v2227_v59 = vor.u32 %v2226_v22, %v2223_v21  ;;  %v8254_v14 = vld [vmem:[#allocation2 + $0xc] sm:$0xff]   ;;  %v8258_v3 = vld [vmem:[#allocation2 + $0x14] sm:$0xff]  }
 0x130   : > { %v1775_v48 = vrot.slane %v1773_v42, 1  ;;  %v8234_v50 = vld [vmem:[#allocation2 + $0x30] ss:$0 sps:$4 sm:$0x11]   ;;  %7737 = vmatprep.subr.bf16.mxu1 %v8754_v33  ;;  %v1787_v16 = vor.u32 %v1785_v5, %v1783_v57  ;;  %v2239_v30 = vshrl.u32 %v8246_v20, 16  ;;  %v2242_v31 = vshll.u32 %v8246_v20, 16 }
 0x131   : > { %v1789_v61 = vshll.u32 %v8234_v50, 16  ;;  %v8247_v26 = vld [vmem:[#allocation2 + $0x2c] sm:$0xff]   ;;  %v2000_v28 = vsel %vm1991_vm6, %v1997_v1, %v1999_v19  ;;  %v2236_v34 = vor.u32 %v2235_v25, %v2232_v24  ;;  %v2228_v40 = vsel %vm885_vm2, %v2218_v10, %v2227_v59  ;;  %v8255_v11 = vld [vmem:[#allocation2 + $0x24] sm:$0xff]  }
 0x132   : > { %v1776_v55 = vsel %vm591_vm1, %v1771_v47, %v1775_v48  ;;  %v1779_v56 = vor.u32 %v1777_v49, %v1775_v48  ;;  %v8243_v27 = vld [vmem:[#allocation2 + $0x30] ss:$0 sps:$4 sm:$0x11]   ;;  %v2248_v35 = vshrl.u32 %v8247_v26, 16  ;;  %v2251_v36 = vshll.u32 %v8247_v26, 16  ;;  %v8249_v48 = vld [vmem:[#allocation2 + $0x14] sm:$0xff]  }
 0x133   : > { %7682 = vmatmul.mubr.msk.bf16.gmra.mxu1 %vm516_vm4, %v1776_v55  ;;  %v1791_v6 = vrot.slane %v1789_v61, 1  ;;  %v2003_v41 = vrot.slane %v8243_v27, 1  ;;  %v2241_v42 = vrot.slane %v2239_v30, 1  ;;  %v2244_v43 = vrot.slane %v2242_v31, 2  ;;  %v8253_v49 = vld [vmem:[#allocation2 + $0x4] sm:$0xfc]  }
 0x134   : > { %v1784_v63 = vsel %vm591_vm1, %v1779_v56, %v1783_v57  ;;  %v8252_v38 = vld [vmem:[#allocation2 + $0x34] ss:$0 sps:$4 sm:$0x33]   ;;  %v2237_v44 = vsel %vm885_vm2, %v2227_v59, %v2236_v34  ;;  %v2250_v46 = vrot.slane %v2248_v35, 1  ;;  %v2253_v47 = vrot.slane %v2251_v36, 2  ;;  %v8257_v12 = vld [vmem:[%s9661_s3 + $0x60] sm:$0xff]  }
 0x135   : > { %7685 = vmatprep.mubr.msk.bf16.mxu1 %vm516_vm4, %v1784_v63  ;;  %v1792_v54 = vsel %vm591_vm1, %v1787_v16, %v1791_v6  ;;  %v2463_v50 = vrot.slane %v8244_v39, 2  ;;  %v2257_v52 = vshrl.u32 %v8252_v38, 16  ;;  %v2245_v56 = vor.u32 %v2244_v43, %v2241_v42  ;;  %v8256_v22 = vld [vmem:[#allocation2 + $0x2c] sm:$0xff]   ;;  %v8264_v27 = vld [vmem:[#allocation2 + $0x24] sm:$0xff]  }
 0x136   : > { %7694 = vmatmul.mubr.msk.bf16.vlgmr.msra.gmra.mxu0 %vm516_vm4, %v1996_v0  ;;  %v2260_v57 = vshll.u32 %v8252_v38, 16  ;;  %v2684_v58 = vshrl.u32 %v8254_v14, 16  ;;  %v2254_v61 = vor.u32 %v2253_v47, %v2250_v46  ;;  %v2687_v62 = vshll.u32 %v8254_v14, 16  ;;  %v8265_v30 = vld [vmem:[#allocation2 + $0x2c] sm:$0xff]  }
 0x137   : > { %7722 = vmatpush3.bf16.msra.mxu0 %v8726_v60  ;;  %7697 = vmatprep.mubr.msk.bf16.mxu0 %vm516_vm4, %v1998_v9  ;;  %v2001_v60 = vrot.slane %v8238_v17, 1  ;;  %v2466_v63 = vrot.slane %v8249_v48, 2  ;;  %v2468_v0 = vrot.slane %v8804_v51, 2  ;;  %v2259_v1 = vrot.slane %v2257_v52, 1  ;;  %v8259_v9 = vld [vmem:[#allocation2 + $0x1c] sm:$0xff]   ;;  %v8838_v36 = vld [vmem:[#allocation2 + $0x10] sm:$0xff]  }
 0x138   : > { %7723 = vmatprep.subr.bf16.mxu0 %v8239_v13  ;;  %v2679_v2 = vshll.u32 %v8253_v49, 16  ;;  %v2246_v4 = vsel %vm885_vm2, %v2236_v34, %v2245_v56  ;;  %v2262_v5 = vrot.slane %v2260_v57, 2  ;;  %v2686_v6 = vrot.slane %v2684_v58, 2  ;;  %v8261_v35 = vld [vmem:[#allocation2 + $0x34] ss:$0 sps:$4 sm:$0x33]  }
 0x139   : > { %v2002_v32 = vsel %vm1991_vm6, %v1999_v19, %v2001_v60  ;;  %v2004_v55 = vsel %vm1991_vm6, %v2001_v60, %v2003_v41  ;;  %v2255_v7 = vsel %vm885_vm2, %v2245_v56, %v2254_v61  ;;  %v2689_v8 = vrot.slane %v2687_v62, 3  ;;  %v8270_v52 = vld [vmem:[#allocation2 + $0x34] ss:$0 sps:$4 sm:$0x77]  }
 0x13a   : > { %v2681_v16 = vrot.slane %v2679_v2, 3  ;;  %v2693_v17 = vshrl.u32 %v8258_v3, 16  ;;  %v2467_v18 = vsel %vm1187_vm3, %v2464_v45, %v2466_v63  ;;  %v2263_v19 = vor.u32 %v2262_v5, %v2259_v1  ;;  %v8272_v57 = vld [vmem:[#allocation2 + $0x10] sm:$0xff]   ;;  %v8267_v2 = vld [vmem:[#allocation2 + $0x18] sm:$0xff]  }
 0x13b   : > { %7686 = vmatmul.mubr.msk.bf16.gmra.mxu1 %vm516_vm4, %v1792_v54  ;;  %7724 = vmatpush3.bf16.msra.mxu0 %v8239_v13  ;;  %v2676_v13 = vshrl.u32 %v8253_v49, 16  ;;  %v2696_v20 = vshll.u32 %v8258_v3, 16  ;;  %v2469_v54 = vsel %vm1187_vm3, %v2466_v63, %v2468_v0  ;;  %v2690_v21 = vor.u32 %v2689_v8, %v2686_v6  ;;  %v8268_v3 = vld [vmem:[#allocation2 + $0x20] sm:$0xff]  }
 0x13c   : > { %7709 = vmatprep.mubr.msk.bf16.mxu1 %vm516_vm4, %v2219_v23  ;;  %7753 = vmatprep.subr.bf16.mxu0 %v8780_v15  ;;  %v2702_v23 = vshrl.u32 %v8259_v9, 16  ;;  %v2705_v24 = vshll.u32 %v8259_v9, 16  ;;  %v2470_v26 = vrot.slane %v8255_v11, 2  ;;  %v2695_v60 = vrot.slane %v2693_v17, 2  ;;  %v8277_v17 = vld [vmem:[#allocation2 + $0x20] sm:$0xff]  }
 0x13d   : > { %v2678_v10 = vrot.slane %v2676_v13, 2  ;;  %v2264_v59 = vsel %vm885_vm2, %v2254_v61, %v2263_v19  ;;  %v2698_v29 = vrot.slane %v2696_v20, 3  ;;  %v2472_v31 = vrot.slane %v8256_v22, 2  ;;  %v8276_v19 = vld [vmem:[#allocation2 + $0x18] sm:$0xff]  }
 0x13e   : > { %7698 = vmatmul.mubr.msk.bf16.gmra.mxu0 %vm516_vm4, %v2000_v28  ;;  %v8832_v28 = vld [vmem:[%s9661_s3 + $0x88] sm:$0xff]   ;;  %v2707_v34 = vrot.slane %v2705_v24, 3  ;;  %v2714_v38 = vshll.u32 %v8264_v27, 16  ;;  %v2471_v39 = vsel %vm1187_vm3, %v2468_v0, %v2470_v26  ;;  %v2720_v41 = vshrl.u32 %v8265_v30, 16 }
 0x13f   : > { %7701 = vmatprep.mubr.msk.bf16.mxu0 %vm516_vm4, %v2002_v32  ;;  %v2682_v25 = vor.u32 %v2681_v16, %v2678_v10  ;;  %v2704_v32 = vrot.slane %v2702_v23, 2  ;;  %v2473_v42 = vsel %vm1187_vm3, %v2470_v26, %v2472_v31  ;;  %v2723_v14 = vshll.u32 %v8265_v30, 16  ;;  %v8274_v26 = vld [vmem:[#allocation2 + $0x30] sm:$0xff]  }
 0x140   : > { %v2474_v46 = vrot.slane %v8261_v35, 2  ;;  %v2937_v47 = vrot.slane %v8838_v36, 3  ;;  %v2716_v49 = vrot.slane %v2714_v38, 3  ;;  %v2722_v51 = vrot.slane %v2720_v41, 2 }
 0x141   : > { %v2708_v43 = vor.u32 %v2707_v34, %v2704_v32  ;;  %v2725_v56 = vrot.slane %v2723_v14, 3  ;;  %v2729_v63 = vshrl.u32 %v8270_v52, 16  ;;  %v2732_v13 = vshll.u32 %v8270_v52, 16 }
 0x142   : > { %v2475_v61 = vsel %vm1187_vm3, %v2472_v31, %v2474_v46  ;;  %v3160_v5 = vshll.u32 %v8272_v57, 16  ;;  %v2941_v11 = vrot.slane %v8268_v3, 3  ;;  %v3169_v30 = vshll.u32 %v8276_v19, 16  ;;  %v8278_v46 = vld [vmem:[#allocation2 + $0x38] ss:$0 sps:$4 sm:$0x77]  }
 0x143   : > { %7710 = vmatmul.mubr.msk.bf16.vlgmr.msra.gmra.mxu1 %vm516_vm4, %v2228_v40  ;;  %v2699_v40 = vor.u32 %v2698_v29, %v2695_v60  ;;  %v2726_v1 = vor.u32 %v2725_v56, %v2722_v51  ;;  %v2731_v8 = vrot.slane %v2729_v63, 2  ;;  %v2734_v9 = vrot.slane %v2732_v13, 3 }
 0x144   : > { %7713 = vmatprep.mubr.msk.bf16.mxu1 %vm516_vm4, %v2237_v44  ;;  %7738 = vmatpush3.bf16.msra.mxu1 %v8754_v33  ;;  %v2465_v33 = vsel %vm1187_vm3, %v2463_v50, %v2464_v45  ;;  %v8269_v44 = vld [vmem:[%s9661_s3 + $0x70] sm:$0xff]   ;;  %v8262_v45 = vld [vmem:[#allocation2 + $0x8] sm:$0xf8]   ;;  %v3162_v16 = vrot.slane %v3160_v5, 4  ;;  %v3175_v60 = vshrl.u32 %v8277_v17, 16  ;;  %v3166_v29 = vshrl.u32 %v8276_v19, 16 }
 0x145   : > { %7739 = vmatprep.subr.bf16.mxu1 %v8251_v37  ;;  %v2700_v50 = vsel %vm2674_vm7, %v2690_v21, %v2699_v40  ;;  %v2936_v58 = vrot.slane %v8262_v45, 3  ;;  %v2735_v23 = vor.u32 %v2734_v9, %v2731_v8  ;;  %v2945_v34 = vrot.slane %v8274_v26, 3  ;;  %v8282_v5 = vld [vmem:[#allocation2 + $0x14] sm:$0xff]   ;;  %v8285_v8 = vld [vmem:[#allocation2 + $0x24] sm:$0xff]   ;;  %v8286_v9 = vld [vmem:[#allocation2 + $0x2c] sm:$0xff]  }
 0x146   : > { %7702 = vmatmul.mubr.msk.bf16.gmra.mxu0 %vm516_vm4, %v2004_v55  ;;  %v2709_v55 = vsel %vm2674_vm7, %v2699_v40, %v2708_v43  ;;  %v3177_v35 = vrot.slane %v3175_v60, 3  ;;  %v3168_v38 = vrot.slane %v3166_v29, 3  ;;  %v8280_v40 = vld [vmem:[#allocation2 + $0x28] sm:$0xff]   ;;  %v8293_v26 = vld [vmem:[%s9663_s5 + $0x10] sm:$0xff]  }
 0x147   : > { %7725 = vmatprep.mubr.msk.bf16.mxu0 %vm516_vm4, %v2465_v33  ;;  %v8271_v33 = vld [vmem:[#allocation2 + $0x8] sm:$0xf8]   ;;  %v2938_v0 = vsel %vm2935_vm8, %v2936_v58, %v2937_v47  ;;  %v2736_v31 = vsel %vm2674_vm7, %v2726_v1, %v2735_v23  ;;  %v8284_v58 = vld [vmem:[#allocation2 + $0x38] ss:$0 sps:$4 sm:$0xff]  }
 0x148   : > { %7740 = vmatpush3.bf16.msra.mxu1 %v8251_v37  ;;  %v2711_v37 = vshrl.u32 %v8264_v27, 16  ;;  %v3152_v6 = vshll.u32 %v8271_v33, 16  ;;  %v3178_v27 = vshll.u32 %v8277_v17, 16  ;;  %v3202_v13 = vshrl.u32 %v8284_v58, 16 }
 0x149   : > { %7769 = vmatprep.subr.bf16.mxu1 %v8809_v53 }
 0x14a   : > { %v2713_v48 = vrot.slane %v2711_v37, 2  ;;  %v3180_v36 = vrot.slane %v3178_v27, 4  ;;  %v8281_v37 = vld [vmem:[#allocation2 + $0x30] sm:$0xff]   ;;  %v3204_v3 = vrot.slane %v3202_v13, 3 }
 0x14b   : > { %7714 = vmatmul.mubr.msk.bf16.gmra.mxu1 %vm516_vm4, %v2246_v4  ;;  %v3157_v4 = vshrl.u32 %v8272_v57, 16  ;;  %v3193_v14 = vshrl.u32 %v8281_v37, 16 }
 0x14c   : > { %7717 = vmatprep.mubr.msk.bf16.mxu1 %vm516_vm4, %v2255_v7  ;;  %v2717_v62 = vor.u32 %v2716_v49, %v2713_v48  ;;  %v3187_v48 = vshll.u32 %v8280_v40, 16 }
 0x14d   : > { %v3195_v51 = vrot.slane %v3193_v14, 3 }
 0x14e   : > { %7726 = vmatmul.mubr.msk.bf16.vlgmr.msra.gmra.mxu0 %vm516_vm4, %v2467_v18  ;;  %v2718_v7 = vsel %vm2674_vm7, %v2708_v43, %v2717_v62  ;;  %v2727_v10 = vsel %vm2674_vm7, %v2717_v62, %v2726_v1  ;;  %v2939_v18 = vrot.slane %v8267_v2, 3  ;;  %v3181_v43 = vor.u32 %v3180_v36, %v3177_v35 }
 0x14f   : > { %7754 = vmatpush3.bf16.msra.mxu0 %v8780_v15  ;;  %7729 = vmatprep.mubr.msk.bf16.mxu0 %vm516_vm4, %v2469_v54  ;;  %v2691_v15 = vsel %vm2674_vm7, %v2682_v25, %v2690_v21  ;;  %v3154_v54 = vrot.slane %v3152_v6, 4  ;;  %v8275_v21 = vld [vmem:[%s9661_s3 + $0x80] sm:$0xff]   ;;  %v3189_v57 = vrot.slane %v3187_v48, 4 }
 0x150   : > { %7755 = vmatprep.subr.bf16.mxu0 %v8257_v12  ;;  %v2940_v22 = vsel %vm2935_vm8, %v2937_v47, %v2939_v18  ;;  %v2942_v24 = vsel %vm2935_vm8, %v2939_v18, %v2941_v11  ;;  %v3184_v47 = vshrl.u32 %v8280_v40, 16 }
 0x152   : > { %v3186_v56 = vrot.slane %v3184_v47, 3 }
 0x153   : > { %7718 = vmatmul.mubr.msk.bf16.gmra.mxu1 %vm516_vm4, %v2264_v59  ;;  %7756 = vmatpush3.bf16.msra.mxu0 %v8257_v12  ;;  %v3159_v12 = vrot.slane %v3157_v4, 3  ;;  %v8273_v59 = vld [vmem:[#allocation2 + $0x28] sm:$0xff]  }
 0x154   : > { %7741 = vmatprep.mubr.msk.bf16.mxu1 %vm516_vm4, %v2691_v15  ;;  %7785 = vmatprep.subr.bf16.mxu0 %v8832_v28  ;;  %v3190_v63 = vor.u32 %v3189_v57, %v3186_v56 }
 0x155   : > { %v3163_v25 = vor.u32 %v3162_v16, %v3159_v12  ;;  %v8411_v12 = vmov 0.0  }
 0x156   : > { %7730 = vmatmul.mubr.msk.bf16.gmra.mxu0 %vm516_vm4, %v2471_v39  ;;  %v3171_v39 = vrot.slane %v3169_v30, 4  ;;  %v3191_v1 = vsel %vm3147_vm9, %v3181_v43, %v3190_v63 }
 0x157   : > { %7733 = vmatprep.mubr.msk.bf16.mxu0 %vm516_vm4, %v2473_v42 }
 0x158   : > { %v3172_v45 = vor.u32 %v3171_v39, %v3168_v38 }
 0x15a   : > { %v3173_v49 = vsel %vm3147_vm9, %v3163_v25, %v3172_v45 }
 0x15b   : > { %7742 = vmatmul.mubr.msk.bf16.vlgmr.msra.gmra.mxu1 %vm516_vm4, %v2700_v50  ;;  %v3182_v50 = vsel %vm3147_vm9, %v3172_v45, %v3181_v43 }
 0x15c   : > { %7745 = vmatprep.mubr.msk.bf16.mxu1 %vm516_vm4, %v2709_v55  ;;  %7770 = vmatpush3.bf16.msra.mxu1 %v8809_v53  ;;  %v3149_v53 = vshrl.u32 %v8271_v33, 16  ;;  %v2947_v55 = vrot.slane %v8278_v46, 3 }
 0x15d   : > { %7771 = vmatprep.subr.bf16.mxu1 %v8269_v44 }
 0x15e   : > { %7734 = vmatmul.mubr.msk.bf16.gmra.mxu0 %vm516_vm4, %v2475_v61  ;;  %v3151_v20 = vrot.slane %v3149_v53, 3  ;;  %v2948_v33 = vsel %vm2935_vm8, %v2945_v34, %v2947_v55  ;;  %v8279_v61 = vld [vmem:[#allocation2 + $0xc] sm:$0xff]   ;;  %v8283_v53 = vld [vmem:[#allocation2 + $0x1c] sm:$0xff]  }
 0x15f   : > { %7757 = vmatprep.mubr.msk.bf16.mxu0 %vm516_vm4, %v2938_v0  ;;  %v3205_v0 = vshll.u32 %v8284_v58, 16 }
 0x160   : > { %7772 = vmatpush3.bf16.msra.mxu1 %v8269_v44  ;;  %v3155_v15 = vor.u32 %v3154_v54, %v3151_v20  ;;  %v3196_v44 = vshll.u32 %v8281_v37, 16 }
 0x161   : > { %v3207_v4 = vrot.slane %v3205_v0, 4  ;;  %7801 = vmatprep.subr.bf16.mxu1 %v8411_v12 }
 0x162   : > { %v3164_v32 = vsel %vm3147_vm9, %v3155_v15, %v3163_v25  ;;  %v3198_v52 = vrot.slane %v3196_v44, 4 }
 0x163   : > { %7746 = vmatmul.mubr.msk.bf16.gmra.mxu1 %vm516_vm4, %v2718_v7  ;;  %v3208_v6 = vor.u32 %v3207_v4, %v3204_v3 }
 0x164   : > { %7749 = vmatprep.mubr.msk.bf16.mxu1 %vm516_vm4, %v2727_v10  ;;  %v3199_v62 = vor.u32 %v3198_v52, %v3195_v51  ;;  %v8287_v10 = vld [vmem:[#allocation2 + $0x34] sm:$0xff]  }
 0x166   : > { %7758 = vmatmul.mubr.msk.bf16.vlgmr.msra.gmra.mxu0 %vm516_vm4, %v2940_v22  ;;  %v3200_v2 = vsel %vm3147_vm9, %v3190_v63, %v3199_v62  ;;  %v3209_v7 = vsel %vm3147_vm9, %v3199_v62, %v3208_v6  ;;  %v8291_v22 = vld [vmem:[%s9663_s5 + $0x18] sm:$0xff]  }
 0x167   : > { %7786 = vmatpush3.bf16.msra.mxu0 %v8832_v28  ;;  %7761 = vmatprep.mubr.msk.bf16.mxu0 %vm516_vm4, %v2942_v24  ;;  %v2943_v28 = vrot.slane %v8273_v59, 3 }
 0x168   : > { %7787 = vmatprep.subr.bf16.mxu0 %v8275_v21 }
 0x169   : > { %v2944_v41 = vsel %vm2935_vm8, %v2941_v11, %v2943_v28  ;;  %v2946_v42 = vsel %vm2935_vm8, %v2943_v28, %v2945_v34  ;;  %v8288_v11 = vld [vmem:[%s9663_s5 + $0x8] sm:$0xff]  }
 0x16b   : > { %7750 = vmatmul.mubr.msk.bf16.gmra.mxu1 %vm516_vm4, %v2736_v31  ;;  %7788 = vmatpush3.bf16.msra.mxu0 %v8275_v21  ;;  %v8289_v21 = vld [vmem:[%s9663_s5] sm:$0xff]  }
 0x16c   : > { %7773 = vmatprep.mubr.msk.bf16.mxu1 %vm516_vm4, %v3164_v32  ;;  %7825 = vmatprep.subr.bf16.mxu0 %v8411_v12 }
 0x16e   : > { %7762 = vmatmul.mubr.msk.bf16.gmra.mxu0 %vm516_vm4, %v2944_v41 }
 0x16f   : > { %7765 = vmatprep.mubr.msk.bf16.mxu0 %vm516_vm4, %v2946_v42 }
 0x173   : > { %7774 = vmatmul.mubr.msk.bf16.vlgmr.msra.gmra.mxu1 %vm516_vm4, %v3173_v49 }
 0x174   : > { %7777 = vmatprep.mubr.msk.bf16.mxu1 %vm516_vm4, %v3182_v50  ;;  %7802 = vmatpush3.bf16.msra.mxu1 %v8288_v11 }
 0x175   : > { %7803 = vmatprep.subr.bf16.mxu1 %v8411_v12 }
 0x176   : > { %7766 = vmatmul.mubr.msk.bf16.gmra.mxu0 %vm516_vm4, %v2948_v33 }
 0x177   : > { %7789 = vmatprep.mubr.msk.bf16.mxu0 %vm516_vm4, %v8279_v61 }
 0x178   : > { %7804 = vmatpush3.bf16.msra.mxu1 %v8289_v21 }
 0x179   : > { %7849 = vmatprep.subr.bf16.mxu1 %v8411_v12 }
 0x17b   : > { %7778 = vmatmul.mubr.msk.bf16.gmra.mxu1 %vm516_vm4, %v3191_v1 }
 0x17c   : > { %7781 = vmatprep.mubr.msk.bf16.mxu1 %vm516_vm4, %v3200_v2 }
 0x17e   : > { %7790 = vmatmul.mubr.msk.bf16.vlgmr.msra.gmra.mxu0 %vm516_vm4, %v8282_v5 }
 0x17f   : > { %7793 = vmatprep.mubr.msk.bf16.mxu0 %vm516_vm4, %v8283_v53  ;;  %7826 = vmatpush3.bf16.msra.mxu0 %v8291_v22 }
 0x180   : > { %7827 = vmatprep.subr.bf16.mxu0 %v8411_v12 }
 0x183   : > { %7782 = vmatmul.mubr.msk.bf16.gmra.mxu1 %vm516_vm4, %v3209_v7  ;;  %7828 = vmatpush3.bf16.msra.mxu0 %v8293_v26 }
 0x184   : > { %7805 = vmatprep.mubr.msk.bf16.mxu1 %vm8412_vm10, %v8411_v12  ;;  %7873 = vmatprep.subr.bf16.mxu0 %v8411_v12 }
 0x186   : > { %7794 = vmatmul.mubr.msk.bf16.gmra.mxu0 %vm516_vm4, %v8285_v8 }
 0x187   : > { %7797 = vmatprep.mubr.msk.bf16.mxu0 %vm516_vm4, %v8286_v9 }
 0x18e   : > { %7798 = vmatmul.mubr.msk.bf16.gmra.mxu0 %vm516_vm4, %v8287_v10 }
 0x18f   : > { %7829 = vmatprep.mubr.msk.bf16.mxu0 %vm8412_vm10, %v8411_v12 }
 0x1dd   : > { %v7663_v16 = vpop.f32.mrf.mxu0 }
 0x1de   : > { %1680 = vst.msk [vmem:[#allocation5 + $0x10] sm:$0xff] %vm516_vm4, %v7663_v16 }
 0x1df   : > { %v1631_v17 = vpop.f32.mrf.mxu0 }
 0x1e0   : > { %1678 = vst.msk [vmem:[#allocation5] sm:$0xff] %vm516_vm4, %v1631_v17 }
 0x1e1   : > { %v7664_v18 = vpop.f32.mrf.mxu0 }
 0x1e2   : > { %1681 = vst.msk [vmem:[#allocation5 + $0x18] sm:$0xff] %vm516_vm4, %v7664_v18 }
 0x1e3   : > { %v1634_v19 = vpop.f32.mrf.mxu0 }
 0x1e4   : > { %1679 = vst.msk [vmem:[#allocation5 + $0x8] sm:$0xff] %vm516_vm4, %v1634_v19 }
 0x1e5   : > { %v7667_v20 = vpop.f32.mrf.mxu0  ;;  %v1906_v25 = vld [vmem:[#allocation5 + $0x10] sm:$0xff] }
 0x1e6   : > { %1684 = vst.msk [vmem:[#allocation5 + $0x30] sm:$0xff] %vm516_vm4, %v7667_v20 }
 0x1e7   : > { %v1647_v54 = vpop.f32.mrf.mxu0  ;;  %v1904_v29 = vld [vmem:[#allocation5] sm:$0xff] }
 0x1e8   : > { %1682 = vst.msk [vmem:[#allocation5 + $0x20] sm:$0xff] %vm516_vm4, %v1647_v54 }
 0x1e9   : > { %v7668_v23 = vpop.f32.mrf.mxu0  ;;  %v1907_v32 = vld [vmem:[#allocation5 + $0x18] sm:$0xff] }
 0x1ea   : > { %v7679_v24 = vpop.f32.mrf.mxu1  ;;  %1685 = vst.msk [vmem:[#allocation5 + $0x38] sm:$0xff] %vm516_vm4, %v7668_v23 }
 0x1eb   : > { %v1918_v60 = vadd.f32 %v7679_v24, %v1906_v25  ;;  %v1650_v27 = vpop.f32.mrf.mxu0  ;;  %v1905_v37 = vld [vmem:[#allocation5 + $0x8] sm:$0xff] }
 0x1ec   : > { %v1857_v59 = vpop.f32.mrf.mxu1  ;;  %1683 = vst.msk [vmem:[#allocation5 + $0x28] sm:$0xff] %vm516_vm4, %v1650_v27 }
 0x1ed   : > { %1930 = vst.msk [vmem:[#allocation5 + $0x10] sm:$0xff] %vm516_vm4, %v1918_v60  ;;  %v1916_v30 = vadd.f32 %v1904_v29, %v1857_v59  ;;  %v1910_v40 = vld [vmem:[#allocation5 + $0x30] sm:$0xff] }
 0x1ee   : > { %v7671_v15 = vpop.f32.mrf.mxu0  ;;  %v7680_v31 = vpop.f32.mrf.mxu1 }
 0x1ef   : > { %1928 = vst.msk [vmem:[#allocation5] sm:$0xff] %vm516_vm4, %v1916_v30  ;;  %1688 = vst.msk [vmem:[#allocation5 + $0x50] sm:$0xff] %vm516_vm4, %v7671_v15  ;;  %v1919_v34 = vadd.f32 %v7680_v31, %v1907_v32  ;;  %v1908_v14 = vld [vmem:[#allocation5 + $0x20] sm:$0xff] }
 0x1f0   : > { %v1663_v35 = vpop.f32.mrf.mxu0  ;;  %v1860_v36 = vpop.f32.mrf.mxu1 }
 0x1f1   : > { %1931 = vst.msk [vmem:[#allocation5 + $0x18] sm:$0xff] %vm516_vm4, %v1919_v34  ;;  %1686 = vst.msk [vmem:[#allocation5 + $0x40] sm:$0xff] %vm516_vm4, %v1663_v35  ;;  %v1917_v28 = vadd.f32 %v1905_v37, %v1860_v36  ;;  %v1911_v46 = vld [vmem:[#allocation5 + $0x38] sm:$0xff] }
 0x1f2   : > { %v7672_v38 = vpop.f32.mrf.mxu0 }
 0x1f3   : > { %v7683_v39 = vpop.f32.mrf.mxu1  ;;  %1929 = vst.msk [vmem:[#allocation5 + $0x8] sm:$0xff] %vm516_vm4, %v1917_v28  ;;  %1689 = vst.msk [vmem:[#allocation5 + $0x58] sm:$0xff] %vm516_vm4, %v7672_v38  ;;  %v1909_v52 = vld [vmem:[#allocation5 + $0x28] sm:$0xff] }
 0x1f4   : > { %v1922_v41 = vadd.f32 %v7683_v39, %v1910_v40  ;;  %v1666_v42 = vpop.f32.mrf.mxu0  ;;  %v2118_v48 = vld [vmem:[#allocation5 + $0x10] sm:$0xff] }
 0x1f5   : > { %v1873_v43 = vpop.f32.mrf.mxu1  ;;  %1687 = vst.msk [vmem:[#allocation5 + $0x48] sm:$0xff] %vm516_vm4, %v1666_v42 }
 0x1f6   : > { %1934 = vst.msk [vmem:[#allocation5 + $0x30] sm:$0xff] %vm516_vm4, %v1922_v41  ;;  %v1920_v44 = vadd.f32 %v1908_v14, %v1873_v43  ;;  %v7695_v47 = vpop.f32.mrf.mxu0  ;;  %v2116_v56 = vld [vmem:[#allocation5] sm:$0xff]  ;;  %v1914_v61 = vld [vmem:[#allocation5 + $0x50] sm:$0xff] }
 0x1f7   : > { %v7684_v45 = vpop.f32.mrf.mxu1  ;;  %v2130_v50 = vadd.f32 %v7695_v47, %v2118_v48 }
 0x1f8   : > { %1932 = vst.msk [vmem:[#allocation5 + $0x20] sm:$0xff] %vm516_vm4, %v1920_v44  ;;  %v1923_v49 = vadd.f32 %v7684_v45, %v1911_v46  ;;  %v2069_v55 = vpop.f32.mrf.mxu0  ;;  %v2119_v63 = vld [vmem:[#allocation5 + $0x18] sm:$0xff]  ;;  %v1912_v2 = vld [vmem:[#allocation5 + $0x40] sm:$0xff] }
 0x1f9   : > { %v1876_v51 = vpop.f32.mrf.mxu1  ;;  %2142 = vst.msk [vmem:[#allocation5 + $0x10] sm:$0xff] %vm516_vm4, %v2130_v50  ;;  %v2128_v58 = vadd.f32 %v2116_v56, %v2069_v55 }
 0x1fa   : > { %1935 = vst.msk [vmem:[#allocation5 + $0x38] sm:$0xff] %vm516_vm4, %v1923_v49  ;;  %v1921_v57 = vadd.f32 %v1909_v52, %v1876_v51  ;;  %v7696_v62 = vpop.f32.mrf.mxu0  ;;  %v2117_v4 = vld [vmem:[#allocation5 + $0x8] sm:$0xff]  ;;  %v1915_v7 = vld [vmem:[#allocation5 + $0x58] sm:$0xff] }
 0x1fb   : > { %v7687_v33 = vpop.f32.mrf.mxu1  ;;  %2140 = vst.msk [vmem:[#allocation5] sm:$0xff] %vm516_vm4, %v2128_v58  ;;  %v2131_v0 = vadd.f32 %v7696_v62, %v2119_v63 }
 0x1fc   : > { %1933 = vst.msk [vmem:[#allocation5 + $0x28] sm:$0xff] %vm516_vm4, %v1921_v57  ;;  %v1926_v13 = vadd.f32 %v7687_v33, %v1914_v61  ;;  %v2072_v3 = vpop.f32.mrf.mxu0  ;;  %v1913_v17 = vld [vmem:[#allocation5 + $0x48] sm:$0xff] }
 0x1fd   : > { %v1889_v1 = vpop.f32.mrf.mxu1  ;;  %2143 = vst.msk [vmem:[#allocation5 + $0x18] sm:$0xff] %vm516_vm4, %v2131_v0  ;;  %v2129_v53 = vadd.f32 %v2117_v4, %v2072_v3  ;;  %v2122_v9 = vld [vmem:[#allocation5 + $0x30] sm:$0xff] }
 0x1fe   : > { %1938 = vst.msk [vmem:[#allocation5 + $0x50] sm:$0xff] %vm516_vm4, %v1926_v13  ;;  %v1924_v5 = vadd.f32 %v1912_v2, %v1889_v1  ;;  %v7699_v8 = vpop.f32.mrf.mxu0 }
 0x1ff   : > { %v7688_v6 = vpop.f32.mrf.mxu1  ;;  %2141 = vst.msk [vmem:[#allocation5 + $0x8] sm:$0xff] %vm516_vm4, %v2129_v53  ;;  %v2134_v11 = vadd.f32 %v7699_v8, %v2122_v9  ;;  %v2120_v19 = vld [vmem:[#allocation5 + $0x20] sm:$0xff] }
 0x200   : > { %1936 = vst.msk [vmem:[#allocation5 + $0x40] sm:$0xff] %vm516_vm4, %v1924_v5  ;;  %v1927_v10 = vadd.f32 %v7688_v6, %v1915_v7  ;;  %v2085_v18 = vpop.f32.mrf.mxu0  ;;  %v2378_v24 = vld [vmem:[#allocation5 + $0x10] sm:$0xff] }
 0x201   : > { %v1892_v16 = vpop.f32.mrf.mxu1  ;;  %2146 = vst.msk [vmem:[#allocation5 + $0x30] sm:$0xff] %vm516_vm4, %v2134_v11  ;;  %v2132_v54 = vadd.f32 %v2120_v19, %v2085_v18  ;;  %v2123_v22 = vld [vmem:[#allocation5 + $0x38] sm:$0xff] }
 0x202   : > { %1939 = vst.msk [vmem:[#allocation5 + $0x58] sm:$0xff] %vm516_vm4, %v1927_v10  ;;  %v1925_v20 = vadd.f32 %v1913_v17, %v1892_v16  ;;  %v7700_v21 = vpop.f32.mrf.mxu0  ;;  %v2376_v29 = vld [vmem:[#allocation5] sm:$0xff] }
 0x203   : > { %v7711_v23 = vpop.f32.mrf.mxu1  ;;  %2144 = vst.msk [vmem:[#allocation5 + $0x20] sm:$0xff] %vm516_vm4, %v2132_v54  ;;  %v2135_v25 = vadd.f32 %v7700_v21, %v2123_v22  ;;  %v2121_v27 = vld [vmem:[#allocation5 + $0x28] sm:$0xff] }
 0x204   : > { %1937 = vst.msk [vmem:[#allocation5 + $0x48] sm:$0xff] %vm516_vm4, %v1925_v20  ;;  %v2390_v26 = vadd.f32 %v7711_v23, %v2378_v24  ;;  %v2088_v60 = vpop.f32.mrf.mxu0  ;;  %v2379_v35 = vld [vmem:[#allocation5 + $0x18] sm:$0xff] }
 0x205   : > { %v2329_v59 = vpop.f32.mrf.mxu1  ;;  %2147 = vst.msk [vmem:[#allocation5 + $0x38] sm:$0xff] %vm516_vm4, %v2135_v25  ;;  %v2133_v30 = vadd.f32 %v2121_v27, %v2088_v60  ;;  %v2126_v32 = vld [vmem:[#allocation5 + $0x50] sm:$0xff] }
 0x206   : > { %2402 = vst.msk [vmem:[#allocation5 + $0x10] sm:$0xff] %vm516_vm4, %v2390_v26  ;;  %v2388_v15 = vadd.f32 %v2376_v29, %v2329_v59  ;;  %v7703_v31 = vpop.f32.mrf.mxu0  ;;  %v2377_v40 = vld [vmem:[#allocation5 + $0x8] sm:$0xff] }
 0x207   : > { %v7712_v34 = vpop.f32.mrf.mxu1  ;;  %2145 = vst.msk [vmem:[#allocation5 + $0x28] sm:$0xff] %vm516_vm4, %v2133_v30  ;;  %v2138_v36 = vadd.f32 %v7703_v31, %v2126_v32  ;;  %v2124_v38 = vld [vmem:[#allocation5 + $0x40] sm:$0xff] }
 0x208   : > { %2400 = vst.msk [vmem:[#allocation5] sm:$0xff] %vm516_vm4, %v2388_v15  ;;  %v2391_v37 = vadd.f32 %v7712_v34, %v2379_v35  ;;  %v2101_v28 = vpop.f32.mrf.mxu0  ;;  %v2382_v45 = vld [vmem:[#allocation5 + $0x30] sm:$0xff] }
 0x209   : > { %v2332_v39 = vpop.f32.mrf.mxu1  ;;  %2150 = vst.msk [vmem:[#allocation5 + $0x50] sm:$0xff] %vm516_vm4, %v2138_v36  ;;  %v2136_v41 = vadd.f32 %v2124_v38, %v2101_v28  ;;  %v2127_v14 = vld [vmem:[#allocation5 + $0x58] sm:$0xff] }
 0x20a   : > { %2403 = vst.msk [vmem:[#allocation5 + $0x18] sm:$0xff] %vm516_vm4, %v2391_v37  ;;  %v2389_v42 = vadd.f32 %v2377_v40, %v2332_v39  ;;  %v7704_v43 = vpop.f32.mrf.mxu0  ;;  %v2380_v51 = vld [vmem:[#allocation5 + $0x20] sm:$0xff] }
 0x20b   : > { %v7715_v44 = vpop.f32.mrf.mxu1  ;;  %2148 = vst.msk [vmem:[#allocation5 + $0x40] sm:$0xff] %vm516_vm4, %v2136_v41  ;;  %v2139_v46 = vadd.f32 %v7704_v43, %v2127_v14  ;;  %v2125_v49 = vld [vmem:[#allocation5 + $0x48] sm:$0xff] }
 0x20c   : > { %2401 = vst.msk [vmem:[#allocation5 + $0x8] sm:$0xff] %vm516_vm4, %v2389_v42  ;;  %v2394_v47 = vadd.f32 %v7715_v44, %v2382_v45  ;;  %v2104_v48 = vpop.f32.mrf.mxu0  ;;  %v2383_v57 = vld [vmem:[#allocation5 + $0x38] sm:$0xff] }
 0x20d   : > { %v2345_v50 = vpop.f32.mrf.mxu1  ;;  %2151 = vst.msk [vmem:[#allocation5 + $0x58] sm:$0xff] %vm516_vm4, %v2139_v46  ;;  %v2137_v52 = vadd.f32 %v2125_v49, %v2104_v48  ;;  %v2589_v33 = vld [vmem:[#allocation5 + $0x10] sm:$0xff] }
 0x20e   : > { %2406 = vst.msk [vmem:[#allocation5 + $0x30] sm:$0xff] %vm516_vm4, %v2394_v47  ;;  %v2392_v55 = vadd.f32 %v2380_v51, %v2345_v50  ;;  %v7727_v58 = vpop.f32.mrf.mxu0  ;;  %v2381_v13 = vld [vmem:[#allocation5 + $0x28] sm:$0xff] }
 0x20f   : > { %v7716_v56 = vpop.f32.mrf.mxu1  ;;  %2149 = vst.msk [vmem:[#allocation5 + $0x48] sm:$0xff] %vm516_vm4, %v2137_v52  ;;  %v2601_v62 = vadd.f32 %v7727_v58, %v2589_v33  ;;  %v2587_v1 = vld [vmem:[#allocation5] sm:$0xff] }
 0x210   : > { %2404 = vst.msk [vmem:[#allocation5 + $0x20] sm:$0xff] %vm516_vm4, %v2392_v55  ;;  %v2395_v61 = vadd.f32 %v7716_v56, %v2383_v57  ;;  %v2540_v0 = vpop.f32.mrf.mxu0  ;;  %v2386_v5 = vld [vmem:[#allocation5 + $0x50] sm:$0xff] }
 0x211   : > { %v2348_v63 = vpop.f32.mrf.mxu1  ;;  %2613 = vst.msk [vmem:[#allocation5 + $0x10] sm:$0xff] %vm516_vm4, %v2601_v62  ;;  %v2599_v3 = vadd.f32 %v2587_v1, %v2540_v0  ;;  %v2590_v6 = vld [vmem:[#allocation5 + $0x18] sm:$0xff] }
 0x212   : > { %2407 = vst.msk [vmem:[#allocation5 + $0x38] sm:$0xff] %vm516_vm4, %v2395_v61  ;;  %v2393_v2 = vadd.f32 %v2381_v13, %v2348_v63  ;;  %v7728_v53 = vpop.f32.mrf.mxu0  ;;  %v2384_v10 = vld [vmem:[#allocation5 + $0x40] sm:$0xff] }
 0x213   : > { %v7719_v4 = vpop.f32.mrf.mxu1  ;;  %2611 = vst.msk [vmem:[#allocation5] sm:$0xff] %vm516_vm4, %v2599_v3  ;;  %v2602_v8 = vadd.f32 %v7728_v53, %v2590_v6  ;;  %v2588_v16 = vld [vmem:[#allocation5 + $0x8] sm:$0xff] }
 0x214   : > { %2405 = vst.msk [vmem:[#allocation5 + $0x28] sm:$0xff] %vm516_vm4, %v2393_v2  ;;  %v2398_v7 = vadd.f32 %v7719_v4, %v2386_v5  ;;  %v2543_v11 = vpop.f32.mrf.mxu0  ;;  %v2387_v20 = vld [vmem:[#allocation5 + $0x58] sm:$0xff] }
 0x215   : > { %v2361_v9 = vpop.f32.mrf.mxu1  ;;  %2614 = vst.msk [vmem:[#allocation5 + $0x18] sm:$0xff] %vm516_vm4, %v2602_v8  ;;  %v2600_v18 = vadd.f32 %v2588_v16, %v2543_v11  ;;  %v2593_v21 = vld [vmem:[#allocation5 + $0x30] sm:$0xff] }
 0x216   : > { %2410 = vst.msk [vmem:[#allocation5 + $0x50] sm:$0xff] %vm516_vm4, %v2398_v7  ;;  %v2396_v17 = vadd.f32 %v2384_v10, %v2361_v9  ;;  %v7731_v54 = vpop.f32.mrf.mxu0  ;;  %v2385_v25 = vld [vmem:[#allocation5 + $0x48] sm:$0xff] }
 0x217   : > { %v7720_v19 = vpop.f32.mrf.mxu1  ;;  %2612 = vst.msk [vmem:[#allocation5 + $0x8] sm:$0xff] %vm516_vm4, %v2600_v18  ;;  %v2605_v23 = vadd.f32 %v7731_v54, %v2593_v21  ;;  %v2591_v60 = vld [vmem:[#allocation5 + $0x20] sm:$0xff] }
 0x218   : > { %2408 = vst.msk [vmem:[#allocation5 + $0x40] sm:$0xff] %vm516_vm4, %v2396_v17  ;;  %v2399_v22 = vadd.f32 %v7720_v19, %v2387_v20  ;;  %v2556_v26 = vpop.f32.mrf.mxu0  ;;  %v2850_v31 = vld [vmem:[#allocation5 + $0x10] sm:$0xff] }
 0x219   : > { %v2364_v24 = vpop.f32.mrf.mxu1  ;;  %2617 = vst.msk [vmem:[#allocation5 + $0x30] sm:$0xff] %vm516_vm4, %v2605_v23  ;;  %v2603_v59 = vadd.f32 %v2591_v60, %v2556_v26  ;;  %v2594_v30 = vld [vmem:[#allocation5 + $0x38] sm:$0xff] }
 0x21a   : > { %2411 = vst.msk [vmem:[#allocation5 + $0x58] sm:$0xff] %vm516_vm4, %v2399_v22  ;;  %v2397_v27 = vadd.f32 %v2385_v25, %v2364_v24  ;;  %v7732_v29 = vpop.f32.mrf.mxu0  ;;  %v2848_v28 = vld [vmem:[#allocation5] sm:$0xff] }
 0x21b   : > { %v7743_v15 = vpop.f32.mrf.mxu1  ;;  %2615 = vst.msk [vmem:[#allocation5 + $0x20] sm:$0xff] %vm516_vm4, %v2603_v59  ;;  %v2606_v32 = vadd.f32 %v7732_v29, %v2594_v30  ;;  %v2592_v36 = vld [vmem:[#allocation5 + $0x28] sm:$0xff] }
 0x21c   : > { %2409 = vst.msk [vmem:[#allocation5 + $0x48] sm:$0xff] %vm516_vm4, %v2397_v27  ;;  %v2862_v34 = vadd.f32 %v7743_v15, %v2850_v31  ;;  %v2559_v35 = vpop.f32.mrf.mxu0  ;;  %v2851_v43 = vld [vmem:[#allocation5 + $0x18] sm:$0xff] }
 0x21d   : > { %v2801_v37 = vpop.f32.mrf.mxu1  ;;  %2618 = vst.msk [vmem:[#allocation5 + $0x38] sm:$0xff] %vm516_vm4, %v2606_v32  ;;  %v2604_v38 = vadd.f32 %v2592_v36, %v2559_v35  ;;  %v2597_v41 = vld [vmem:[#allocation5 + $0x50] sm:$0xff] }
 0x21e   : > { %2874 = vst.msk [vmem:[#allocation5 + $0x10] sm:$0xff] %vm516_vm4, %v2862_v34  ;;  %v2860_v39 = vadd.f32 %v2848_v28, %v2801_v37  ;;  %v7735_v40 = vpop.f32.mrf.mxu0  ;;  %v2849_v48 = vld [vmem:[#allocation5 + $0x8] sm:$0xff] }
 0x21f   : > { %v7744_v42 = vpop.f32.mrf.mxu1  ;;  %2616 = vst.msk [vmem:[#allocation5 + $0x28] sm:$0xff] %vm516_vm4, %v2604_v38  ;;  %v2609_v14 = vadd.f32 %v7735_v40, %v2597_v41  ;;  %v2595_v46 = vld [vmem:[#allocation5 + $0x40] sm:$0xff] }
 0x220   : > { %2872 = vst.msk [vmem:[#allocation5] sm:$0xff] %vm516_vm4, %v2860_v39  ;;  %v2863_v44 = vadd.f32 %v7744_v42, %v2851_v43  ;;  %v2572_v45 = vpop.f32.mrf.mxu0  ;;  %v2854_v56 = vld [vmem:[#allocation5 + $0x30] sm:$0xff] }
 0x221   : > { %v2804_v47 = vpop.f32.mrf.mxu1  ;;  %2621 = vst.msk [vmem:[#allocation5 + $0x50] sm:$0xff] %vm516_vm4, %v2609_v14  ;;  %v2607_v49 = vadd.f32 %v2595_v46, %v2572_v45  ;;  %v2598_v52 = vld [vmem:[#allocation5 + $0x58] sm:$0xff] }
 0x222   : > { %2875 = vst.msk [vmem:[#allocation5 + $0x18] sm:$0xff] %vm516_vm4, %v2863_v44  ;;  %v2861_v50 = vadd.f32 %v2849_v48, %v2804_v47  ;;  %v7736_v51 = vpop.f32.mrf.mxu0  ;;  %v2852_v63 = vld [vmem:[#allocation5 + $0x20] sm:$0xff] }
 0x223   : > { %v7747_v55 = vpop.f32.mrf.mxu1  ;;  %2619 = vst.msk [vmem:[#allocation5 + $0x40] sm:$0xff] %vm516_vm4, %v2607_v49  ;;  %v2610_v57 = vadd.f32 %v7736_v51, %v2598_v52  ;;  %v2596_v61 = vld [vmem:[#allocation5 + $0x48] sm:$0xff] }
 0x224   : > { %2873 = vst.msk [vmem:[#allocation5 + $0x8] sm:$0xff] %vm516_vm4, %v2861_v50  ;;  %v2866_v58 = vadd.f32 %v7747_v55, %v2854_v56  ;;  %v2575_v33 = vpop.f32.mrf.mxu0  ;;  %v2855_v2 = vld [vmem:[#allocation5 + $0x38] sm:$0xff] }
 0x225   : > { %v2817_v62 = vpop.f32.mrf.mxu1  ;;  %2622 = vst.msk [vmem:[#allocation5 + $0x58] sm:$0xff] %vm516_vm4, %v2610_v57  ;;  %v2608_v13 = vadd.f32 %v2596_v61, %v2575_v33  ;;  %v3062_v4 = vld [vmem:[#allocation5 + $0x10] sm:$0xff] }
 0x226   : > { %2878 = vst.msk [vmem:[#allocation5 + $0x30] sm:$0xff] %vm516_vm4, %v2866_v58  ;;  %v2864_v0 = vadd.f32 %v2852_v63, %v2817_v62  ;;  %v7759_v3 = vpop.f32.mrf.mxu0  ;;  %v2853_v7 = vld [vmem:[#allocation5 + $0x28] sm:$0xff] }
 0x227   : > { %v7748_v1 = vpop.f32.mrf.mxu1  ;;  %2620 = vst.msk [vmem:[#allocation5 + $0x48] sm:$0xff] %vm516_vm4, %v2608_v13  ;;  %v3074_v53 = vadd.f32 %v7759_v3, %v3062_v4  ;;  %v3060_v9 = vld [vmem:[#allocation5] sm:$0xff] }
 0x228   : > { %2876 = vst.msk [vmem:[#allocation5 + $0x20] sm:$0xff] %vm516_vm4, %v2864_v0  ;;  %v2867_v5 = vadd.f32 %v7748_v1, %v2855_v2  ;;  %v3013_v8 = vpop.f32.mrf.mxu0  ;;  %v2858_v17 = vld [vmem:[#allocation5 + $0x50] sm:$0xff] }
 0x229   : > { %v2820_v6 = vpop.f32.mrf.mxu1  ;;  %3086 = vst.msk [vmem:[#allocation5 + $0x10] sm:$0xff] %vm516_vm4, %v3074_v53  ;;  %v3072_v11 = vadd.f32 %v3060_v9, %v3013_v8  ;;  %v3063_v19 = vld [vmem:[#allocation5 + $0x18] sm:$0xff] }
 0x22a   : > { %2879 = vst.msk [vmem:[#allocation5 + $0x38] sm:$0xff] %vm516_vm4, %v2867_v5  ;;  %v2865_v10 = vadd.f32 %v2853_v7, %v2820_v6  ;;  %v7760_v18 = vpop.f32.mrf.mxu0  ;;  %v2856_v22 = vld [vmem:[#allocation5 + $0x40] sm:$0xff] }
 0x22b   : > { %v7751_v16 = vpop.f32.mrf.mxu1  ;;  %3084 = vst.msk [vmem:[#allocation5] sm:$0xff] %vm516_vm4, %v3072_v11  ;;  %v3075_v54 = vadd.f32 %v7760_v18, %v3063_v19  ;;  %v3061_v24 = vld [vmem:[#allocation5 + $0x8] sm:$0xff] }
 0x22c   : > { %2877 = vst.msk [vmem:[#allocation5 + $0x28] sm:$0xff] %vm516_vm4, %v2865_v10  ;;  %v2870_v20 = vadd.f32 %v7751_v16, %v2858_v17  ;;  %v3016_v23 = vpop.f32.mrf.mxu0  ;;  %v2859_v27 = vld [vmem:[#allocation5 + $0x58] sm:$0xff] }
 0x22d   : > { %v2833_v21 = vpop.f32.mrf.mxu1  ;;  %3087 = vst.msk [vmem:[#allocation5 + $0x18] sm:$0xff] %vm516_vm4, %v3075_v54  ;;  %v3073_v26 = vadd.f32 %v3061_v24, %v3016_v23  ;;  %v3066_v29 = vld [vmem:[#allocation5 + $0x30] sm:$0xff] }
 0x22e   : > { %2882 = vst.msk [vmem:[#allocation5 + $0x50] sm:$0xff] %vm516_vm4, %v2870_v20  ;;  %v2868_v25 = vadd.f32 %v2856_v22, %v2833_v21  ;;  %v7763_v59 = vpop.f32.mrf.mxu0  ;;  %v2857_v32 = vld [vmem:[#allocation5 + $0x48] sm:$0xff] }
 0x22f   : > { %v7752_v60 = vpop.f32.mrf.mxu1  ;;  %3085 = vst.msk [vmem:[#allocation5 + $0x8] sm:$0xff] %vm516_vm4, %v3073_v26  ;;  %v3078_v15 = vadd.f32 %v7763_v59, %v3066_v29  ;;  %v3064_v35 = vld [vmem:[#allocation5 + $0x20] sm:$0xff] }
 0x230   : > { %2880 = vst.msk [vmem:[#allocation5 + $0x40] sm:$0xff] %vm516_vm4, %v2868_v25  ;;  %v2871_v30 = vadd.f32 %v7752_v60, %v2859_v27  ;;  %v3029_v34 = vpop.f32.mrf.mxu0  ;;  %v3323_v40 = vld [vmem:[#allocation5 + $0x10] sm:$0xff] }
 0x231   : > { %v2836_v31 = vpop.f32.mrf.mxu1  ;;  %3090 = vst.msk [vmem:[#allocation5 + $0x30] sm:$0xff] %vm516_vm4, %v3078_v15  ;;  %v3076_v37 = vadd.f32 %v3064_v35, %v3029_v34  ;;  %v3067_v38 = vld [vmem:[#allocation5 + $0x38] sm:$0xff]  ;;  %v9017_v35 = vld [vmem:[%s9662_s4] ss:$0 sm:$0xff] }
 0x232   : > { %2883 = vst.msk [vmem:[#allocation5 + $0x58] sm:$0xff] %vm516_vm4, %v2871_v30  ;;  %v2869_v36 = vadd.f32 %v2857_v32, %v2836_v31  ;;  %v7764_v28 = vpop.f32.mrf.mxu0  ;;  %v3321_v45 = vld [vmem:[#allocation5] sm:$0xff] }
 0x233   : > { %v7775_v39 = vpop.f32.mrf.mxu1  ;;  %3088 = vst.msk [vmem:[#allocation5 + $0x20] sm:$0xff] %vm516_vm4, %v3076_v37  ;;  %v3079_v41 = vadd.f32 %v7764_v28, %v3067_v38  ;;  %v3065_v14 = vld [vmem:[#allocation5 + $0x28] sm:$0xff] }
 0x234   : > { %2881 = vst.msk [vmem:[#allocation5 + $0x48] sm:$0xff] %vm516_vm4, %v2869_v36  ;;  %v3335_v42 = vadd.f32 %v7775_v39, %v3323_v40  ;;  %v3032_v43 = vpop.f32.mrf.mxu0  ;;  %v3324_v51 = vld [vmem:[#allocation5 + $0x18] sm:$0xff]  ;;  %v9022_v39 = vld [vmem:[%s9662_s4 + $0x1] ss:$0 sm:$0xff] }
 0x235   : > { %v3274_v44 = vpop.f32.mrf.mxu1  ;;  %3091 = vst.msk [vmem:[#allocation5 + $0x38] sm:$0xff] %vm516_vm4, %v3079_v41  ;;  %v3077_v46 = vadd.f32 %v3065_v14, %v3032_v43  ;;  %v3070_v49 = vld [vmem:[#allocation5 + $0x50] sm:$0xff] }
 0x236   : > { %3347 = vst.msk [vmem:[#allocation5 + $0x10] sm:$0xff] %vm516_vm4, %v3335_v42  ;;  %v3333_v47 = vadd.f32 %v3321_v45, %v3274_v44  ;;  %v7767_v48 = vpop.f32.mrf.mxu0  ;;  %v3322_v33 = vld [vmem:[#allocation5 + $0x8] sm:$0xff] }
 0x237   : > { %v7776_v50 = vpop.f32.mrf.mxu1  ;;  %3089 = vst.msk [vmem:[#allocation5 + $0x28] sm:$0xff] %vm516_vm4, %v3077_v46  ;;  %v3082_v52 = vadd.f32 %v7767_v48, %v3070_v49  ;;  %v3068_v57 = vld [vmem:[#allocation5 + $0x40] sm:$0xff] }
 0x238   : > { %3345 = vst.msk [vmem:[#allocation5] sm:$0xff] %vm516_vm4, %v3333_v47  ;;  %v3336_v55 = vadd.f32 %v7776_v50, %v3324_v51  ;;  %v3045_v56 = vpop.f32.mrf.mxu0  ;;  %v3327_v1 = vld [vmem:[#allocation5 + $0x30] sm:$0xff] }
 0x239   : > { %v3277_v58 = vpop.f32.mrf.mxu1  ;;  %3094 = vst.msk [vmem:[#allocation5 + $0x50] sm:$0xff] %vm516_vm4, %v3082_v52  ;;  %v3080_v61 = vadd.f32 %v3068_v57, %v3045_v56  ;;  %v3071_v13 = vld [vmem:[#allocation5 + $0x58] sm:$0xff] }
 0x23a   : > { %3348 = vst.msk [vmem:[#allocation5 + $0x18] sm:$0xff] %vm516_vm4, %v3336_v55  ;;  %v3334_v62 = vadd.f32 %v3322_v33, %v3277_v58  ;;  %v7768_v63 = vpop.f32.mrf.mxu0  ;;  %v3325_v6 = vld [vmem:[#allocation5 + $0x20] sm:$0xff] }
 0x23b   : > { %v7779_v0 = vpop.f32.mrf.mxu1  ;;  %3092 = vst.msk [vmem:[#allocation5 + $0x40] sm:$0xff] %vm516_vm4, %v3080_v61  ;;  %v3083_v2 = vadd.f32 %v7768_v63, %v3071_v13  ;;  %v3069_v5 = vld [vmem:[#allocation5 + $0x48] sm:$0xff] }
 0x23c   : > { %3346 = vst.msk [vmem:[#allocation5 + $0x8] sm:$0xff] %vm516_vm4, %v3334_v62  ;;  %v3339_v3 = vadd.f32 %v7779_v0, %v3327_v1  ;;  %v3048_v4 = vpop.f32.mrf.mxu0  ;;  %v3328_v10 = vld [vmem:[#allocation5 + $0x38] sm:$0xff] }
 0x23d   : > { %v3290_v53 = vpop.f32.mrf.mxu1  ;;  %3095 = vst.msk [vmem:[#allocation5 + $0x58] sm:$0xff] %vm516_vm4, %v3083_v2  ;;  %v3081_v7 = vadd.f32 %v3069_v5, %v3048_v4  ;;  %v3517_v16 = vld [vmem:[#allocation5 + $0x10] sm:$0xff] }
 0x23e   : > { %3351 = vst.msk [vmem:[#allocation5 + $0x30] sm:$0xff] %vm516_vm4, %v3339_v3  ;;  %v3337_v8 = vadd.f32 %v3325_v6, %v3290_v53  ;;  %v7791_v11 = vpop.f32.mrf.mxu0  ;;  %v3326_v20 = vld [vmem:[#allocation5 + $0x28] sm:$0xff] }
 0x23f   : > { %v7780_v9 = vpop.f32.mrf.mxu1  ;;  %3093 = vst.msk [vmem:[#allocation5 + $0x48] sm:$0xff] %vm516_vm4, %v3081_v7  ;;  %v3529_v18 = vadd.f32 %v7791_v11, %v3517_v16  ;;  %v3515_v21 = vld [vmem:[#allocation5] sm:$0xff] }
 0x240   : > { %3349 = vst.msk [vmem:[#allocation5 + $0x20] sm:$0xff] %vm516_vm4, %v3337_v8  ;;  %v3340_v17 = vadd.f32 %v7780_v9, %v3328_v10  ;;  %v3468_v54 = vpop.f32.mrf.mxu0  ;;  %v3331_v25 = vld [vmem:[#allocation5 + $0x50] sm:$0xff] }
 0x241   : > { %v3293_v19 = vpop.f32.mrf.mxu1  ;;  %3541 = vst.msk [vmem:[#allocation5 + $0x10] sm:$0xff] %vm516_vm4, %v3529_v18  ;;  %v3527_v23 = vadd.f32 %v3515_v21, %v3468_v54  ;;  %v3518_v60 = vld [vmem:[#allocation5 + $0x18] sm:$0xff] }
 0x242   : > { %3352 = vst.msk [vmem:[#allocation5 + $0x38] sm:$0xff] %vm516_vm4, %v3340_v17  ;;  %v3338_v22 = vadd.f32 %v3326_v20, %v3293_v19  ;;  %v7792_v26 = vpop.f32.mrf.mxu0  ;;  %v3329_v30 = vld [vmem:[#allocation5 + $0x40] sm:$0xff] }
 0x243   : > { %v7783_v24 = vpop.f32.mrf.mxu1  ;;  %3539 = vst.msk [vmem:[#allocation5] sm:$0xff] %vm516_vm4, %v3527_v23  ;;  %v3530_v59 = vadd.f32 %v7792_v26, %v3518_v60  ;;  %v3516_v31 = vld [vmem:[#allocation5 + $0x8] sm:$0xff] }
 0x244   : > { %3350 = vst.msk [vmem:[#allocation5 + $0x28] sm:$0xff] %vm516_vm4, %v3338_v22  ;;  %v3343_v27 = vadd.f32 %v7783_v24, %v3331_v25  ;;  %v3471_v15 = vpop.f32.mrf.mxu0  ;;  %v3332_v37 = vld [vmem:[#allocation5 + $0x58] sm:$0xff] }
 0x245   : > { %v3306_v29 = vpop.f32.mrf.mxu1  ;;  %3542 = vst.msk [vmem:[#allocation5 + $0x18] sm:$0xff] %vm516_vm4, %v3530_v59  ;;  %v3528_v34 = vadd.f32 %v3516_v31, %v3471_v15  ;;  %v3521_v38 = vld [vmem:[#allocation5 + $0x30] sm:$0xff] }
 0x246   : > { %3355 = vst.msk [vmem:[#allocation5 + $0x50] sm:$0xff] %vm516_vm4, %v3343_v27  ;;  %v3341_v32 = vadd.f32 %v3329_v30, %v3306_v29  ;;  %v7795_v28 = vpop.f32.mrf.mxu0  ;;  %v3330_v14 = vld [vmem:[#allocation5 + $0x48] sm:$0xff] }
 0x247   : > { %v7784_v36 = vpop.f32.mrf.mxu1  ;;  %3540 = vst.msk [vmem:[#allocation5 + $0x8] sm:$0xff] %vm516_vm4, %v3528_v34  ;;  %v3533_v41 = vadd.f32 %v7795_v28, %v3521_v38  ;;  %v3519_v45 = vld [vmem:[#allocation5 + $0x20] sm:$0xff] }
 0x248   : > { %3353 = vst.msk [vmem:[#allocation5 + $0x40] sm:$0xff] %vm516_vm4, %v3341_v32  ;;  %v3344_v40 = vadd.f32 %v7784_v36, %v3332_v37  ;;  %v3555_v42 = vld [vmem:[#allocation5 + $0x10] sm:$0xff]  ;;  %v3484_v44 = vpop.f32.mrf.mxu0 }
 0x249   : > { %v3309_v43 = vpop.f32.mrf.mxu1  ;;  %v3571_v46 = vmul.f32 %v9017_v35, %v3555_v42  ;;  %3545 = vst.msk [vmem:[#allocation5 + $0x30] sm:$0xff] %vm516_vm4, %v3533_v41  ;;  %v3531_v48 = vadd.f32 %v3519_v45, %v3484_v44  ;;  %v3522_v51 = vld [vmem:[#allocation5 + $0x38] sm:$0xff] }
 0x24a   : > { %3356 = vst.msk [vmem:[#allocation5 + $0x58] sm:$0xff] %vm516_vm4, %v3344_v40  ;;  %v3342_v47 = vadd.f32 %v3330_v14, %v3309_v43  ;;  %v3553_v49 = vld [vmem:[#allocation5] sm:$0xff]  ;;  %v7796_v50 = vpop.f32.mrf.mxu0 }
 0x24b   : > { %v3587_v52 = vadd.f32 %v9022_v39, %v3571_v46  ;;  %v3569_v55 = vmul.f32 %v9017_v35, %v3553_v49  ;;  %3543 = vst.msk [vmem:[#allocation5 + $0x20] sm:$0xff] %vm516_vm4, %v3531_v48  ;;  %v3534_v56 = vadd.f32 %v7796_v50, %v3522_v51  ;;  %v3520_v33 = vld [vmem:[#allocation5 + $0x28] sm:$0xff]  ;;  %v8292_v48 = vld [vmem:[%s9663_s5 + $0x28] sm:$0xff]  }
 0x24c   : > { %3354 = vst.msk [vmem:[#allocation5 + $0x48] sm:$0xff] %vm516_vm4, %v3342_v47  ;;  %v3556_v57 = vld [vmem:[#allocation5 + $0x18] sm:$0xff]  ;;  %v3487_v58 = vpop.f32.mrf.mxu0 }
 0x24d   : > { %v3599_v61 = vmax.f32 %v3587_v52, 0.0  ;;  %v3585_v62 = vadd.f32 %v9022_v39, %v3569_v55  ;;  %v3572_v63 = vmul.f32 %v9017_v35, %v3556_v57  ;;  %3546 = vst.msk [vmem:[#allocation5 + $0x38] sm:$0xff] %vm516_vm4, %v3534_v56  ;;  %v3532_v13 = vadd.f32 %v3520_v33, %v3487_v58  ;;  %v3525_v53 = vld [vmem:[#allocation5 + $0x50] sm:$0xff] }
 0x24e   : > { %v3554_v0 = vld [vmem:[#allocation5 + $0x8] sm:$0xff]  ;;  %v7799_v1 = vpop.f32.mrf.mxu0 }
 0x24f   : > { %v7350_v2 = vpack.c.bf16 %v3599_v61, %v3599_v61  ;;  %v3597_v3 = vmax.f32 %v3585_v62, 0.0  ;;  %v3588_v4 = vadd.f32 %v9022_v39, %v3572_v63  ;;  %v3570_v5 = vmul.f32 %v9017_v35, %v3554_v0  ;;  %3544 = vst.msk [vmem:[#allocation5 + $0x28] sm:$0xff] %vm516_vm4, %v3532_v13  ;;  %v3523_v17 = vld [vmem:[#allocation5 + $0x40] sm:$0xff] }
 0x250   : > { %v3559_v6 = vld [vmem:[#allocation5 + $0x30] sm:$0xff]  ;;  %v3537_v7 = vadd.f32 %v7799_v1, %v3525_v53  ;;  %v3500_v8 = vpop.f32.mrf.mxu0 }
 0x251   : > { %3659 = vst.msk [vmem:[#allocation3 + $0x8] sm:$0xf] %vm1505_vm5, %v7350_v2  ;;  %v7348_v9 = vpack.c.bf16 %v3597_v3, %v3597_v3  ;;  %v3600_v10 = vmax.f32 %v3588_v4, 0.0  ;;  %v3586_v11 = vadd.f32 %v9022_v39, %v3570_v5  ;;  %v3575_v16 = vmul.f32 %v9017_v35, %v3559_v6  ;;  %v3526_v24 = vld [vmem:[#allocation5 + $0x58] sm:$0xff]  ;;  %v8299_v2 = vld [vmem:[%s9663_s5 + $0x20] sm:$0xff]  }
 0x252   : > { %v3557_v18 = vld [vmem:[#allocation5 + $0x20] sm:$0xff]  ;;  %3549 = vst.msk [vmem:[#allocation5 + $0x50] sm:$0xff] %vm516_vm4, %v3537_v7  ;;  %v3535_v19 = vadd.f32 %v3523_v17, %v3500_v8  ;;  %v7800_v20 = vpop.f32.mrf.mxu0 }
 0x253   : > { %3657 = vst.msk [vmem:[#allocation3] sm:$0xf] %vm1505_vm5, %v7348_v9  ;;  %v7351_v54 = vpack.c.bf16 %v3600_v10, %v3600_v10  ;;  %v3598_v21 = vmax.f32 %v3586_v11, 0.0  ;;  %v3591_v22 = vadd.f32 %v9022_v39, %v3575_v16  ;;  %v3573_v23 = vmul.f32 %v9017_v35, %v3557_v18  ;;  %v3524_v15 = vld [vmem:[#allocation5 + $0x48] sm:$0xff] }
 0x254   : > { %v3560_v25 = vld [vmem:[#allocation5 + $0x38] sm:$0xff]  ;;  %3547 = vst.msk [vmem:[#allocation5 + $0x40] sm:$0xff] %vm516_vm4, %v3535_v19  ;;  %v3538_v26 = vadd.f32 %v7800_v20, %v3526_v24  ;;  %v3503_v60 = vpop.f32.mrf.mxu0  ;;  %v8302_v11 = vld [vmem:[%s9663_s5 + $0x38] sm:$0xff]   ;;  %v8308_v19 = vld [vmem:[%s9663_s5 + $0x30] sm:$0xff]  }
 0x255   : > { %3660 = vst.msk [vmem:[#allocation3 + $0xc] sm:$0xf] %vm1505_vm5, %v7351_v54  ;;  %v7349_v27 = vpack.c.bf16 %v3598_v21, %v3598_v21  ;;  %v3603_v59 = vmax.f32 %v3591_v22, 0.0  ;;  %v3589_v29 = vadd.f32 %v9022_v39, %v3573_v23  ;;  %v3576_v30 = vmul.f32 %v9017_v35, %v3560_v25 }
 0x256   : > { %v3558_v31 = vld [vmem:[#allocation5 + $0x28] sm:$0xff]  ;;  %3550 = vst.msk [vmem:[#allocation5 + $0x58] sm:$0xff] %vm516_vm4, %v3538_v26  ;;  %v3536_v32 = vadd.f32 %v3524_v15, %v3503_v60 }
 0x257   : > { %3658 = vst.msk [vmem:[#allocation3 + $0x4] sm:$0xf] %vm1505_vm5, %v7349_v27  ;;  %v7354_v34 = vpack.c.bf16 %v3603_v59, %v3603_v59  ;;  %v3601_v36 = vmax.f32 %v3589_v29, 0.0  ;;  %v3592_v37 = vadd.f32 %v9022_v39, %v3576_v30  ;;  %v3574_v28 = vmul.f32 %v9017_v35, %v3558_v31 }
 0x258   : > { %3548 = vst.msk [vmem:[#allocation5 + $0x48] sm:$0xff] %vm516_vm4, %v3536_v32 }
 0x259   : > { %3663 = vst.msk [vmem:[#allocation3 + $0x18] sm:$0xf] %vm1505_vm5, %v7354_v34  ;;  %v7352_v38 = vpack.c.bf16 %v3601_v36, %v3601_v36  ;;  %v3604_v40 = vmax.f32 %v3592_v37, 0.0  ;;  %v3590_v41 = vadd.f32 %v9022_v39, %v3574_v28  ;;  %v3563_v42 = vld [vmem:[#allocation5 + $0x50] sm:$0xff] }
 0x25a   : > { %v3579_v43 = vmul.f32 %v9017_v35, %v3563_v42 }
 0x25b   : > { %3661 = vst.msk [vmem:[#allocation3 + $0x10] sm:$0xf] %vm1505_vm5, %v7352_v38  ;;  %v7355_v14 = vpack.c.bf16 %v3604_v40, %v3604_v40  ;;  %v3602_v44 = vmax.f32 %v3590_v41, 0.0  ;;  %v3561_v45 = vld [vmem:[#allocation5 + $0x40] sm:$0xff] }
 0x25c   : > { %v3595_v46 = vadd.f32 %v9022_v39, %v3579_v43  ;;  %v3577_v47 = vmul.f32 %v9017_v35, %v3561_v45  ;;  %v8295_v51 = vld [vmem:[#allocation3 + $0x8] sm:$0xff]  }
 0x25d   : > { %3664 = vst.msk [vmem:[#allocation3 + $0x1c] sm:$0xf] %vm1505_vm5, %v7355_v14  ;;  %v7353_v49 = vpack.c.bf16 %v3602_v44, %v3602_v44  ;;  %v3564_v50 = vld [vmem:[#allocation5 + $0x58] sm:$0xff]  ;;  %v3861_v1 = vshll.u32 %v8295_v51, 16  ;;  %v3865_v20 = vshrl.u32 %v8295_v51, 16 }
 0x25e   : > { %v3607_v52 = vmax.f32 %v3595_v46, 0.0  ;;  %v3593_v55 = vadd.f32 %v9022_v39, %v3577_v47  ;;  %v3580_v56 = vmul.f32 %v9017_v35, %v3564_v50  ;;  %v8290_v57 = vld [vmem:[#allocation3] sm:$0xff]   ;;  %v8296_v10 = vld [vmem:[#allocation3 + $0x8] sm:$0xff]  }
 0x25f   : > { %3662 = vst.msk [vmem:[#allocation3 + $0x14] sm:$0xf] %vm1505_vm5, %v7353_v49  ;;  %v3562_v58 = vld [vmem:[#allocation5 + $0x48] sm:$0xff]  ;;  %7806 = vmatmul.mubr.msk.bf16.vlgmr.msra.gmra.mxu1 %vm516_vm4, %v8290_v57  ;;  %v3863_v9 = vrot.slane %v3861_v1, 1  ;;  %v8306_v40 = vld [vmem:[#allocation3 + $0x8] sm:$0xff]  }
 0x260   : > { %v8294_v33 = vld [vmem:[#allocation3] sm:$0xff]   ;;  %v7358_v61 = vpack.c.bf16 %v3607_v52, %v3607_v52  ;;  %v3605_v62 = vmax.f32 %v3593_v55, 0.0  ;;  %v3596_v63 = vadd.f32 %v9022_v39, %v3580_v56  ;;  %v3578_v13 = vmul.f32 %v9017_v35, %v3562_v58  ;;  %7850 = vmatpush3.bf16.msra.mxu1 %v8292_v48  ;;  %7809 = vmatprep.mubr.msk.bf16.mxu1 %vm8412_vm10, %v8411_v12  ;;  %v8307_v46 = vld [vmem:[%s9663_s5 + $0x48] sm:$0xff]  }
 0x261   : > { %v3856_v0 = vshll.u32 %v8294_v33, 16  ;;  %7851 = vmatprep.subr.bf16.mxu1 %v8411_v12  ;;  %v3854_v35 = vshrl.u32 %v8294_v33, 16  ;;  %v3867_v22 = vor.u32 %v3865_v20, %v3863_v9  ;;  %v8305_v28 = vld [vmem:[#allocation3] sm:$0xfe]   ;;  %v4059_v45 = vrot.slane %v8306_v40, 1 }
 0x262   : > { %3667 = vst.msk [vmem:[#allocation3 + $0x28] sm:$0xf] %vm1505_vm5, %v7358_v61  ;;  %v7356_v3 = vpack.c.bf16 %v3605_v62, %v3605_v62  ;;  %v3608_v4 = vmax.f32 %v3596_v63, 0.0  ;;  %v3594_v5 = vadd.f32 %v9022_v39, %v3578_v13  ;;  %v8310_v38 = vld [vmem:[#allocation3 + $0xc] sm:$0xff]   ;;  %v8309_v41 = vld [vmem:[#allocation3 + $0x4] sm:$0xfe]  }
 0x263   : > { %v3858_v53 = vrot.slane %v3856_v0, 1  ;;  %v4058_v42 = vrot.slane %v8305_v28, 1  ;;  %v4242_v43 = vshrl.u32 %v8310_v38, 16  ;;  %v4245_v14 = vshll.u32 %v8310_v38, 16  ;;  %v8314_v57 = vld [vmem:[%s9663_s5 + $0x40] sm:$0xff]   ;;  %v8317_v1 = vld [vmem:[%s9663_s5 + $0x58] sm:$0xff]  }
 0x264   : > { %3665 = vst.msk [vmem:[#allocation3 + $0x20] sm:$0xf] %vm1505_vm5, %v7356_v3  ;;  %v7359_v6 = vpack.c.bf16 %v3608_v4, %v3608_v4  ;;  %v3606_v7 = vmax.f32 %v3594_v5, 0.0  ;;  %7852 = vmatpush3.bf16.msra.mxu1 %v8299_v2  ;;  %v8300_v21 = vld [vmem:[#allocation3 + $0x18] sm:$0xff]   ;;  %v4234_v47 = vshrl.u32 %v8309_v41, 16  ;;  %v4237_v48 = vshll.u32 %v8309_v41, 16 }
 0x265   : > { %v3859_v8 = vor.u32 %v3858_v53, %v3854_v35  ;;  %7897 = vmatprep.subr.bf16.mxu1 %v8411_v12  ;;  %v3877_v25 = vshll.u32 %v8300_v21, 16  ;;  %v8301_v29 = vld [vmem:[#allocation3 + $0x18] sm:$0xff]   ;;  %v3881_v31 = vshrl.u32 %v8300_v21, 16  ;;  %v4060_v50 = vsel %vm1991_vm6, %v4058_v42, %v4059_v45 }
 0x266   : > { %3668 = vst.msk [vmem:[#allocation3 + $0x2c] sm:$0xf] %vm1505_vm5, %v7359_v6  ;;  %v7357_v16 = vpack.c.bf16 %v3606_v7, %v3606_v7  ;;  %v8297_v39 = vld [vmem:[#allocation3 + $0x10] sm:$0xff]   ;;  %v4244_v51 = vrot.slane %v4242_v43, 1  ;;  %v4247_v52 = vrot.slane %v4245_v14, 2  ;;  %v4236_v58 = vrot.slane %v4234_v47, 1 }
 0x267   : > { %v3864_v17 = vsel %vm591_vm1, %v3859_v8, %v3863_v9  ;;  %7810 = vmatmul.mubr.msk.bf16.gmra.mxu1 %vm516_vm4, %v8296_v10  ;;  %v3869_v18 = vshll.u32 %v8297_v39, 16  ;;  %v8298_v23 = vld [vmem:[#allocation3 + $0x10] sm:$0xff]   ;;  %v3873_v26 = vshrl.u32 %v8297_v39, 16  ;;  %v3879_v59 = vrot.slane %v3877_v25, 1  ;;  %v8313_v53 = vld [vmem:[#allocation3 + $0x18] sm:$0xff]  }
 0x268   : > { %3666 = vst.msk [vmem:[#allocation3 + $0x24] sm:$0xf] %vm1505_vm5, %v7357_v16  ;;  %7830 = vmatmul.mubr.msk.bf16.vlgmr.msra.gmra.mxu0 %vm516_vm4, %v3864_v17  ;;  %7813 = vmatprep.mubr.msk.bf16.mxu1 %vm8412_vm10, %v8411_v12  ;;  %v8311_v55 = vld [vmem:[#allocation3 + $0x10] sm:$0xff]   ;;  %v4239_v33 = vrot.slane %v4237_v48, 2  ;;  %v4248_v61 = vor.u32 %v4247_v52, %v4244_v51  ;;  %v4063_v10 = vrot.slane %v8313_v53, 1  ;;  %v8331_v52 = vld [vmem:[%s9663_s5 + $0x78] sm:$0xff]  }
 0x269   : > { %7833 = vmatprep.mubr.msk.bf16.mxu0 %vm8412_vm10, %v8411_v12  ;;  %7874 = vmatpush3.bf16.msra.mxu0 %v8302_v11  ;;  %v3871_v54 = vrot.slane %v3869_v18, 1  ;;  %v3883_v34 = vor.u32 %v3881_v31, %v3879_v59  ;;  %v8312_v56 = vld [vmem:[#allocation3 + $0x14] sm:$0xff]   ;;  %v4061_v62 = vrot.slane %v8311_v55, 1 }
 0x26a   : > { %7875 = vmatprep.subr.bf16.mxu0 %v8411_v12  ;;  %v4251_v63 = vshrl.u32 %v8312_v56, 16  ;;  %v4254_v13 = vshll.u32 %v8312_v56, 16  ;;  %v4240_v0 = vor.u32 %v4239_v33, %v4236_v58  ;;  %v8322_v6 = vld [vmem:[%s9663_s5 + $0x50] sm:$0xff]  }
 0x26b   : > { %v3872_v24 = vsel %vm591_vm1, %v3867_v22, %v3871_v54  ;;  %v3875_v60 = vor.u32 %v3873_v26, %v3871_v54  ;;  %v8304_v36 = vld [vmem:[#allocation3 + $0x20] ss:$0 sps:$4 sm:$0xff]   ;;  %v4062_v3 = vsel %vm1991_vm6, %v4059_v45, %v4061_v62  ;;  %v4064_v16 = vsel %vm1991_vm6, %v4061_v62, %v4063_v10  ;;  %v8325_v43 = vld [vmem:[#allocation3 + $0x14] sm:$0xff]  }
 0x26c   : > { %v4249_v2 = vsel %vm885_vm2, %v4240_v0, %v4248_v61  ;;  %v4253_v4 = vrot.slane %v4251_v63, 1  ;;  %v4256_v5 = vrot.slane %v4254_v13, 2  ;;  %v8315_v35 = vld [vmem:[#allocation3 + $0x1c] sm:$0xff]   ;;  %v8326_v14 = vld [vmem:[#allocation3 + $0x14] sm:$0xff]   ;;  %v4446_v48 = vrot.slane %v8325_v43, 2 }
 0x26d   : > { %7876 = vmatpush3.bf16.msra.mxu0 %v8308_v19  ;;  %v3880_v30 = vsel %vm591_vm1, %v3875_v60, %v3879_v59  ;;  %v4260_v8 = vshrl.u32 %v8315_v35, 16  ;;  %v4263_v9 = vshll.u32 %v8315_v35, 16  ;;  %v8320_v59 = vld [vmem:[#allocation3 + $0xc] sm:$0xff]   ;;  %v8327_v33 = vld [vmem:[#allocation3 + $0x1c] sm:$0xff]   ;;  %v8336_v62 = vld [vmem:[%s9663_s5 + $0x70] sm:$0xff]  }
 0x26e   : > { %7921 = vmatprep.subr.bf16.mxu0 %v8411_v12  ;;  %v4257_v7 = vor.u32 %v4256_v5, %v4253_v4  ;;  %v4444_v31 = vrot.slane %v8320_v59, 2  ;;  %v4448_v13 = vrot.slane %v8327_v33, 2 }
 0x26f   : > { %7814 = vmatmul.mubr.msk.bf16.gmra.mxu1 %vm516_vm4, %v8298_v23  ;;  %v8303_v27 = vld [vmem:[#allocation3 + $0x20] sm:$0x1f]   ;;  %v4262_v39 = vrot.slane %v4260_v8, 1  ;;  %v4265_v17 = vrot.slane %v4263_v9, 2 }
 0x270   : > { %7834 = vmatmul.mubr.msk.bf16.gmra.mxu0 %vm516_vm4, %v3872_v24  ;;  %7817 = vmatprep.mubr.msk.bf16.mxu1 %vm8412_vm10, %v8411_v12  ;;  %v3885_v15 = vshll.u32 %v8303_v27, 16  ;;  %v3889_v44 = vshrl.u32 %v8303_v27, 16  ;;  %v4258_v11 = vsel %vm885_vm2, %v4248_v61, %v4257_v7  ;;  %v8316_v18 = vld [vmem:[#allocation3 + $0x20] sm:$0x1f]   ;;  %v4447_v56 = vsel %vm1187_vm3, %v4444_v31, %v4446_v48 }
 0x271   : > { %7837 = vmatprep.mubr.msk.bf16.mxu0 %vm8412_vm10, %v8411_v12  ;;  %v8318_v19 = vld [vmem:[#allocation3 + $0x24] sm:$0x3f]   ;;  %v4266_v20 = vor.u32 %v4265_v17, %v4262_v39  ;;  %v4065_v54 = vrot.slane %v8316_v18, 1  ;;  %v8329_v61 = vld [vmem:[#allocation3 + $0x1c] sm:$0xff]  }
 0x272   : > { %v3887_v32 = vrot.slane %v3885_v15, 1  ;;  %v4269_v21 = vshrl.u32 %v8318_v19, 16  ;;  %v4272_v22 = vshll.u32 %v8318_v19, 16  ;;  %v8323_v15 = vld [vmem:[#allocation3 + $0x4] sm:$0xfc]   ;;  %v4645_v0 = vshrl.u32 %v8329_v61, 16 }
 0x273   : > { %v4267_v23 = vsel %vm885_vm2, %v4257_v7, %v4266_v20  ;;  %v4066_v24 = vsel %vm1991_vm6, %v4063_v10, %v4065_v54  ;;  %v4619_v28 = vshrl.u32 %v8323_v15, 16  ;;  %v4622_v38 = vshll.u32 %v8323_v15, 16  ;;  %v8330_v35 = vld [vmem:[#allocation3 + $0x24] sm:$0x3f]   ;;  %v8334_v19 = vld [vmem:[#allocation3 + $0x10] sm:$0xff]  }
 0x274   : > { %v3888_v37 = vsel %vm591_vm1, %v3883_v34, %v3887_v32  ;;  %v3891_v49 = vor.u32 %v3889_v44, %v3887_v32  ;;  %v4271_v25 = vrot.slane %v4269_v21, 1  ;;  %v4274_v26 = vrot.slane %v4272_v22, 2  ;;  %v8332_v53 = vld [vmem:[#allocation3 + $0x24] sm:$0x7f]   ;;  %v8337_v21 = vld [vmem:[#allocation3 + $0x8] sm:$0xf8]  }
 0x275   : > { %v4621_v44 = vrot.slane %v4619_v28, 2  ;;  %v4624_v45 = vrot.slane %v4622_v38, 3  ;;  %v4647_v4 = vrot.slane %v4645_v0, 2  ;;  %v4450_v7 = vrot.slane %v8330_v35, 2  ;;  %v8347_v35 = vld [vmem:[#allocation3 + $0x14] sm:$0xff]  }
 0x276   : > { %v4275_v60 = vor.u32 %v4274_v26, %v4271_v25  ;;  %v4654_v8 = vshrl.u32 %v8332_v53, 16  ;;  %v4657_v9 = vshll.u32 %v8332_v53, 16  ;;  %v4829_v22 = vrot.slane %v8334_v19, 3  ;;  %v8335_v26 = vld [vmem:[%s9663_s5 + $0x88] sm:$0xff]   ;;  %v8348_v53 = vld [vmem:[#allocation3 + $0x1c] sm:$0xff]  }
 0x277   : > { %7818 = vmatmul.mubr.msk.bf16.gmra.mxu1 %vm516_vm4, %v8301_v29  ;;  %v8324_v29 = vld [vmem:[#allocation3 + $0xc] sm:$0xff]   ;;  %v4625_v51 = vor.u32 %v4624_v45, %v4621_v44  ;;  %v8343_v44 = vld [vmem:[#allocation3 + $0x20] sm:$0xff]  }
 0x278   : > { %7838 = vmatmul.mubr.msk.bf16.gmra.mxu0 %vm516_vm4, %v3880_v30  ;;  %7821 = vmatprep.mubr.msk.bf16.mxu1 %vm8412_vm10, %v8411_v12  ;;  %v4276_v27 = vsel %vm885_vm2, %v4266_v20, %v4275_v60  ;;  %v8319_v30 = vld [vmem:[#allocation3 + $0x4] sm:$0xfc]   ;;  %v4627_v32 = vshrl.u32 %v8324_v29, 16  ;;  %v4630_v34 = vshll.u32 %v8324_v29, 16  ;;  %v4659_v39 = vrot.slane %v4657_v9, 3  ;;  %v8338_v20 = vld [vmem:[#allocation3 + $0x10] sm:$0xff]  }
 0x279   : > { %7841 = vmatprep.mubr.msk.bf16.mxu0 %vm8412_vm10, %v8411_v12 }
 0x27a   : > { %v4629_v41 = vrot.slane %v4627_v32, 2  ;;  %v4632_v42 = vrot.slane %v4630_v34, 3  ;;  %v8339_v32 = vld [vmem:[#allocation3 + $0x18] sm:$0xff]  }
 0x27b   : > { %v8340_v34 = vld [vmem:[#allocation3 + $0x18] sm:$0xff]   ;;  %v4831_v38 = vrot.slane %v8339_v32, 3 }
 0x27c   : > { %v4633_v47 = vor.u32 %v4632_v42, %v4629_v41  ;;  %v5024_v41 = vshll.u32 %v8340_v34, 16 }
 0x27d   : > { %v4832_v43 = vsel %vm2935_vm8, %v4829_v22, %v4831_v38 }
 0x27e   : > { %v4634_v55 = vsel %vm2674_vm7, %v4625_v51, %v4633_v47 }
 0x27f   : > { %7822 = vmatmul.mubr.msk.bf16.gmra.mxu1 %vm516_vm4, %v8304_v36  ;;  %v4443_v36 = vrot.slane %v8319_v30, 2 }
 0x280   : > { %7842 = vmatmul.mubr.msk.bf16.gmra.mxu0 %vm516_vm4, %v3888_v37  ;;  %7853 = vmatprep.mubr.msk.bf16.mxu1 %vm8412_vm10, %v8411_v12  ;;  %v8321_v37 = vld [vmem:[%s9663_s5 + $0x68] sm:$0xff]  }
 0x281   : > { %7845 = vmatprep.mubr.msk.bf16.mxu0 %vm8412_vm10, %v8411_v12  ;;  %v4445_v40 = vsel %vm1187_vm3, %v4443_v36, %v4444_v31  ;;  %v8342_v36 = vld [vmem:[%s9663_s5 + $0x80] sm:$0xff]  }
 0x287   : > { %7854 = vmatmul.mubr.msk.bf16.vlgmr.msra.gmra.mxu1 %vm516_vm4, %v4060_v50  ;;  %v4639_v50 = vshll.u32 %v8326_v14, 16 }
 0x288   : > { %7846 = vmatmul.mubr.msk.bf16.gmra.mxu0 %vm516_vm4, %v3891_v49  ;;  %7898 = vmatpush3.bf16.msra.mxu1 %v8307_v46  ;;  %v8328_v46 = vld [vmem:[%s9663_s5 + $0x60] sm:$0xff]   ;;  %v4636_v49 = vshrl.u32 %v8326_v14, 16 }
 0x289   : > { %7877 = vmatprep.mubr.msk.bf16.mxu0 %vm8412_vm10, %v8411_v12  ;;  %7857 = vmatprep.mubr.msk.bf16.mxu1 %vm8412_vm10, %v8411_v12  ;;  %v4641_v58 = vrot.slane %v4639_v50, 3  ;;  %v8341_v14 = vld [vmem:[#allocation3 + $0x20] sm:$0xff]  }
 0x28a   : > { %7899 = vmatprep.subr.bf16.mxu1 %v8411_v12 }
 0x28c   : > { %7900 = vmatpush3.bf16.msra.mxu1 %v8314_v57  ;;  %v4638_v57 = vrot.slane %v4636_v49, 2  ;;  %v5033_v49 = vshll.u32 %v8343_v44, 16 }
 0x28d   : > { %7945 = vmatprep.subr.bf16.mxu1 %v8411_v12 }
 0x28e   : > { %v4642_v63 = vor.u32 %v4641_v58, %v4638_v57  ;;  %v8344_v57 = vld [vmem:[#allocation3 + $0x28] sm:$0x7f]  }
 0x28f   : > { %7858 = vmatmul.mubr.msk.bf16.gmra.mxu1 %vm516_vm4, %v4062_v3  ;;  %v4449_v3 = vsel %vm1187_vm3, %v4446_v48, %v4448_v13  ;;  %v5030_v48 = vshrl.u32 %v8343_v44, 16  ;;  %v8345_v58 = vld [vmem:[#allocation3 + $0x28] sm:$0xff]  }
 0x290   : > { %7878 = vmatmul.mubr.msk.bf16.vlgmr.msra.gmra.mxu0 %vm516_vm4, %v4249_v2  ;;  %7861 = vmatprep.mubr.msk.bf16.mxu1 %vm8412_vm10, %v8411_v12  ;;  %v4643_v2 = vsel %vm2674_vm7, %v4633_v47, %v4642_v63  ;;  %v4833_v47 = vrot.slane %v8341_v14, 3 }
 0x291   : > { %7881 = vmatprep.mubr.msk.bf16.mxu0 %vm8412_vm10, %v8411_v12  ;;  %7922 = vmatpush3.bf16.msra.mxu0 %v8317_v1  ;;  %v4648_v1 = vshll.u32 %v8329_v61, 16  ;;  %v4835_v61 = vrot.slane %v8344_v57, 3 }
 0x292   : > { %7923 = vmatprep.subr.bf16.mxu0 %v8411_v12 }
 0x293   : > { %v4650_v5 = vrot.slane %v4648_v1, 3  ;;  %v4836_v0 = vsel %vm2935_vm8, %v4833_v47, %v4835_v61 }
 0x295   : > { %7924 = vmatpush3.bf16.msra.mxu0 %v8322_v6  ;;  %v4651_v6 = vor.u32 %v4650_v5, %v4647_v4  ;;  %v8346_v5 = vld [vmem:[#allocation3 + $0xc] sm:$0xff]  }
 0x296   : > { %7969 = vmatprep.subr.bf16.mxu0 %v8411_v12 }
 0x297   : > { %7862 = vmatmul.mubr.msk.bf16.gmra.mxu1 %vm516_vm4, %v4064_v16  ;;  %v4652_v10 = vsel %vm2674_vm7, %v4642_v63, %v4651_v6  ;;  %v4656_v16 = vrot.slane %v4654_v8, 2  ;;  %v5042_v63 = vshll.u32 %v8345_v58, 16 }
 0x298   : > { %7882 = vmatmul.mubr.msk.bf16.gmra.mxu0 %vm516_vm4, %v4258_v11  ;;  %7865 = vmatprep.mubr.msk.bf16.mxu1 %vm8412_vm10, %v8411_v12  ;;  %v4451_v11 = vsel %vm1187_vm3, %v4448_v13, %v4450_v7 }
 0x299   : > { %7885 = vmatprep.mubr.msk.bf16.mxu0 %vm8412_vm10, %v8411_v12  ;;  %v4660_v17 = vor.u32 %v4659_v39, %v4656_v16 }
 0x29b   : > { %v4661_v18 = vsel %vm2674_vm7, %v4651_v6, %v4660_v17  ;;  %v8349_v6 = vld [vmem:[#allocation3 + $0x24] sm:$0xff]  }
 0x29f   : > { %7866 = vmatmul.mubr.msk.bf16.gmra.mxu1 %vm516_vm4, %v4066_v24  ;;  %v5015_v24 = vshll.u32 %v8338_v20, 16 }
 0x2a0   : > { %7886 = vmatmul.mubr.msk.bf16.gmra.mxu0 %vm516_vm4, %v4267_v23  ;;  %7869 = vmatprep.mubr.msk.bf16.mxu1 %vm8412_vm10, %v8411_v12  ;;  %v5012_v23 = vshrl.u32 %v8338_v20, 16 }
 0x2a1   : > { %7889 = vmatprep.mubr.msk.bf16.mxu0 %vm8412_vm10, %v8411_v12  ;;  %v5017_v30 = vrot.slane %v5015_v24, 4 }
 0x2a2   : > { %v5014_v29 = vrot.slane %v5012_v23, 3 }
 0x2a7   : > { %7870 = vmatmul.mubr.msk.bf16.gmra.mxu1 %vm516_vm4, %v4065_v54  ;;  %v8333_v54 = vld [vmem:[#allocation3 + $0x8] sm:$0xf8]  }
 0x2a8   : > { %7890 = vmatmul.mubr.msk.bf16.gmra.mxu0 %vm516_vm4, %v4276_v27  ;;  %7901 = vmatprep.mubr.msk.bf16.mxu1 %vm8412_vm10, %v8411_v12  ;;  %v4828_v25 = vrot.slane %v8333_v54, 3  ;;  %v5007_v27 = vshll.u32 %v8337_v21, 16 }
 0x2a9   : > { %7893 = vmatprep.mubr.msk.bf16.mxu0 %vm8412_vm10, %v8411_v12 }
 0x2aa   : > { %v4830_v59 = vsel %vm2935_vm8, %v4828_v25, %v4829_v22  ;;  %v5009_v31 = vrot.slane %v5007_v27, 4 }
 0x2af   : > { %7902 = vmatmul.mubr.msk.bf16.vlgmr.msra.gmra.mxu1 %vm516_vm4, %v4445_v40  ;;  %v5021_v40 = vshrl.u32 %v8340_v34, 16 }
 0x2b0   : > { %7894 = vmatmul.mubr.msk.bf16.gmra.mxu0 %vm516_vm4, %v4275_v60  ;;  %7946 = vmatpush3.bf16.msra.mxu1 %v8321_v37  ;;  %v5004_v60 = vshrl.u32 %v8337_v21, 16  ;;  %v5018_v37 = vor.u32 %v5017_v30, %v5014_v29 }
 0x2b1   : > { %7925 = vmatprep.mubr.msk.bf16.mxu0 %vm8412_vm10, %v8411_v12  ;;  %7905 = vmatprep.mubr.msk.bf16.mxu1 %vm8412_vm10, %v8411_v12  ;;  %v5023_v45 = vrot.slane %v5021_v40, 3 }
 0x2b2   : > { %7947 = vmatprep.subr.bf16.mxu1 %v8411_v12  ;;  %v5006_v15 = vrot.slane %v5004_v60, 3 }
 0x2b4   : > { %7948 = vmatpush3.bf16.msra.mxu1 %v8328_v46  ;;  %v5010_v28 = vor.u32 %v5009_v31, %v5006_v15  ;;  %v5026_v46 = vrot.slane %v5024_v41, 4 }
 0x2b5   : > { %7993 = vmatprep.subr.bf16.mxu1 %v8411_v12 }
 0x2b6   : > { %v5019_v42 = vsel %vm3147_vm9, %v5010_v28, %v5018_v37  ;;  %v5027_v50 = vor.u32 %v5026_v46, %v5023_v45 }
 0x2b7   : > { %7906 = vmatmul.mubr.msk.bf16.gmra.mxu1 %vm516_vm4, %v4447_v56  ;;  %v5035_v56 = vrot.slane %v5033_v49, 4 }
 0x2b8   : > { %7926 = vmatmul.mubr.msk.bf16.vlgmr.msra.gmra.mxu0 %vm516_vm4, %v4634_v55  ;;  %7909 = vmatprep.mubr.msk.bf16.mxu1 %vm8412_vm10, %v8411_v12  ;;  %v5028_v51 = vsel %vm3147_vm9, %v5018_v37, %v5027_v50  ;;  %v5032_v55 = vrot.slane %v5030_v48, 3 }
 0x2b9   : > { %7929 = vmatprep.mubr.msk.bf16.mxu0 %vm8412_vm10, %v8411_v12  ;;  %7970 = vmatpush3.bf16.msra.mxu0 %v8331_v52  ;;  %v4834_v52 = vsel %vm2935_vm8, %v4831_v38, %v4833_v47  ;;  %v8351_v47 = vld [vmem:[%s9665_s7 + $0x8] sm:$0xff]  }
 0x2ba   : > { %7971 = vmatprep.subr.bf16.mxu0 %v8411_v12  ;;  %v5036_v33 = vor.u32 %v5035_v56, %v5032_v55 }
 0x2bc   : > { %v5037_v13 = vsel %vm3147_vm9, %v5027_v50, %v5036_v33 }
 0x2bd   : > { %7972 = vmatpush3.bf16.msra.mxu0 %v8336_v62  ;;  %v5039_v62 = vshrl.u32 %v8345_v58, 16 }
 0x2be   : > { %8017 = vmatprep.subr.bf16.mxu0 %v8411_v12 }
 0x2bf   : > { %7910 = vmatmul.mubr.msk.bf16.gmra.mxu1 %vm516_vm4, %v4449_v3  ;;  %v5041_v1 = vrot.slane %v5039_v62, 3 }
 0x2c0   : > { %7930 = vmatmul.mubr.msk.bf16.gmra.mxu0 %vm516_vm4, %v4643_v2  ;;  %7913 = vmatprep.mubr.msk.bf16.mxu1 %vm8412_vm10, %v8411_v12  ;;  %v5044_v2 = vrot.slane %v5042_v63, 4 }
 0x2c1   : > { %7933 = vmatprep.mubr.msk.bf16.mxu0 %vm8412_vm10, %v8411_v12 }
 0x2c2   : > { %v5045_v3 = vor.u32 %v5044_v2, %v5041_v1 }
 0x2c4   : > { %v5046_v4 = vsel %vm3147_vm9, %v5036_v33, %v5045_v3 }
 0x2c7   : > { %7914 = vmatmul.mubr.msk.bf16.gmra.mxu1 %vm516_vm4, %v4451_v11 }
 0x2c8   : > { %7934 = vmatmul.mubr.msk.bf16.gmra.mxu0 %vm516_vm4, %v4652_v10  ;;  %7917 = vmatprep.mubr.msk.bf16.mxu1 %vm8412_vm10, %v8411_v12 }
 0x2c9   : > { %7937 = vmatprep.mubr.msk.bf16.mxu0 %vm8412_vm10, %v8411_v12 }
 0x2cf   : > { %7918 = vmatmul.mubr.msk.bf16.gmra.mxu1 %vm516_vm4, %v4450_v7  ;;  %v8350_v7 = vld [vmem:[#allocation3 + $0x2c] ss:$0 sps:$4 sm:$0xff]  }
 0x2d0   : > { %7938 = vmatmul.mubr.msk.bf16.gmra.mxu0 %vm516_vm4, %v4661_v18  ;;  %7949 = vmatprep.mubr.msk.bf16.mxu1 %vm8412_vm10, %v8411_v12 }
 0x2d1   : > { %7941 = vmatprep.mubr.msk.bf16.mxu0 %vm8412_vm10, %v8411_v12 }
 0x2d7   : > { %7950 = vmatmul.mubr.msk.bf16.vlgmr.msra.gmra.mxu1 %vm516_vm4, %v4830_v59 }
 0x2d8   : > { %7942 = vmatmul.mubr.msk.bf16.gmra.mxu0 %vm516_vm4, %v4660_v17  ;;  %7994 = vmatpush3.bf16.msra.mxu1 %v8335_v26 }
 0x2d9   : > { %7973 = vmatprep.mubr.msk.bf16.mxu0 %vm8412_vm10, %v8411_v12  ;;  %7953 = vmatprep.mubr.msk.bf16.mxu1 %vm8412_vm10, %v8411_v12 }
 0x2da   : > { %7995 = vmatprep.subr.bf16.mxu1 %v8411_v12 }
 0x2dc   : > { %7996 = vmatpush3.bf16.msra.mxu1 %v8342_v36 }
 0x2dd   : > { %8033 = vmatprep.subr.bf16.mxu1 %v8411_v12 }
 0x2df   : > { %7954 = vmatmul.mubr.msk.bf16.gmra.mxu1 %vm516_vm4, %v4832_v43 }
 0x2e0   : > { %7974 = vmatmul.mubr.msk.bf16.vlgmr.msra.gmra.mxu0 %vm516_vm4, %v5019_v42  ;;  %7957 = vmatprep.mubr.msk.bf16.mxu1 %vm8412_vm10, %v8411_v12 }
 0x2e1   : > { %7977 = vmatprep.mubr.msk.bf16.mxu0 %vm8412_vm10, %v8411_v12  ;;  %8018 = vmatpush3.bf16.msra.mxu0 %v8351_v47 }
 0x2e2   : > { %8019 = vmatprep.subr.bf16.mxu0 %v8411_v12 }
 0x2e7   : > { %7958 = vmatmul.mubr.msk.bf16.gmra.mxu1 %vm516_vm4, %v4834_v52 }
 0x2e8   : > { %7978 = vmatmul.mubr.msk.bf16.gmra.mxu0 %vm516_vm4, %v5028_v51  ;;  %7961 = vmatprep.mubr.msk.bf16.mxu1 %vm8412_vm10, %v8411_v12 }
 0x2e9   : > { %7981 = vmatprep.mubr.msk.bf16.mxu0 %vm8412_vm10, %v8411_v12 }
 0x2ef   : > { %7962 = vmatmul.mubr.msk.bf16.gmra.mxu1 %vm516_vm4, %v4836_v0 }
 0x2f0   : > { %7982 = vmatmul.mubr.msk.bf16.gmra.mxu0 %vm516_vm4, %v5037_v13  ;;  %7965 = vmatprep.mubr.msk.bf16.mxu1 %vm8412_vm10, %v8411_v12 }
 0x2f1   : > { %7985 = vmatprep.mubr.msk.bf16.mxu0 %vm8412_vm10, %v8411_v12 }
 0x2f7   : > { %7966 = vmatmul.mubr.msk.bf16.gmra.mxu1 %vm516_vm4, %v4835_v61 }
 0x2f8   : > { %7986 = vmatmul.mubr.msk.bf16.gmra.mxu0 %vm516_vm4, %v5046_v4  ;;  %7997 = vmatprep.mubr.msk.bf16.mxu1 %vm8412_vm10, %v8411_v12 }
 0x2f9   : > { %7989 = vmatprep.mubr.msk.bf16.mxu0 %vm8412_vm10, %v8411_v12 }
 0x2ff   : > { %7998 = vmatmul.mubr.msk.bf16.vlgmr.msra.gmra.mxu1 %vm516_vm4, %v8346_v5 }
 0x300   : > { %7990 = vmatmul.mubr.msk.bf16.gmra.mxu0 %vm516_vm4, %v5045_v3  ;;  %8001 = vmatprep.mubr.msk.bf16.mxu1 %vm8412_vm10, %v8411_v12 }
 0x301   : > { %8021 = vmatprep.mubr.msk.bf16.mxu0 %vm8412_vm10, %v8411_v12 }
 0x307   : > { %8002 = vmatmul.mubr.msk.bf16.gmra.mxu1 %vm516_vm4, %v8347_v35 }
 0x308   : > { %8005 = vmatprep.mubr.msk.bf16.mxu1 %vm8412_vm10, %v8411_v12 }
 0x30f   : > { %8006 = vmatmul.mubr.msk.bf16.gmra.mxu1 %vm516_vm4, %v8348_v53 }
 0x310   : > { %8009 = vmatprep.mubr.msk.bf16.mxu1 %vm8412_vm10, %v8411_v12 }
 0x317   : > { %8010 = vmatmul.mubr.msk.bf16.gmra.mxu1 %vm516_vm4, %v8349_v6 }
 0x318   : > { %8013 = vmatprep.mubr.msk.bf16.mxu1 %vm8412_vm10, %v8411_v12 }
 0x31f   : > { %v3766_v8 = vpop.f32.mrf.mxu1  ;;  %8014 = vmatmul.mubr.msk.bf16.gmra.mxu1 %vm516_vm4, %v8350_v7 }
 0x320   : > { %3804 = vst.msk [vmem:[#allocation5] sm:$0xff] %vm516_vm4, %v3766_v8  ;;  %8037 = vmatprep.mubr.msk.bf16.mxu1 %vm8412_vm10, %v8411_v12 }
 0x321   : > { %v7807_v9 = vpop.f32.mrf.mxu1 }
 0x323   : > { %v3769_v10 = vpop.f32.mrf.mxu1 }
 0x324   : > { %3805 = vst.msk [vmem:[#allocation5 + $0x8] sm:$0xff] %vm516_vm4, %v3769_v10 }
 0x325   : > { %v7808_v11 = vpop.f32.mrf.mxu1 }
 0x327   : > { %v3991_v39 = vld [vmem:[#allocation5] sm:$0xff]  ;;  %v3774_v17 = vpop.f32.mrf.mxu1 }
 0x328   : > { %v3953_v16 = vpop.f32.mrf.mxu0  ;;  %3806 = vst.msk [vmem:[#allocation5 + $0x10] sm:$0xff] %vm516_vm4, %v3774_v17 }
 0x329   : > { %v4000_v18 = vadd.f32 %v3991_v39, %v3953_v16  ;;  %v7811_v20 = vpop.f32.mrf.mxu1 }
 0x32a   : > { %v7831_v19 = vpop.f32.mrf.mxu0 }
 0x32b   : > { %4009 = vst.msk [vmem:[#allocation5] sm:$0xff] %vm516_vm4, %v4000_v18  ;;  %v3992_v21 = vld [vmem:[#allocation5 + $0x8] sm:$0xff]  ;;  %v3777_v22 = vpop.f32.mrf.mxu1 }
 0x32c   : > { %v3956_v54 = vpop.f32.mrf.mxu0  ;;  %3807 = vst.msk [vmem:[#allocation5 + $0x18] sm:$0xff] %vm516_vm4, %v3777_v22 }
 0x32d   : > { %v4001_v23 = vadd.f32 %v3992_v21, %v3956_v54  ;;  %v7812_v25 = vpop.f32.mrf.mxu1 }
 0x32e   : > { %v7832_v24 = vpop.f32.mrf.mxu0 }
 0x32f   : > { %4010 = vst.msk [vmem:[#allocation5 + $0x8] sm:$0xff] %vm516_vm4, %v4001_v23  ;;  %v3993_v60 = vld [vmem:[#allocation5 + $0x10] sm:$0xff]  ;;  %v3782_v27 = vpop.f32.mrf.mxu1 }
 0x330   : > { %v3961_v26 = vpop.f32.mrf.mxu0  ;;  %3808 = vst.msk [vmem:[#allocation5 + $0x20] sm:$0xff] %vm516_vm4, %v3782_v27 }
 0x331   : > { %v4002_v59 = vadd.f32 %v3993_v60, %v3961_v26  ;;  %v7815_v30 = vpop.f32.mrf.mxu1 }
 0x332   : > { %v7835_v29 = vpop.f32.mrf.mxu0  ;;  %v4166_v3 = vld [vmem:[#allocation5] sm:$0xff] }
 0x333   : > { %4011 = vst.msk [vmem:[#allocation5 + $0x10] sm:$0xff] %vm516_vm4, %v4002_v59  ;;  %v3994_v31 = vld [vmem:[#allocation5 + $0x18] sm:$0xff]  ;;  %v3785_v32 = vpop.f32.mrf.mxu1  ;;  %v8352_v29 = vld [vmem:[%s9665_s7 + $0x18] sm:$0xff]  }
 0x334   : > { %v3964_v15 = vpop.f32.mrf.mxu0  ;;  %3809 = vst.msk [vmem:[#allocation5 + $0x28] sm:$0xff] %vm516_vm4, %v3785_v32  ;;  %8034 = vmatpush3.bf16.msra.mxu1 %v8352_v29 }
 0x335   : > { %v4003_v34 = vadd.f32 %v3994_v31, %v3964_v15  ;;  %v7816_v37 = vpop.f32.mrf.mxu1  ;;  %8035 = vmatprep.subr.bf16.mxu1 %v8411_v12 }
 0x336   : > { %v7836_v36 = vpop.f32.mrf.mxu0  ;;  %v4167_v8 = vld [vmem:[#allocation5 + $0x8] sm:$0xff] }
 0x337   : > { %4012 = vst.msk [vmem:[#allocation5 + $0x18] sm:$0xff] %vm516_vm4, %v4003_v34  ;;  %v3995_v38 = vld [vmem:[#allocation5 + $0x20] sm:$0xff]  ;;  %v3790_v40 = vpop.f32.mrf.mxu1 }
 0x338   : > { %v3969_v28 = vpop.f32.mrf.mxu0  ;;  %3810 = vst.msk [vmem:[#allocation5 + $0x30] sm:$0xff] %vm516_vm4, %v3790_v40 }
 0x339   : > { %v4004_v41 = vadd.f32 %v3995_v38, %v3969_v28  ;;  %v7819_v43 = vpop.f32.mrf.mxu1 }
 0x33a   : > { %v7839_v42 = vpop.f32.mrf.mxu0  ;;  %v4168_v17 = vld [vmem:[#allocation5 + $0x10] sm:$0xff] }
 0x33b   : > { %4013 = vst.msk [vmem:[#allocation5 + $0x20] sm:$0xff] %vm516_vm4, %v4004_v41  ;;  %v3996_v44 = vld [vmem:[#allocation5 + $0x28] sm:$0xff]  ;;  %v3793_v45 = vpop.f32.mrf.mxu1 }
 0x33c   : > { %v3972_v14 = vpop.f32.mrf.mxu0  ;;  %3811 = vst.msk [vmem:[#allocation5 + $0x38] sm:$0xff] %vm516_vm4, %v3793_v45 }
 0x33d   : > { %v4005_v46 = vadd.f32 %v3996_v44, %v3972_v14  ;;  %v7820_v49 = vpop.f32.mrf.mxu1 }
 0x33e   : > { %v7840_v48 = vpop.f32.mrf.mxu0  ;;  %v4169_v24 = vld [vmem:[#allocation5 + $0x18] sm:$0xff] }
 0x33f   : > { %4014 = vst.msk [vmem:[#allocation5 + $0x28] sm:$0xff] %vm516_vm4, %v4005_v46  ;;  %v3997_v51 = vld [vmem:[#allocation5 + $0x30] sm:$0xff]  ;;  %v3798_v52 = vpop.f32.mrf.mxu1 }
 0x340   : > { %v3977_v50 = vpop.f32.mrf.mxu0  ;;  %3812 = vst.msk [vmem:[#allocation5 + $0x40] sm:$0xff] %vm516_vm4, %v3798_v52  ;;  %v8353_v46 = vld [vmem:[%s9665_s7] sm:$0xff]  }
 0x341   : > { %v4006_v55 = vadd.f32 %v3997_v51, %v3977_v50  ;;  %v7823_v57 = vpop.f32.mrf.mxu1  ;;  %8020 = vmatpush3.bf16.msra.mxu0 %v8353_v46 }
 0x342   : > { %v7843_v56 = vpop.f32.mrf.mxu0  ;;  %v4170_v31 = vld [vmem:[#allocation5 + $0x20] sm:$0xff]  ;;  %8049 = vmatprep.subr.bf16.mxu0 %v8411_v12 }
 0x343   : > { %4015 = vst.msk [vmem:[#allocation5 + $0x30] sm:$0xff] %vm516_vm4, %v4006_v55  ;;  %v3998_v33 = vld [vmem:[#allocation5 + $0x38] sm:$0xff]  ;;  %v3801_v61 = vpop.f32.mrf.mxu1 }
 0x344   : > { %v3980_v58 = vpop.f32.mrf.mxu0 }
 0x345   : > { %v4007_v62 = vadd.f32 %v3998_v33, %v3980_v58  ;;  %v7824_v13 = vpop.f32.mrf.mxu1 }
 0x346   : > { %v7844_v63 = vpop.f32.mrf.mxu0  ;;  %v4171_v41 = vld [vmem:[#allocation5 + $0x28] sm:$0xff] }
 0x347   : > { %4016 = vst.msk [vmem:[#allocation5 + $0x38] sm:$0xff] %vm516_vm4, %v4007_v62  ;;  %v3999_v1 = vld [vmem:[#allocation5 + $0x40] sm:$0xff]  ;;  %v4128_v2 = vpop.f32.mrf.mxu1 }
 0x348   : > { %v3985_v0 = vpop.f32.mrf.mxu0  ;;  %v4175_v5 = vadd.f32 %v4166_v3, %v4128_v2 }
 0x349   : > { %v4008_v4 = vadd.f32 %v3999_v1, %v3985_v0  ;;  %v7855_v53 = vpop.f32.mrf.mxu1 }
 0x34a   : > { %v7847_v35 = vpop.f32.mrf.mxu0  ;;  %4184 = vst.msk [vmem:[#allocation5] sm:$0xff] %vm516_vm4, %v4175_v5  ;;  %v4172_v49 = vld [vmem:[#allocation5 + $0x30] sm:$0xff] }
 0x34b   : > { %4017 = vst.msk [vmem:[#allocation5 + $0x40] sm:$0xff] %vm516_vm4, %v4008_v4  ;;  %v4131_v7 = vpop.f32.mrf.mxu1 }
 0x34c   : > { %v3988_v6 = vpop.f32.mrf.mxu0  ;;  %v4176_v9 = vadd.f32 %v4167_v8, %v4131_v7  ;;  %v8354_v7 = vld [vmem:[%s9665_s7 + $0x10] sm:$0xff]  }
 0x34d   : > { %v7856_v11 = vpop.f32.mrf.mxu1  ;;  %8036 = vmatpush3.bf16.msra.mxu1 %v8354_v7 }
 0x34e   : > { %v7848_v10 = vpop.f32.mrf.mxu0  ;;  %4185 = vst.msk [vmem:[#allocation5 + $0x8] sm:$0xff] %vm516_vm4, %v4176_v9  ;;  %v4173_v33 = vld [vmem:[#allocation5 + $0x38] sm:$0xff]  ;;  %8065 = vmatprep.subr.bf16.mxu1 %v8411_v12 }
 0x34f   : > { %v4136_v39 = vpop.f32.mrf.mxu1 }
 0x350   : > { %v4338_v16 = vpop.f32.mrf.mxu0  ;;  %v4177_v18 = vadd.f32 %v4168_v17, %v4136_v39 }
 0x351   : > { %v4376_v19 = vld [vmem:[#allocation5] sm:$0xff]  ;;  %v7859_v54 = vpop.f32.mrf.mxu1 }
 0x352   : > { %v7879_v20 = vpop.f32.mrf.mxu0  ;;  %v4385_v21 = vadd.f32 %v4376_v19, %v4338_v16  ;;  %4186 = vst.msk [vmem:[#allocation5 + $0x10] sm:$0xff] %vm516_vm4, %v4177_v18  ;;  %v4174_v3 = vld [vmem:[#allocation5 + $0x40] sm:$0xff] }
 0x353   : > { %v4139_v23 = vpop.f32.mrf.mxu1 }
 0x354   : > { %v4341_v22 = vpop.f32.mrf.mxu0  ;;  %4394 = vst.msk [vmem:[#allocation5] sm:$0xff] %vm516_vm4, %v4385_v21  ;;  %v4178_v25 = vadd.f32 %v4169_v24, %v4139_v23 }
 0x355   : > { %v4377_v26 = vld [vmem:[#allocation5 + $0x8] sm:$0xff]  ;;  %v7860_v27 = vpop.f32.mrf.mxu1 }
 0x356   : > { %v7880_v60 = vpop.f32.mrf.mxu0  ;;  %v4386_v59 = vadd.f32 %v4377_v26, %v4341_v22  ;;  %4187 = vst.msk [vmem:[#allocation5 + $0x18] sm:$0xff] %vm516_vm4, %v4178_v25 }
 0x357   : > { %v4144_v15 = vpop.f32.mrf.mxu1 }
 0x358   : > { %v4346_v30 = vpop.f32.mrf.mxu0  ;;  %4395 = vst.msk [vmem:[#allocation5 + $0x8] sm:$0xff] %vm516_vm4, %v4386_v59  ;;  %v4179_v32 = vadd.f32 %v4170_v31, %v4144_v15 }
 0x359   : > { %v4378_v34 = vld [vmem:[#allocation5 + $0x10] sm:$0xff]  ;;  %v7863_v37 = vpop.f32.mrf.mxu1 }
 0x35a   : > { %v7883_v36 = vpop.f32.mrf.mxu0  ;;  %v4387_v28 = vadd.f32 %v4378_v34, %v4346_v30  ;;  %4188 = vst.msk [vmem:[#allocation5 + $0x20] sm:$0xff] %vm516_vm4, %v4179_v32 }
 0x35b   : > { %v4147_v40 = vpop.f32.mrf.mxu1  ;;  %v4551_v19 = vld [vmem:[#allocation5] sm:$0xff] }
 0x35c   : > { %v4349_v38 = vpop.f32.mrf.mxu0  ;;  %4396 = vst.msk [vmem:[#allocation5 + $0x10] sm:$0xff] %vm516_vm4, %v4387_v28  ;;  %v4180_v42 = vadd.f32 %v4171_v41, %v4147_v40 }
 0x35d   : > { %v4379_v43 = vld [vmem:[#allocation5 + $0x18] sm:$0xff]  ;;  %v7864_v44 = vpop.f32.mrf.mxu1 }
 0x35e   : > { %v7884_v14 = vpop.f32.mrf.mxu0  ;;  %v4388_v45 = vadd.f32 %v4379_v43, %v4349_v38  ;;  %4189 = vst.msk [vmem:[#allocation5 + $0x28] sm:$0xff] %vm516_vm4, %v4180_v42 }
 0x35f   : > { %v4152_v48 = vpop.f32.mrf.mxu1  ;;  %v4552_v26 = vld [vmem:[#allocation5 + $0x8] sm:$0xff] }
 0x360   : > { %v4354_v47 = vpop.f32.mrf.mxu0  ;;  %4397 = vst.msk [vmem:[#allocation5 + $0x18] sm:$0xff] %vm516_vm4, %v4388_v45  ;;  %v4181_v50 = vadd.f32 %v4172_v49, %v4152_v48 }
 0x361   : > { %v4380_v51 = vld [vmem:[#allocation5 + $0x20] sm:$0xff]  ;;  %v7867_v55 = vpop.f32.mrf.mxu1 }
 0x362   : > { %v7887_v52 = vpop.f32.mrf.mxu0  ;;  %v4389_v56 = vadd.f32 %v4380_v51, %v4354_v47  ;;  %4190 = vst.msk [vmem:[#allocation5 + $0x30] sm:$0xff] %vm516_vm4, %v4181_v50 }
 0x363   : > { %v4155_v58 = vpop.f32.mrf.mxu1  ;;  %v4553_v15 = vld [vmem:[#allocation5 + $0x10] sm:$0xff] }
 0x364   : > { %v4357_v57 = vpop.f32.mrf.mxu0  ;;  %4398 = vst.msk [vmem:[#allocation5 + $0x20] sm:$0xff] %vm516_vm4, %v4389_v56  ;;  %v4182_v61 = vadd.f32 %v4173_v33, %v4155_v58 }
 0x365   : > { %v4381_v62 = vld [vmem:[#allocation5 + $0x28] sm:$0xff]  ;;  %v7868_v13 = vpop.f32.mrf.mxu1 }
 0x366   : > { %v7888_v63 = vpop.f32.mrf.mxu0  ;;  %v4390_v0 = vadd.f32 %v4381_v62, %v4357_v57  ;;  %4191 = vst.msk [vmem:[#allocation5 + $0x38] sm:$0xff] %vm516_vm4, %v4182_v61 }
 0x367   : > { %v4160_v2 = vpop.f32.mrf.mxu1  ;;  %v4554_v40 = vld [vmem:[#allocation5 + $0x18] sm:$0xff] }
 0x368   : > { %v4362_v1 = vpop.f32.mrf.mxu0  ;;  %4399 = vst.msk [vmem:[#allocation5 + $0x28] sm:$0xff] %vm516_vm4, %v4390_v0  ;;  %v4183_v4 = vadd.f32 %v4174_v3, %v4160_v2 }
 0x369   : > { %v4382_v5 = vld [vmem:[#allocation5 + $0x30] sm:$0xff]  ;;  %v7871_v53 = vpop.f32.mrf.mxu1 }
 0x36a   : > { %v7891_v35 = vpop.f32.mrf.mxu0  ;;  %v4391_v6 = vadd.f32 %v4382_v5, %v4362_v1  ;;  %4192 = vst.msk [vmem:[#allocation5 + $0x40] sm:$0xff] %vm516_vm4, %v4183_v4 }
 0x36b   : > { %v4163_v9 = vpop.f32.mrf.mxu1  ;;  %v4555_v47 = vld [vmem:[#allocation5 + $0x20] sm:$0xff] }
 0x36c   : > { %v4365_v8 = vpop.f32.mrf.mxu0  ;;  %4400 = vst.msk [vmem:[#allocation5 + $0x30] sm:$0xff] %vm516_vm4, %v4391_v6 }
 0x36d   : > { %v4383_v10 = vld [vmem:[#allocation5 + $0x38] sm:$0xff]  ;;  %v7872_v16 = vpop.f32.mrf.mxu1 }
 0x36e   : > { %v7892_v11 = vpop.f32.mrf.mxu0  ;;  %v4392_v39 = vadd.f32 %v4383_v10, %v4365_v8 }
 0x36f   : > { %v4513_v18 = vpop.f32.mrf.mxu1  ;;  %v4556_v57 = vld [vmem:[#allocation5 + $0x28] sm:$0xff] }
 0x370   : > { %v4370_v17 = vpop.f32.mrf.mxu0  ;;  %4401 = vst.msk [vmem:[#allocation5 + $0x38] sm:$0xff] %vm516_vm4, %v4392_v39  ;;  %v4560_v20 = vadd.f32 %v4551_v19, %v4513_v18 }
 0x371   : > { %v4384_v54 = vld [vmem:[#allocation5 + $0x40] sm:$0xff]  ;;  %v7903_v22 = vpop.f32.mrf.mxu1 }
 0x372   : > { %v7895_v21 = vpop.f32.mrf.mxu0  ;;  %v4393_v23 = vadd.f32 %v4384_v54, %v4370_v17  ;;  %4569 = vst.msk [vmem:[#allocation5] sm:$0xff] %vm516_vm4, %v4560_v20 }
 0x373   : > { %v4516_v25 = vpop.f32.mrf.mxu1  ;;  %v4557_v1 = vld [vmem:[#allocation5 + $0x30] sm:$0xff] }
 0x374   : > { %v4373_v24 = vpop.f32.mrf.mxu0  ;;  %4402 = vst.msk [vmem:[#allocation5 + $0x40] sm:$0xff] %vm516_vm4, %v4393_v23  ;;  %v4561_v60 = vadd.f32 %v4552_v26, %v4516_v25 }
 0x375   : > { %v7904_v59 = vpop.f32.mrf.mxu1 }
 0x376   : > { %v7896_v27 = vpop.f32.mrf.mxu0  ;;  %4570 = vst.msk [vmem:[#allocation5 + $0x8] sm:$0xff] %vm516_vm4, %v4561_v60 }
 0x377   : > { %v4521_v30 = vpop.f32.mrf.mxu1  ;;  %v4558_v7 = vld [vmem:[#allocation5 + $0x38] sm:$0xff] }
 0x378   : > { %v4723_v29 = vpop.f32.mrf.mxu0  ;;  %v4562_v31 = vadd.f32 %v4553_v15, %v4521_v30 }
 0x379   : > { %v4761_v32 = vld [vmem:[#allocation5] sm:$0xff]  ;;  %v7907_v36 = vpop.f32.mrf.mxu1 }
 0x37a   : > { %v7927_v34 = vpop.f32.mrf.mxu0  ;;  %v4770_v37 = vadd.f32 %v4761_v32, %v4723_v29  ;;  %4571 = vst.msk [vmem:[#allocation5 + $0x10] sm:$0xff] %vm516_vm4, %v4562_v31 }
 0x37b   : > { %v4524_v38 = vpop.f32.mrf.mxu1  ;;  %v4559_v18 = vld [vmem:[#allocation5 + $0x40] sm:$0xff] }
 0x37c   : > { %v4726_v28 = vpop.f32.mrf.mxu0  ;;  %4779 = vst.msk [vmem:[#allocation5] sm:$0xff] %vm516_vm4, %v4770_v37  ;;  %v4563_v41 = vadd.f32 %v4554_v40, %v4524_v38 }
 0x37d   : > { %v4762_v42 = vld [vmem:[#allocation5 + $0x8] sm:$0xff]  ;;  %v7908_v14 = vpop.f32.mrf.mxu1 }
 0x37e   : > { %v7928_v43 = vpop.f32.mrf.mxu0  ;;  %v4771_v44 = vadd.f32 %v4762_v42, %v4726_v28  ;;  %4572 = vst.msk [vmem:[#allocation5 + $0x18] sm:$0xff] %vm516_vm4, %v4563_v41 }
 0x37f   : > { %v4529_v46 = vpop.f32.mrf.mxu1 }
 0x380   : > { %v4731_v45 = vpop.f32.mrf.mxu0  ;;  %4780 = vst.msk [vmem:[#allocation5 + $0x8] sm:$0xff] %vm516_vm4, %v4771_v44  ;;  %v4564_v48 = vadd.f32 %v4555_v47, %v4529_v46 }
 0x381   : > { %v4763_v49 = vld [vmem:[#allocation5 + $0x10] sm:$0xff]  ;;  %v7911_v51 = vpop.f32.mrf.mxu1 }
 0x382   : > { %v7931_v50 = vpop.f32.mrf.mxu0  ;;  %v4772_v52 = vadd.f32 %v4763_v49, %v4731_v45  ;;  %4573 = vst.msk [vmem:[#allocation5 + $0x20] sm:$0xff] %vm516_vm4, %v4564_v48 }
 0x383   : > { %v4532_v56 = vpop.f32.mrf.mxu1  ;;  %v4936_v30 = vld [vmem:[#allocation5] sm:$0xff] }
 0x384   : > { %v4734_v55 = vpop.f32.mrf.mxu0  ;;  %4781 = vst.msk [vmem:[#allocation5 + $0x10] sm:$0xff] %vm516_vm4, %v4772_v52  ;;  %v4565_v58 = vadd.f32 %v4556_v57, %v4532_v56 }
 0x385   : > { %v4764_v33 = vld [vmem:[#allocation5 + $0x18] sm:$0xff]  ;;  %v7912_v62 = vpop.f32.mrf.mxu1 }
 0x386   : > { %v7932_v61 = vpop.f32.mrf.mxu0  ;;  %v4773_v63 = vadd.f32 %v4764_v33, %v4734_v55  ;;  %4574 = vst.msk [vmem:[#allocation5 + $0x28] sm:$0xff] %vm516_vm4, %v4565_v58 }
 0x387   : > { %v4537_v0 = vpop.f32.mrf.mxu1  ;;  %v4937_v38 = vld [vmem:[#allocation5 + $0x8] sm:$0xff] }
 0x388   : > { %v4739_v13 = vpop.f32.mrf.mxu0  ;;  %4782 = vst.msk [vmem:[#allocation5 + $0x18] sm:$0xff] %vm516_vm4, %v4773_v63  ;;  %v4566_v2 = vadd.f32 %v4557_v1, %v4537_v0 }
 0x389   : > { %v4765_v3 = vld [vmem:[#allocation5 + $0x20] sm:$0xff]  ;;  %v7915_v5 = vpop.f32.mrf.mxu1 }
 0x38a   : > { %v7935_v4 = vpop.f32.mrf.mxu0  ;;  %v4774_v35 = vadd.f32 %v4765_v3, %v4739_v13  ;;  %4575 = vst.msk [vmem:[#allocation5 + $0x30] sm:$0xff] %vm516_vm4, %v4566_v2 }
 0x38b   : > { %v4540_v6 = vpop.f32.mrf.mxu1  ;;  %v4938_v44 = vld [vmem:[#allocation5 + $0x10] sm:$0xff] }
 0x38c   : > { %v4742_v53 = vpop.f32.mrf.mxu0  ;;  %4783 = vst.msk [vmem:[#allocation5 + $0x20] sm:$0xff] %vm516_vm4, %v4774_v35  ;;  %v4567_v8 = vadd.f32 %v4558_v7, %v4540_v6 }
 0x38d   : > { %v4766_v9 = vld [vmem:[#allocation5 + $0x28] sm:$0xff]  ;;  %v7916_v11 = vpop.f32.mrf.mxu1 }
 0x38e   : > { %v7936_v10 = vpop.f32.mrf.mxu0  ;;  %v4775_v16 = vadd.f32 %v4766_v9, %v4742_v53  ;;  %4576 = vst.msk [vmem:[#allocation5 + $0x38] sm:$0xff] %vm516_vm4, %v4567_v8 }
 0x38f   : > { %v4545_v17 = vpop.f32.mrf.mxu1  ;;  %v4939_v52 = vld [vmem:[#allocation5 + $0x18] sm:$0xff] }
 0x390   : > { %v4747_v39 = vpop.f32.mrf.mxu0  ;;  %4784 = vst.msk [vmem:[#allocation5 + $0x28] sm:$0xff] %vm516_vm4, %v4775_v16  ;;  %v4568_v19 = vadd.f32 %v4559_v18, %v4545_v17 }
 0x391   : > { %v4767_v20 = vld [vmem:[#allocation5 + $0x30] sm:$0xff]  ;;  %v7919_v21 = vpop.f32.mrf.mxu1 }
 0x392   : > { %v7939_v54 = vpop.f32.mrf.mxu0  ;;  %v4776_v22 = vadd.f32 %v4767_v20, %v4747_v39  ;;  %4577 = vst.msk [vmem:[#allocation5 + $0x40] sm:$0xff] %vm516_vm4, %v4568_v19 }
 0x393   : > { %v4548_v24 = vpop.f32.mrf.mxu1  ;;  %v4940_v63 = vld [vmem:[#allocation5 + $0x20] sm:$0xff] }
 0x394   : > { %v4750_v23 = vpop.f32.mrf.mxu0  ;;  %4785 = vst.msk [vmem:[#allocation5 + $0x30] sm:$0xff] %vm516_vm4, %v4776_v22 }
 0x395   : > { %v4768_v25 = vld [vmem:[#allocation5 + $0x38] sm:$0xff]  ;;  %v7920_v60 = vpop.f32.mrf.mxu1 }
 0x396   : > { %v7940_v26 = vpop.f32.mrf.mxu0  ;;  %v4777_v27 = vadd.f32 %v4768_v25, %v4750_v23 }
 0x397   : > { %v4898_v29 = vpop.f32.mrf.mxu1  ;;  %v4941_v35 = vld [vmem:[#allocation5 + $0x28] sm:$0xff] }
 0x398   : > { %v4755_v59 = vpop.f32.mrf.mxu0  ;;  %4786 = vst.msk [vmem:[#allocation5 + $0x38] sm:$0xff] %vm516_vm4, %v4777_v27  ;;  %v4945_v15 = vadd.f32 %v4936_v30, %v4898_v29 }
 0x399   : > { %v4769_v31 = vld [vmem:[#allocation5 + $0x40] sm:$0xff]  ;;  %v7951_v34 = vpop.f32.mrf.mxu1 }
 0x39a   : > { %v7943_v32 = vpop.f32.mrf.mxu0  ;;  %v4778_v36 = vadd.f32 %v4769_v31, %v4755_v59  ;;  %4954 = vst.msk [vmem:[#allocation5] sm:$0xff] %vm516_vm4, %v4945_v15 }
 0x39b   : > { %v4901_v28 = vpop.f32.mrf.mxu1  ;;  %v4942_v16 = vld [vmem:[#allocation5 + $0x30] sm:$0xff] }
 0x39c   : > { %v4758_v37 = vpop.f32.mrf.mxu0  ;;  %4787 = vst.msk [vmem:[#allocation5 + $0x40] sm:$0xff] %vm516_vm4, %v4778_v36  ;;  %v4946_v40 = vadd.f32 %v4937_v38, %v4901_v28 }
 0x39d   : > { %v7952_v42 = vpop.f32.mrf.mxu1 }
 0x39e   : > { %v7944_v41 = vpop.f32.mrf.mxu0  ;;  %4955 = vst.msk [vmem:[#allocation5 + $0x8] sm:$0xff] %vm516_vm4, %v4946_v40 }
 0x39f   : > { %v4906_v14 = vpop.f32.mrf.mxu1  ;;  %v4943_v22 = vld [vmem:[#allocation5 + $0x38] sm:$0xff] }
 0x3a0   : > { %v5108_v43 = vpop.f32.mrf.mxu0  ;;  %v4947_v45 = vadd.f32 %v4938_v44, %v4906_v14 }
 0x3a1   : > { %v5146_v46 = vld [vmem:[#allocation5] sm:$0xff]  ;;  %v7955_v48 = vpop.f32.mrf.mxu1 }
 0x3a2   : > { %v7975_v47 = vpop.f32.mrf.mxu0  ;;  %v5155_v49 = vadd.f32 %v5146_v46, %v5108_v43  ;;  %4956 = vst.msk [vmem:[#allocation5 + $0x10] sm:$0xff] %vm516_vm4, %v4947_v45 }
 0x3a3   : > { %v4909_v51 = vpop.f32.mrf.mxu1  ;;  %v4944_v29 = vld [vmem:[#allocation5 + $0x40] sm:$0xff] }
 0x3a4   : > { %v5111_v50 = vpop.f32.mrf.mxu0  ;;  %5164 = vst.msk [vmem:[#allocation5] sm:$0xff] %vm516_vm4, %v5155_v49  ;;  %v4948_v55 = vadd.f32 %v4939_v52, %v4909_v51 }
 0x3a5   : > { %v5147_v56 = vld [vmem:[#allocation5 + $0x8] sm:$0xff]  ;;  %v7956_v58 = vpop.f32.mrf.mxu1 }
 0x3a6   : > { %v7976_v57 = vpop.f32.mrf.mxu0  ;;  %v5156_v33 = vadd.f32 %v5147_v56, %v5111_v50  ;;  %4957 = vst.msk [vmem:[#allocation5 + $0x18] sm:$0xff] %vm516_vm4, %v4948_v55 }
 0x3a7   : > { %v4914_v62 = vpop.f32.mrf.mxu1  ;;  %v9384_v57 = vld [vmem:[%s9664_s6] ss:$0 sm:$0xff] }
 0x3a8   : > { %v5116_v61 = vpop.f32.mrf.mxu0  ;;  %5165 = vst.msk [vmem:[#allocation5 + $0x8] sm:$0xff] %vm516_vm4, %v5156_v33  ;;  %v4949_v13 = vadd.f32 %v4940_v63, %v4914_v62  ;;  %v9389_v62 = vld [vmem:[%s9664_s6 + $0x1] ss:$0 sm:$0xff] }
 0x3a9   : > { %v5148_v0 = vld [vmem:[#allocation5 + $0x10] sm:$0xff]  ;;  %v7959_v2 = vpop.f32.mrf.mxu1 }
 0x3aa   : > { %v7979_v1 = vpop.f32.mrf.mxu0  ;;  %v5157_v3 = vadd.f32 %v5148_v0, %v5116_v61  ;;  %4958 = vst.msk [vmem:[#allocation5 + $0x20] sm:$0xff] %vm516_vm4, %v4949_v13 }
 0x3ab   : > { %v4917_v5 = vpop.f32.mrf.mxu1  ;;  %v5309_v14 = vld [vmem:[#allocation5] sm:$0xff] }
 0x3ac   : > { %v5119_v4 = vpop.f32.mrf.mxu0  ;;  %5166 = vst.msk [vmem:[#allocation5 + $0x10] sm:$0xff] %vm516_vm4, %v5157_v3  ;;  %v4950_v53 = vadd.f32 %v4941_v35, %v4917_v5 }
 0x3ad   : > { %v5149_v6 = vld [vmem:[#allocation5 + $0x18] sm:$0xff]  ;;  %v7960_v8 = vpop.f32.mrf.mxu1 }
 0x3ae   : > { %v7980_v7 = vpop.f32.mrf.mxu0  ;;  %v5158_v9 = vadd.f32 %v5149_v6, %v5119_v4  ;;  %4959 = vst.msk [vmem:[#allocation5 + $0x28] sm:$0xff] %vm516_vm4, %v4950_v53 }
 0x3af   : > { %v4922_v11 = vpop.f32.mrf.mxu1  ;;  %v5310_v51 = vld [vmem:[#allocation5 + $0x8] sm:$0xff] }
 0x3b0   : > { %v5124_v10 = vpop.f32.mrf.mxu0  ;;  %5167 = vst.msk [vmem:[#allocation5 + $0x18] sm:$0xff] %vm516_vm4, %v5158_v9  ;;  %v4951_v39 = vadd.f32 %v4942_v16, %v4922_v11 }
 0x3b1   : > { %v5150_v17 = vld [vmem:[#allocation5 + $0x20] sm:$0xff]  ;;  %v7963_v19 = vpop.f32.mrf.mxu1 }
 0x3b2   : > { %v7983_v18 = vpop.f32.mrf.mxu0  ;;  %v5159_v20 = vadd.f32 %v5150_v17, %v5124_v10  ;;  %4960 = vst.msk [vmem:[#allocation5 + $0x30] sm:$0xff] %vm516_vm4, %v4951_v39 }
 0x3b3   : > { %v4925_v21 = vpop.f32.mrf.mxu1  ;;  %v5311_v33 = vld [vmem:[#allocation5 + $0x10] sm:$0xff] }
 0x3b4   : > { %v5127_v54 = vpop.f32.mrf.mxu0  ;;  %5168 = vst.msk [vmem:[#allocation5 + $0x20] sm:$0xff] %vm516_vm4, %v5159_v20  ;;  %v4952_v23 = vadd.f32 %v4943_v22, %v4925_v21 }
 0x3b5   : > { %v5151_v24 = vld [vmem:[#allocation5 + $0x28] sm:$0xff]  ;;  %v7964_v26 = vpop.f32.mrf.mxu1 }
 0x3b6   : > { %v7984_v25 = vpop.f32.mrf.mxu0  ;;  %v5160_v60 = vadd.f32 %v5151_v24, %v5127_v54  ;;  %4961 = vst.msk [vmem:[#allocation5 + $0x38] sm:$0xff] %vm516_vm4, %v4952_v23 }
 0x3b7   : > { %v4930_v59 = vpop.f32.mrf.mxu1  ;;  %v5312_v2 = vld [vmem:[#allocation5 + $0x18] sm:$0xff] }
 0x3b8   : > { %v5132_v27 = vpop.f32.mrf.mxu0  ;;  %5169 = vst.msk [vmem:[#allocation5 + $0x28] sm:$0xff] %vm516_vm4, %v5160_v60  ;;  %v4953_v30 = vadd.f32 %v4944_v29, %v4930_v59 }
 0x3b9   : > { %v5152_v15 = vld [vmem:[#allocation5 + $0x30] sm:$0xff]  ;;  %v7967_v32 = vpop.f32.mrf.mxu1 }
 0x3ba   : > { %v7987_v31 = vpop.f32.mrf.mxu0  ;;  %v5161_v34 = vadd.f32 %v5152_v15, %v5132_v27  ;;  %4962 = vst.msk [vmem:[#allocation5 + $0x40] sm:$0xff] %vm516_vm4, %v4953_v30 }
 0x3bb   : > { %v4933_v37 = vpop.f32.mrf.mxu1  ;;  %v5313_v8 = vld [vmem:[#allocation5 + $0x20] sm:$0xff] }
 0x3bc   : > { %v5135_v36 = vpop.f32.mrf.mxu0  ;;  %5170 = vst.msk [vmem:[#allocation5 + $0x30] sm:$0xff] %vm516_vm4, %v5161_v34 }
 0x3bd   : > { %v5153_v28 = vld [vmem:[#allocation5 + $0x38] sm:$0xff]  ;;  %v7968_v40 = vpop.f32.mrf.mxu1 }
 0x3be   : > { %v7988_v38 = vpop.f32.mrf.mxu0  ;;  %v5162_v41 = vadd.f32 %v5153_v28, %v5135_v36 }
 0x3bf   : > { %v5271_v43 = vpop.f32.mrf.mxu1  ;;  %v5314_v20 = vld [vmem:[#allocation5 + $0x28] sm:$0xff] }
 0x3c0   : > { %v5140_v42 = vpop.f32.mrf.mxu0  ;;  %5171 = vst.msk [vmem:[#allocation5 + $0x38] sm:$0xff] %vm516_vm4, %v5162_v41  ;;  %v5318_v44 = vadd.f32 %v5309_v14, %v5271_v43  ;;  %v8356_v41 = vld [vmem:[%s9665_s7 + $0x28] sm:$0xff]  }
 0x3c1   : > { %v5154_v45 = vld [vmem:[#allocation5 + $0x40] sm:$0xff]  ;;  %v7999_v47 = vpop.f32.mrf.mxu1 }
 0x3c2   : > { %v7991_v46 = vpop.f32.mrf.mxu0  ;;  %v5163_v48 = vadd.f32 %v5154_v45, %v5140_v42  ;;  %5327 = vst.msk [vmem:[#allocation5] sm:$0xff] %vm516_vm4, %v5318_v44 }
 0x3c3   : > { %v5274_v50 = vpop.f32.mrf.mxu1  ;;  %v5315_v27 = vld [vmem:[#allocation5 + $0x30] sm:$0xff] }
 0x3c4   : > { %v5143_v49 = vpop.f32.mrf.mxu0  ;;  %5172 = vst.msk [vmem:[#allocation5 + $0x40] sm:$0xff] %vm516_vm4, %v5163_v48  ;;  %v5319_v52 = vadd.f32 %v5310_v51, %v5274_v50 }
 0x3c5   : > { %v8000_v56 = vpop.f32.mrf.mxu1 }
 0x3c6   : > { %v7992_v55 = vpop.f32.mrf.mxu0  ;;  %5328 = vst.msk [vmem:[#allocation5 + $0x8] sm:$0xff] %vm516_vm4, %v5319_v52  ;;  %v8358_v52 = vld [vmem:[%s9665_s7 + $0x20] sm:$0xff]  }
 0x3c7   : > { %v5279_v58 = vpop.f32.mrf.mxu1  ;;  %v5316_v37 = vld [vmem:[#allocation5 + $0x38] sm:$0xff] }
 0x3c8   : > { %v5320_v61 = vadd.f32 %v5311_v33, %v5279_v58 }
 0x3c9   : > { %v5338_v63 = vld [vmem:[#allocation5] sm:$0xff]  ;;  %v8003_v13 = vpop.f32.mrf.mxu1 }
 0x3ca   : > { %v5351_v0 = vmul.f32 %v9384_v57, %v5338_v63  ;;  %5329 = vst.msk [vmem:[#allocation5 + $0x10] sm:$0xff] %vm516_vm4, %v5320_v61 }
 0x3cb   : > { %v5282_v1 = vpop.f32.mrf.mxu1  ;;  %v5317_v48 = vld [vmem:[#allocation5 + $0x40] sm:$0xff] }
 0x3cc   : > { %v5364_v3 = vadd.f32 %v9389_v62, %v5351_v0  ;;  %v5321_v4 = vadd.f32 %v5312_v2, %v5282_v1 }
 0x3cd   : > { %v5339_v5 = vld [vmem:[#allocation5 + $0x8] sm:$0xff]  ;;  %v8004_v35 = vpop.f32.mrf.mxu1 }
 0x3ce   : > { %v5373_v53 = vmax.f32 %v5364_v3, 0.0  ;;  %v5352_v6 = vmul.f32 %v9384_v57, %v5339_v5  ;;  %5330 = vst.msk [vmem:[#allocation5 + $0x18] sm:$0xff] %vm516_vm4, %v5321_v4 }
 0x3cf   : > { %v5287_v7 = vpop.f32.mrf.mxu1 }
 0x3d0   : > { %v7360_v9 = vpack.c.bf16 %v5373_v53, %v5373_v53  ;;  %v5365_v10 = vadd.f32 %v9389_v62, %v5352_v6  ;;  %v5322_v11 = vadd.f32 %v5313_v8, %v5287_v7 }
 0x3d1   : > { %v5340_v16 = vld [vmem:[#allocation5 + $0x10] sm:$0xff]  ;;  %v8007_v39 = vpop.f32.mrf.mxu1 }
 0x3d2   : > { %5419 = vst.msk [vmem:[#allocation4] sm:$0xf] %vm1505_vm5, %v7360_v9  ;;  %v5374_v17 = vmax.f32 %v5365_v10, 0.0  ;;  %v5353_v18 = vmul.f32 %v9384_v57, %v5340_v16  ;;  %v8361_v10 = vld [vmem:[%s9665_s7 + $0x38] sm:$0xff]  }
 0x3d3   : > { %5331 = vst.msk [vmem:[#allocation5 + $0x20] sm:$0xff] %vm516_vm4, %v5322_v11  ;;  %v5290_v19 = vpop.f32.mrf.mxu1 }
 0x3d4   : > { %v7361_v54 = vpack.c.bf16 %v5374_v17, %v5374_v17  ;;  %v5366_v21 = vadd.f32 %v9389_v62, %v5353_v18  ;;  %v5323_v22 = vadd.f32 %v5314_v20, %v5290_v19 }
 0x3d5   : > { %v5341_v23 = vld [vmem:[#allocation5 + $0x18] sm:$0xff]  ;;  %v8008_v24 = vpop.f32.mrf.mxu1 }
 0x3d6   : > { %5420 = vst.msk [vmem:[#allocation4 + $0x4] sm:$0xf] %vm1505_vm5, %v7361_v54  ;;  %v5375_v25 = vmax.f32 %v5366_v21, 0.0  ;;  %v5354_v26 = vmul.f32 %v9384_v57, %v5341_v23  ;;  %v8367_v21 = vld [vmem:[%s9665_s7 + $0x30] sm:$0xff]  }
 0x3d7   : > { %5332 = vst.msk [vmem:[#allocation5 + $0x28] sm:$0xff] %vm516_vm4, %v5323_v22  ;;  %v5295_v60 = vpop.f32.mrf.mxu1 }
 0x3d8   : > { %v7362_v59 = vpack.c.bf16 %v5375_v25, %v5375_v25  ;;  %v5367_v29 = vadd.f32 %v9389_v62, %v5354_v26  ;;  %v5324_v30 = vadd.f32 %v5315_v27, %v5295_v60 }
 0x3d9   : > { %v8011_v31 = vpop.f32.mrf.mxu1 }
 0x3da   : > { %v5342_v15 = vld [vmem:[#allocation5 + $0x20] sm:$0xff]  ;;  %5421 = vst.msk [vmem:[#allocation4 + $0x8] sm:$0xf] %vm1505_vm5, %v7362_v59  ;;  %v5376_v32 = vmax.f32 %v5367_v29, 0.0 }
 0x3db   : > { %v5355_v34 = vmul.f32 %v9384_v57, %v5342_v15  ;;  %5333 = vst.msk [vmem:[#allocation5 + $0x30] sm:$0xff] %vm516_vm4, %v5324_v30  ;;  %v5298_v36 = vpop.f32.mrf.mxu1 }
 0x3dc   : > { %v7363_v28 = vpack.c.bf16 %v5376_v32, %v5376_v32  ;;  %v5325_v40 = vadd.f32 %v5316_v37, %v5298_v36 }
 0x3dd   : > { %v5368_v38 = vadd.f32 %v9389_v62, %v5355_v34  ;;  %v8012_v43 = vpop.f32.mrf.mxu1  ;;  %v8355_v14 = vld [vmem:[#allocation4] sm:$0xff]  }
 0x3de   : > { %v5343_v42 = vld [vmem:[#allocation5 + $0x28] sm:$0xff]  ;;  %5422 = vst.msk [vmem:[#allocation4 + $0xc] sm:$0xf] %vm1505_vm5, %v7363_v28  ;;  %v8359_v46 = vld [vmem:[#allocation4] sm:$0xff]   ;;  %8022 = vmatmul.mubr.msk.bf16.vlgmr.msra.gmra.mxu0 %vm516_vm4, %v8355_v14  ;;  %v8370_v14 = vld [vmem:[%s9665_s7 + $0x40] sm:$0xff]  }
 0x3df   : > { %v5377_v44 = vmax.f32 %v5368_v38, 0.0  ;;  %v5356_v45 = vmul.f32 %v9384_v57, %v5343_v42  ;;  %5334 = vst.msk [vmem:[#allocation5 + $0x38] sm:$0xff] %vm516_vm4, %v5325_v40  ;;  %v5303_v47 = vpop.f32.mrf.mxu1  ;;  %8050 = vmatpush3.bf16.msra.mxu0 %v8356_v41  ;;  %8025 = vmatprep.mubr.msk.bf16.mxu0 %vm8412_vm10, %v8411_v12  ;;  %v5570_v58 = vshll.u32 %v8359_v46, 16  ;;  %v5568_v8 = vshrl.u32 %v8359_v46, 16  ;;  %v8364_v60 = vld [vmem:[#allocation4] sm:$0xfe]  }
 0x3e0   : > { %v5326_v51 = vadd.f32 %v5317_v48, %v5303_v47  ;;  %8051 = vmatprep.subr.bf16.mxu0 %v8411_v12  ;;  %v5721_v32 = vrot.slane %v8364_v60, 1  ;;  %v8366_v34 = vld [vmem:[%s9665_s7 + $0x48] sm:$0xff]  }
 0x3e1   : > { %v7364_v49 = vpack.c.bf16 %v5377_v44, %v5377_v44  ;;  %v5369_v50 = vadd.f32 %v9389_v62, %v5356_v45  ;;  %v8015_v56 = vpop.f32.mrf.mxu1  ;;  %v5572_v4 = vrot.slane %v5570_v58, 1  ;;  %v8371_v38 = vld [vmem:[#allocation4 + $0x4] sm:$0xfe]  }
 0x3e2   : > { %v5344_v55 = vld [vmem:[#allocation5 + $0x30] sm:$0xff]  ;;  %5335 = vst.msk [vmem:[#allocation5 + $0x40] sm:$0xff] %vm516_vm4, %v5326_v51  ;;  %v5855_v46 = vshrl.u32 %v8371_v38, 16  ;;  %v5858_v47 = vshll.u32 %v8371_v38, 16 }
 0x3e3   : > { %5423 = vst.msk [vmem:[#allocation4 + $0x10] sm:$0xf] %vm1505_vm5, %v7364_v49  ;;  %v5378_v33 = vmax.f32 %v5369_v50, 0.0  ;;  %v5357_v61 = vmul.f32 %v9384_v57, %v5344_v55  ;;  %v5306_v63 = vpop.f32.mrf.mxu1  ;;  %8052 = vmatpush3.bf16.msra.mxu0 %v8358_v52  ;;  %v5573_v17 = vor.u32 %v5572_v4, %v5568_v8  ;;  %v8376_v8 = vld [vmem:[#allocation4 + $0x4] sm:$0xfc]  }
 0x3e4   : > { %8081 = vmatprep.subr.bf16.mxu0 %v8411_v12  ;;  %v5857_v56 = vrot.slane %v5855_v46, 1  ;;  %v5860_v58 = vrot.slane %v5858_v47, 2  ;;  %v8391_v47 = vld [vmem:[%s9665_s7 + $0x70] sm:$0xff]  }
 0x3e5   : > { %v7365_v13 = vpack.c.bf16 %v5378_v33, %v5378_v33  ;;  %v5370_v0 = vadd.f32 %v9389_v62, %v5357_v61  ;;  %v8016_v2 = vpop.f32.mrf.mxu1  ;;  %v8357_v3 = vld [vmem:[#allocation4 + $0x8] sm:$0xff]  }
 0x3e6   : > { %v5345_v1 = vld [vmem:[#allocation5 + $0x38] sm:$0xff]  ;;  %v8360_v53 = vld [vmem:[#allocation4 + $0x8] sm:$0xff]   ;;  %8026 = vmatmul.mubr.msk.bf16.gmra.mxu0 %vm516_vm4, %v8357_v3 }
 0x3e7   : > { %5424 = vst.msk [vmem:[#allocation4 + $0x14] sm:$0xf] %vm1505_vm5, %v7365_v13  ;;  %v5379_v5 = vmax.f32 %v5370_v0, 0.0  ;;  %v5358_v35 = vmul.f32 %v9384_v57, %v5345_v1  ;;  %v5575_v9 = vshll.u32 %v8360_v53, 16  ;;  %8029 = vmatprep.mubr.msk.bf16.mxu0 %vm8412_vm10, %v8411_v12  ;;  %v8365_v24 = vld [vmem:[#allocation4 + $0x8] sm:$0xff]   ;;  %v5579_v25 = vshrl.u32 %v8360_v53, 16 }
 0x3e8   : > { %v5722_v30 = vrot.slane %v8365_v24, 1  ;;  %v5861_v13 = vor.u32 %v5860_v58, %v5857_v56  ;;  %v8373_v0 = vld [vmem:[%s9665_s7 + $0x58] sm:$0xff]   ;;  %v8390_v58 = vld [vmem:[%s9665_s7 + $0x88] sm:$0xff]  }
 0x3e9   : > { %v7366_v6 = vpack.c.bf16 %v5379_v5, %v5379_v5  ;;  %v5371_v7 = vadd.f32 %v9389_v62, %v5358_v35  ;;  %v5346_v11 = vld [vmem:[#allocation5 + $0x40] sm:$0xff]  ;;  %v5577_v18 = vrot.slane %v5575_v9, 1 }
 0x3ea   : > { %v5359_v39 = vmul.f32 %v9384_v57, %v5346_v11  ;;  %v8372_v15 = vld [vmem:[#allocation4 + $0xc] sm:$0xff]   ;;  %v5723_v37 = vsel %vm1991_vm6, %v5721_v32, %v5722_v30  ;;  %v8379_v35 = vld [vmem:[%s9665_s7 + $0x50] sm:$0xff]  }
 0x3eb   : > { %5425 = vst.msk [vmem:[#allocation4 + $0x18] sm:$0xf] %vm1505_vm5, %v7366_v6  ;;  %v5380_v16 = vmax.f32 %v5371_v7, 0.0  ;;  %v5578_v54 = vsel %vm591_vm1, %v5573_v17, %v5577_v18  ;;  %v5581_v59 = vor.u32 %v5579_v25, %v5577_v18  ;;  %v5863_v40 = vshrl.u32 %v8372_v15, 16  ;;  %v8377_v6 = vld [vmem:[#allocation4 + $0xc] sm:$0xff]   ;;  %v8378_v17 = vld [vmem:[%s9665_s7 + $0x68] sm:$0xff]  }
 0x3ec   : > { %v5372_v20 = vadd.f32 %v9389_v62, %v5359_v39  ;;  %8038 = vmatmul.mubr.msk.bf16.vlgmr.msra.gmra.mxu1 %vm516_vm4, %v5578_v54  ;;  %v5866_v41 = vshll.u32 %v8372_v15, 16  ;;  %v6016_v11 = vrot.slane %v8377_v6, 2  ;;  %v6015_v39 = vrot.slane %v8376_v8, 2 }
 0x3ed   : > { %v7367_v19 = vpack.c.bf16 %v5380_v16, %v5380_v16  ;;  %8066 = vmatpush3.bf16.msra.mxu1 %v8361_v10  ;;  %8041 = vmatprep.mubr.msk.bf16.mxu1 %vm8412_vm10, %v8411_v12  ;;  %v5865_v48 = vrot.slane %v5863_v40, 1  ;;  %v8385_v40 = vld [vmem:[%s9665_s7 + $0x78] sm:$0xff]  }
 0x3ee   : > { %v8362_v22 = vld [vmem:[#allocation4 + $0x10] sm:$0xff]   ;;  %v5381_v23 = vmax.f32 %v5372_v20, 0.0  ;;  %8067 = vmatprep.subr.bf16.mxu1 %v8411_v12  ;;  %v5868_v49 = vrot.slane %v5866_v41, 2  ;;  %v6017_v54 = vsel %vm1187_vm3, %v6015_v39, %v6016_v11 }
 0x3ef   : > { %5426 = vst.msk [vmem:[#allocation4 + $0x1c] sm:$0xf] %vm1505_vm5, %v7367_v19  ;;  %v8363_v57 = vld [vmem:[#allocation4 + $0x10] sm:$0xff]   ;;  %8030 = vmatmul.mubr.msk.bf16.gmra.mxu0 %vm516_vm4, %v8362_v22  ;;  %v8383_v22 = vld [vmem:[#allocation4 + $0x4] sm:$0xfc]  }
 0x3f0   : > { %v7368_v62 = vpack.c.bf16 %v5381_v23, %v5381_v23  ;;  %v5583_v26 = vshll.u32 %v8363_v57, 16  ;;  %8053 = vmatprep.mubr.msk.bf16.mxu0 %vm8412_vm10, %v8411_v12  ;;  %v8369_v28 = vld [vmem:[#allocation4 + $0x10] sm:$0xff]   ;;  %v5587_v42 = vshrl.u32 %v8363_v57, 16  ;;  %v5869_v33 = vor.u32 %v5868_v49, %v5865_v48  ;;  %v8388_v49 = vld [vmem:[#allocation4 + $0x8] sm:$0xf8]  }
 0x3f1   : > { %8068 = vmatpush3.bf16.msra.mxu1 %v8367_v21  ;;  %v5724_v45 = vrot.slane %v8369_v28, 1  ;;  %v8384_v20 = vld [vmem:[#allocation4 + $0xc] sm:$0xff]   ;;  %v8382_v57 = vld [vmem:[%s9665_s7 + $0x60] sm:$0xff]   ;;  %v6152_v60 = vshll.u32 %v8383_v22, 16  ;;  %v6309_v56 = vrot.slane %v8388_v49, 3 }
 0x3f2   : > { %v8368_v27 = vld [vmem:[#allocation4 + $0x18] ss:$0 sps:$4 sm:$0x11]   ;;  %5427 = vst.msk [vmem:[#allocation4 + $0x20] sm:$0xf] %vm1505_vm5, %v7368_v62  ;;  %v5585_v29 = vrot.slane %v5583_v26, 1  ;;  %8097 = vmatprep.subr.bf16.mxu1 %v8411_v12  ;;  %v5870_v3 = vsel %vm885_vm2, %v5861_v13, %v5869_v33 }
 0x3f3   : > { %v5591_v36 = vshll.u32 %v8368_v27, 16  ;;  %v8374_v51 = vld [vmem:[#allocation4 + $0x18] ss:$0 sps:$4 sm:$0x11]   ;;  %v5725_v55 = vsel %vm1991_vm6, %v5722_v30, %v5724_v45  ;;  %v6157_v24 = vshrl.u32 %v8384_v20, 16  ;;  %v6160_v62 = vshll.u32 %v8384_v20, 16 }
 0x3f4   : > { %v5586_v31 = vsel %vm591_vm1, %v5581_v59, %v5585_v29  ;;  %v5589_v44 = vor.u32 %v5587_v42, %v5585_v29  ;;  %v8375_v52 = vld [vmem:[#allocation4 + $0x14] sm:$0xff]   ;;  %v5726_v1 = vrot.slane %v8374_v51, 1  ;;  %v6149_v26 = vshrl.u32 %v8383_v22, 16 }
 0x3f5   : > { %8042 = vmatmul.mubr.msk.bf16.gmra.mxu1 %vm516_vm4, %v5586_v31  ;;  %v5593_v43 = vrot.slane %v5591_v36, 1  ;;  %v5872_v61 = vshrl.u32 %v8375_v52, 16  ;;  %v5875_v63 = vshll.u32 %v8375_v52, 16  ;;  %v8381_v21 = vld [vmem:[#allocation4 + $0x14] sm:$0xff]   ;;  %v6159_v59 = vrot.slane %v6157_v24, 2 }
 0x3f6   : > { %8045 = vmatprep.mubr.msk.bf16.mxu1 %vm8412_vm10, %v8411_v12  ;;  %v8380_v2 = vld [vmem:[#allocation4 + $0x1c] ss:$0 sps:$4 sm:$0x33]   ;;  %v5727_v53 = vsel %vm1991_vm6, %v5724_v45, %v5726_v1  ;;  %v6018_v25 = vrot.slane %v8381_v21, 2  ;;  %v6162_v29 = vrot.slane %v6160_v62, 3  ;;  %v8387_v30 = vld [vmem:[#allocation4 + $0x14] sm:$0xff]  }
 0x3f7   : > { %8054 = vmatmul.mubr.msk.bf16.vlgmr.msra.gmra.mxu0 %vm516_vm4, %v5723_v37  ;;  %v5594_v50 = vsel %vm591_vm1, %v5589_v44, %v5593_v43  ;;  %v5874_v4 = vrot.slane %v5872_v61, 1  ;;  %v5877_v5 = vrot.slane %v5875_v63, 2  ;;  %v5881_v9 = vshrl.u32 %v8380_v2, 16  ;;  %v8392_v44 = vld [vmem:[#allocation4 + $0x1c] ss:$0 sps:$4 sm:$0x77]  }
 0x3f8   : > { %8082 = vmatpush3.bf16.msra.mxu0 %v8366_v34  ;;  %8057 = vmatprep.mubr.msk.bf16.mxu0 %vm8412_vm10, %v8411_v12  ;;  %v5884_v10 = vshll.u32 %v8380_v2, 16  ;;  %v6019_v15 = vsel %vm1187_vm3, %v6016_v11, %v6018_v25  ;;  %v6151_v31 = vrot.slane %v6149_v26, 2  ;;  %v6154_v32 = vrot.slane %v6152_v60, 3  ;;  %v8386_v34 = vld [vmem:[#allocation4 + $0x1c] ss:$0 sps:$4 sm:$0x33]  }
 0x3f9   : > { %8083 = vmatprep.subr.bf16.mxu0 %v8411_v12  ;;  %v5878_v7 = vor.u32 %v5877_v5, %v5874_v4  ;;  %v5883_v18 = vrot.slane %v5881_v9, 1  ;;  %v6163_v36 = vor.u32 %v6162_v29, %v6159_v59  ;;  %v6166_v37 = vshrl.u32 %v8387_v30, 16  ;;  %v8389_v46 = vld [vmem:[#allocation4 + $0x10] sm:$0xff]   ;;  %v8395_v1 = vld [vmem:[#allocation4 + $0x8] sm:$0xf8]  }
 0x3fa   : > { %v5886_v19 = vrot.slane %v5884_v10, 2  ;;  %v6169_v28 = vshll.u32 %v8387_v30, 16  ;;  %v6155_v38 = vor.u32 %v6154_v32, %v6151_v31  ;;  %v6020_v41 = vrot.slane %v8386_v34, 2  ;;  %v8396_v63 = vld [vmem:[#allocation4 + $0x10] sm:$0xff]   ;;  %v8398_v10 = vld [vmem:[#allocation4 + $0x18] sm:$0xff]  }
 0x3fb   : > { %v5879_v16 = vsel %vm885_vm2, %v5869_v33, %v5878_v7  ;;  %v6168_v43 = vrot.slane %v6166_v37, 2  ;;  %v6178_v51 = vshll.u32 %v8392_v44, 16  ;;  %v6310_v52 = vrot.slane %v8389_v46, 3  ;;  %v8400_v24 = vld [vmem:[#allocation4 + $0x20] ss:$0 sps:$4 sm:$0xff]   ;;  %v8399_v30 = vld [vmem:[#allocation4 + $0xc] sm:$0xff]  }
 0x3fc   : > { %8084 = vmatpush3.bf16.msra.mxu0 %v8370_v14  ;;  %v5887_v23 = vor.u32 %v5886_v19, %v5883_v18  ;;  %v6164_v42 = vsel %vm2674_vm7, %v6155_v38, %v6163_v36  ;;  %v6171_v14 = vrot.slane %v6169_v28, 3  ;;  %v6021_v45 = vsel %vm1187_vm3, %v6018_v25, %v6020_v41  ;;  %v8401_v32 = vld [vmem:[#allocation4 + $0x14] sm:$0xff]   ;;  %v8402_v34 = vld [vmem:[#allocation4 + $0x1c] sm:$0xff]  }
 0x3fd   : > { %8046 = vmatmul.mubr.msk.bf16.gmra.mxu1 %vm516_vm4, %v5594_v50  ;;  %8113 = vmatprep.subr.bf16.mxu0 %v8411_v12  ;;  %v6175_v50 = vshrl.u32 %v8392_v44, 16  ;;  %v6180_v61 = vrot.slane %v6178_v51, 3  ;;  %v6311_v13 = vsel %vm2935_vm8, %v6309_v56, %v6310_v52  ;;  %v6451_v4 = vshrl.u32 %v8396_v63, 16 }
 0x3fe   : > { %8069 = vmatprep.mubr.msk.bf16.mxu1 %vm8412_vm10, %v8411_v12  ;;  %v5888_v27 = vsel %vm885_vm2, %v5878_v7, %v5887_v23  ;;  %v6172_v48 = vor.u32 %v6171_v14, %v6168_v43  ;;  %v6454_v5 = vshll.u32 %v8396_v63, 16  ;;  %v6446_v6 = vshll.u32 %v8395_v1, 16 }
 0x3ff   : > { %8058 = vmatmul.mubr.msk.bf16.gmra.mxu0 %vm516_vm4, %v5725_v55  ;;  %v6177_v33 = vrot.slane %v6175_v50, 2  ;;  %v6453_v8 = vrot.slane %v6451_v4, 3  ;;  %v6460_v19 = vshrl.u32 %v8398_v10, 16  ;;  %v6463_v20 = vshll.u32 %v8398_v10, 16 }
 0x400   : > { %8061 = vmatprep.mubr.msk.bf16.mxu0 %vm8412_vm10, %v8411_v12  ;;  %v6173_v55 = vsel %vm2674_vm7, %v6163_v36, %v6172_v48  ;;  %v6456_v9 = vrot.slane %v6454_v5, 4  ;;  %v6448_v39 = vrot.slane %v6446_v6, 4  ;;  %v6469_v26 = vshrl.u32 %v8400_v24, 16 }
 0x401   : > { %v6181_v2 = vor.u32 %v6180_v61, %v6177_v33  ;;  %v6462_v23 = vrot.slane %v6460_v19, 3  ;;  %v6472_v60 = vshll.u32 %v8400_v24, 16 }
 0x402   : > { %v6457_v18 = vor.u32 %v6456_v9, %v6453_v8  ;;  %v6471_v59 = vrot.slane %v6469_v26, 3 }
 0x403   : > { %v6182_v7 = vsel %vm2674_vm7, %v6172_v48, %v6181_v2  ;;  %v6474_v29 = vrot.slane %v6472_v60, 4 }
 0x405   : > { %8070 = vmatmul.mubr.msk.bf16.vlgmr.msra.gmra.mxu1 %vm516_vm4, %v5870_v3  ;;  %v8394_v3 = vld [vmem:[%s9665_s7 + $0x80] sm:$0xff]  }
 0x406   : > { %8098 = vmatpush3.bf16.msra.mxu1 %v8373_v0  ;;  %8073 = vmatprep.mubr.msk.bf16.mxu1 %vm8412_vm10, %v8411_v12  ;;  %v8393_v0 = vld [vmem:[#allocation4 + $0x18] sm:$0xff]  }
 0x407   : > { %8062 = vmatmul.mubr.msk.bf16.gmra.mxu0 %vm516_vm4, %v5727_v53  ;;  %8099 = vmatprep.subr.bf16.mxu1 %v8411_v12  ;;  %v6443_v53 = vshrl.u32 %v8395_v1, 16 }
 0x408   : > { %8085 = vmatprep.mubr.msk.bf16.mxu0 %vm8412_vm10, %v8411_v12 }
 0x40a   : > { %8100 = vmatpush3.bf16.msra.mxu1 %v8379_v35  ;;  %v6312_v35 = vrot.slane %v8393_v0, 3 }
 0x40b   : > { %8129 = vmatprep.subr.bf16.mxu1 %v8411_v12 }
 0x40c   : > { %v6313_v11 = vsel %vm2935_vm8, %v6310_v52, %v6312_v35 }
 0x40d   : > { %8074 = vmatmul.mubr.msk.bf16.gmra.mxu1 %vm516_vm4, %v5879_v16  ;;  %v6445_v16 = vrot.slane %v6443_v53, 3 }
 0x40e   : > { %8077 = vmatprep.mubr.msk.bf16.mxu1 %vm8412_vm10, %v8411_v12 }
 0x40f   : > { %8086 = vmatmul.mubr.msk.bf16.vlgmr.msra.gmra.mxu0 %vm516_vm4, %v6017_v54  ;;  %v6449_v54 = vor.u32 %v6448_v39, %v6445_v16 }
 0x410   : > { %8114 = vmatpush3.bf16.msra.mxu0 %v8378_v17  ;;  %8089 = vmatprep.mubr.msk.bf16.mxu0 %vm8412_vm10, %v8411_v12  ;;  %v8397_v17 = vld [vmem:[#allocation4 + $0x20] ss:$0 sps:$4 sm:$0x77]  }
 0x411   : > { %8115 = vmatprep.subr.bf16.mxu0 %v8411_v12  ;;  %v6314_v21 = vrot.slane %v8397_v17, 3  ;;  %v6458_v22 = vsel %vm3147_vm9, %v6449_v54, %v6457_v18 }
 0x413   : > { %v6315_v62 = vsel %vm2935_vm8, %v6312_v35, %v6314_v21 }
 0x414   : > { %8116 = vmatpush3.bf16.msra.mxu0 %v8382_v57  ;;  %v6465_v57 = vrot.slane %v6463_v20, 4 }
 0x415   : > { %8078 = vmatmul.mubr.msk.bf16.gmra.mxu1 %vm516_vm4, %v5888_v27  ;;  %8145 = vmatprep.subr.bf16.mxu0 %v8411_v12 }
 0x416   : > { %8101 = vmatprep.mubr.msk.bf16.mxu1 %vm8412_vm10, %v8411_v12  ;;  %v6466_v25 = vor.u32 %v6465_v57, %v6462_v23 }
 0x417   : > { %8090 = vmatmul.mubr.msk.bf16.gmra.mxu0 %vm516_vm4, %v6019_v15  ;;  %v6475_v15 = vor.u32 %v6474_v29, %v6471_v59 }
 0x418   : > { %8093 = vmatprep.mubr.msk.bf16.mxu0 %vm8412_vm10, %v8411_v12  ;;  %v6467_v27 = vsel %vm3147_vm9, %v6457_v18, %v6466_v25 }
 0x419   : > { %v6476_v31 = vsel %vm3147_vm9, %v6466_v25, %v6475_v15 }
 0x41d   : > { %8102 = vmatmul.mubr.msk.bf16.vlgmr.msra.gmra.mxu1 %vm516_vm4, %v6164_v42 }
 0x41e   : > { %8130 = vmatpush3.bf16.msra.mxu1 %v8385_v40  ;;  %8105 = vmatprep.mubr.msk.bf16.mxu1 %vm8412_vm10, %v8411_v12 }
 0x41f   : > { %8094 = vmatmul.mubr.msk.bf16.gmra.mxu0 %vm516_vm4, %v6021_v45  ;;  %8131 = vmatprep.subr.bf16.mxu1 %v8411_v12 }
 0x420   : > { %8117 = vmatprep.mubr.msk.bf16.mxu0 %vm8412_vm10, %v8411_v12 }
 0x422   : > { %8132 = vmatpush3.bf16.msra.mxu1 %v8391_v47 }
 0x425   : > { %8106 = vmatmul.mubr.msk.bf16.gmra.mxu1 %vm516_vm4, %v6173_v55 }
 0x426   : > { %8109 = vmatprep.mubr.msk.bf16.mxu1 %vm8412_vm10, %v8411_v12 }
 0x427   : > { %8118 = vmatmul.mubr.msk.bf16.vlgmr.msra.gmra.mxu0 %vm516_vm4, %v6311_v13 }
 0x428   : > { %8146 = vmatpush3.bf16.msra.mxu0 %v8390_v58  ;;  %8121 = vmatprep.mubr.msk.bf16.mxu0 %vm8412_vm10, %v8411_v12 }
 0x429   : > { %8147 = vmatprep.subr.bf16.mxu0 %v8411_v12 }
 0x42c   : > { %8148 = vmatpush3.bf16.msra.mxu0 %v8394_v3 }
 0x42d   : > { %8110 = vmatmul.mubr.msk.bf16.gmra.mxu1 %vm516_vm4, %v6182_v7 }
 0x42e   : > { %8133 = vmatprep.mubr.msk.bf16.mxu1 %vm8412_vm10, %v8411_v12 }
 0x42f   : > { %8122 = vmatmul.mubr.msk.bf16.gmra.mxu0 %vm516_vm4, %v6313_v11 }
 0x430   : > { %8125 = vmatprep.mubr.msk.bf16.mxu0 %vm8412_vm10, %v8411_v12 }
 0x435   : > { %8134 = vmatmul.mubr.msk.bf16.vlgmr.msra.gmra.mxu1 %vm516_vm4, %v6458_v22 }
 0x436   : > { %8137 = vmatprep.mubr.msk.bf16.mxu1 %vm8412_vm10, %v8411_v12 }
 0x437   : > { %8126 = vmatmul.mubr.msk.bf16.gmra.mxu0 %vm516_vm4, %v6315_v62 }
 0x438   : > { %8149 = vmatprep.mubr.msk.bf16.mxu0 %vm8412_vm10, %v8411_v12 }
 0x43d   : > { %8138 = vmatmul.mubr.msk.bf16.gmra.mxu1 %vm516_vm4, %v6467_v27 }
 0x43e   : > { %8141 = vmatprep.mubr.msk.bf16.mxu1 %vm8412_vm10, %v8411_v12 }
 0x43f   : > { %8150 = vmatmul.mubr.msk.bf16.vlgmr.msra.gmra.mxu0 %vm516_vm4, %v8399_v30 }
 0x440   : > { %8153 = vmatprep.mubr.msk.bf16.mxu0 %vm8412_vm10, %v8411_v12 }
 0x445   : > { %8142 = vmatmul.mubr.msk.bf16.gmra.mxu1 %vm516_vm4, %v6476_v31 }
 0x447   : > { %8154 = vmatmul.mubr.msk.bf16.gmra.mxu0 %vm516_vm4, %v8401_v32 }
 0x448   : > { %8157 = vmatprep.mubr.msk.bf16.mxu0 %vm8412_vm10, %v8411_v12 }
 0x44f   : > { %8158 = vmatmul.mubr.msk.bf16.gmra.mxu0 %vm516_vm4, %v8402_v34 }
 0x49e   : > { %v5508_v36 = vpop.f32.mrf.mxu0 }
 0x49f   : > { %5531 = vst.msk [vmem:[#allocation5] sm:$0xff] %vm516_vm4, %v5508_v36 }
 0x4a0   : > { %v8023_v37 = vpop.f32.mrf.mxu0 }
 0x4a2   : > { %v5511_v28 = vpop.f32.mrf.mxu0 }
 0x4a3   : > { %5532 = vst.msk [vmem:[#allocation5 + $0x8] sm:$0xff] %vm516_vm4, %v5511_v28 }
 0x4a4   : > { %v8024_v38 = vpop.f32.mrf.mxu0 }
 0x4a6   : > { %v5516_v40 = vpop.f32.mrf.mxu0  ;;  %v5673_v12 = vld [vmem:[#allocation5] sm:$0xff] }
 0x4a7   : > { %5533 = vst.msk [vmem:[#allocation5 + $0x10] sm:$0xff] %vm516_vm4, %v5516_v40 }
 0x4a8   : > { %v8027_v41 = vpop.f32.mrf.mxu0 }
 0x4aa   : > { %v5519_v42 = vpop.f32.mrf.mxu0  ;;  %v5674_v48 = vld [vmem:[#allocation5 + $0x8] sm:$0xff] }
 0x4ab   : > { %5534 = vst.msk [vmem:[#allocation5 + $0x18] sm:$0xff] %vm516_vm4, %v5519_v42 }
 0x4ac   : > { %v5650_v43 = vpop.f32.mrf.mxu1  ;;  %v8028_v14 = vpop.f32.mrf.mxu0 }
 0x4ad   : > { %v5679_v44 = vadd.f32 %v5673_v12, %v5650_v43 }
 0x4ae   : > { %v8039_v45 = vpop.f32.mrf.mxu1  ;;  %v5675_v56 = vld [vmem:[#allocation5 + $0x10] sm:$0xff] }
 0x4af   : > { %v5524_v46 = vpop.f32.mrf.mxu0  ;;  %5685 = vst.msk [vmem:[#allocation5] sm:$0xff] %vm516_vm4, %v5679_v44 }
 0x4b0   : > { %5535 = vst.msk [vmem:[#allocation5 + $0x20] sm:$0xff] %vm516_vm4, %v5524_v46  ;;  %v5653_v47 = vpop.f32.mrf.mxu1 }
 0x4b1   : > { %v8031_v49 = vpop.f32.mrf.mxu0  ;;  %v5680_v50 = vadd.f32 %v5674_v48, %v5653_v47 }
 0x4b2   : > { %v8040_v51 = vpop.f32.mrf.mxu1  ;;  %v5676_v2 = vld [vmem:[#allocation5 + $0x18] sm:$0xff] }
 0x4b3   : > { %v5527_v52 = vpop.f32.mrf.mxu0  ;;  %5686 = vst.msk [vmem:[#allocation5 + $0x8] sm:$0xff] %vm516_vm4, %v5680_v50 }
 0x4b4   : > { %5536 = vst.msk [vmem:[#allocation5 + $0x28] sm:$0xff] %vm516_vm4, %v5527_v52 }
 0x4b5   : > { %v5658_v55 = vpop.f32.mrf.mxu1  ;;  %v8032_v58 = vpop.f32.mrf.mxu0 }
 0x4b6   : > { %v5681_v33 = vadd.f32 %v5675_v56, %v5658_v55  ;;  %v5806_v13 = vld [vmem:[#allocation5] sm:$0xff] }
 0x4b7   : > { %v8043_v61 = vpop.f32.mrf.mxu1  ;;  %v5783_v63 = vpop.f32.mrf.mxu0  ;;  %v5677_v8 = vld [vmem:[#allocation5 + $0x20] sm:$0xff] }
 0x4b8   : > { %5687 = vst.msk [vmem:[#allocation5 + $0x10] sm:$0xff] %vm516_vm4, %v5681_v33  ;;  %v5812_v0 = vadd.f32 %v5806_v13, %v5783_v63 }
 0x4b9   : > { %v5661_v1 = vpop.f32.mrf.mxu1  ;;  %v8055_v3 = vpop.f32.mrf.mxu0 }
 0x4ba   : > { %5818 = vst.msk [vmem:[#allocation5] sm:$0xff] %vm516_vm4, %v5812_v0  ;;  %v5682_v4 = vadd.f32 %v5676_v2, %v5661_v1  ;;  %v5807_v53 = vld [vmem:[#allocation5 + $0x8] sm:$0xff] }
 0x4bb   : > { %v8044_v5 = vpop.f32.mrf.mxu1  ;;  %v5786_v35 = vpop.f32.mrf.mxu0  ;;  %v5678_v19 = vld [vmem:[#allocation5 + $0x28] sm:$0xff] }
 0x4bc   : > { %5688 = vst.msk [vmem:[#allocation5 + $0x18] sm:$0xff] %vm516_vm4, %v5682_v4  ;;  %v5813_v6 = vadd.f32 %v5807_v53, %v5786_v35 }
 0x4bd   : > { %v5666_v7 = vpop.f32.mrf.mxu1  ;;  %v8056_v9 = vpop.f32.mrf.mxu0 }
 0x4be   : > { %5819 = vst.msk [vmem:[#allocation5 + $0x8] sm:$0xff] %vm516_vm4, %v5813_v6  ;;  %v5683_v10 = vadd.f32 %v5677_v8, %v5666_v7 }
 0x4bf   : > { %v8047_v11 = vpop.f32.mrf.mxu1  ;;  %v5791_v16 = vpop.f32.mrf.mxu0  ;;  %v5808_v39 = vld [vmem:[#allocation5 + $0x10] sm:$0xff] }
 0x4c0   : > { %5689 = vst.msk [vmem:[#allocation5 + $0x20] sm:$0xff] %vm516_vm4, %v5683_v10  ;;  %v5814_v17 = vadd.f32 %v5808_v39, %v5791_v16 }
 0x4c1   : > { %v5669_v18 = vpop.f32.mrf.mxu1  ;;  %v8059_v20 = vpop.f32.mrf.mxu0  ;;  %v5967_v62 = vld [vmem:[#allocation5] sm:$0xff] }
 0x4c2   : > { %5820 = vst.msk [vmem:[#allocation5 + $0x10] sm:$0xff] %vm516_vm4, %v5814_v17  ;;  %v5684_v54 = vadd.f32 %v5678_v19, %v5669_v18 }
 0x4c3   : > { %v8048_v21 = vpop.f32.mrf.mxu1  ;;  %v5794_v22 = vpop.f32.mrf.mxu0  ;;  %v5809_v23 = vld [vmem:[#allocation5 + $0x18] sm:$0xff] }
 0x4c4   : > { %5690 = vst.msk [vmem:[#allocation5 + $0x28] sm:$0xff] %vm516_vm4, %v5684_v54  ;;  %v5815_v57 = vadd.f32 %v5809_v23, %v5794_v22 }
 0x4c5   : > { %v5944_v24 = vpop.f32.mrf.mxu1  ;;  %v8060_v25 = vpop.f32.mrf.mxu0  ;;  %v5968_v15 = vld [vmem:[#allocation5 + $0x8] sm:$0xff] }
 0x4c6   : > { %5821 = vst.msk [vmem:[#allocation5 + $0x18] sm:$0xff] %vm516_vm4, %v5815_v57  ;;  %v5973_v26 = vadd.f32 %v5967_v62, %v5944_v24 }
 0x4c7   : > { %v8071_v60 = vpop.f32.mrf.mxu1  ;;  %v5799_v27 = vpop.f32.mrf.mxu0  ;;  %v5810_v59 = vld [vmem:[#allocation5 + $0x20] sm:$0xff] }
 0x4c8   : > { %5979 = vst.msk [vmem:[#allocation5] sm:$0xff] %vm516_vm4, %v5973_v26  ;;  %v5816_v29 = vadd.f32 %v5810_v59, %v5799_v27 }
 0x4c9   : > { %v5947_v30 = vpop.f32.mrf.mxu1  ;;  %v8063_v31 = vpop.f32.mrf.mxu0  ;;  %v5969_v40 = vld [vmem:[#allocation5 + $0x10] sm:$0xff] }
 0x4ca   : > { %5822 = vst.msk [vmem:[#allocation5 + $0x20] sm:$0xff] %vm516_vm4, %v5816_v29  ;;  %v5974_v32 = vadd.f32 %v5968_v15, %v5947_v30 }
 0x4cb   : > { %v8072_v34 = vpop.f32.mrf.mxu1  ;;  %v5802_v36 = vpop.f32.mrf.mxu0  ;;  %v5811_v37 = vld [vmem:[#allocation5 + $0x28] sm:$0xff] }
 0x4cc   : > { %5980 = vst.msk [vmem:[#allocation5 + $0x8] sm:$0xff] %vm516_vm4, %v5974_v32  ;;  %v5817_v28 = vadd.f32 %v5811_v37, %v5802_v36 }
 0x4cd   : > { %v5952_v38 = vpop.f32.mrf.mxu1  ;;  %v8064_v41 = vpop.f32.mrf.mxu0  ;;  %v5970_v46 = vld [vmem:[#allocation5 + $0x18] sm:$0xff] }
 0x4ce   : > { %5823 = vst.msk [vmem:[#allocation5 + $0x28] sm:$0xff] %vm516_vm4, %v5817_v28  ;;  %v5975_v42 = vadd.f32 %v5969_v40, %v5952_v38 }
 0x4cf   : > { %v8075_v43 = vpop.f32.mrf.mxu1  ;;  %v6077_v12 = vpop.f32.mrf.mxu0  ;;  %v6100_v14 = vld [vmem:[#allocation5] sm:$0xff] }
 0x4d0   : > { %5981 = vst.msk [vmem:[#allocation5 + $0x10] sm:$0xff] %vm516_vm4, %v5975_v42  ;;  %v6106_v44 = vadd.f32 %v6100_v14, %v6077_v12 }
 0x4d1   : > { %v5955_v45 = vpop.f32.mrf.mxu1  ;;  %v8087_v47 = vpop.f32.mrf.mxu0  ;;  %v5971_v56 = vld [vmem:[#allocation5 + $0x20] sm:$0xff] }
 0x4d2   : > { %6112 = vst.msk [vmem:[#allocation5] sm:$0xff] %vm516_vm4, %v6106_v44  ;;  %v5976_v48 = vadd.f32 %v5970_v46, %v5955_v45 }
 0x4d3   : > { %v8076_v49 = vpop.f32.mrf.mxu1  ;;  %v6080_v50 = vpop.f32.mrf.mxu0  ;;  %v6101_v51 = vld [vmem:[#allocation5 + $0x8] sm:$0xff] }
 0x4d4   : > { %5982 = vst.msk [vmem:[#allocation5 + $0x18] sm:$0xff] %vm516_vm4, %v5976_v48  ;;  %v6107_v52 = vadd.f32 %v6101_v51, %v6080_v50 }
 0x4d5   : > { %v5960_v55 = vpop.f32.mrf.mxu1  ;;  %v8088_v58 = vpop.f32.mrf.mxu0  ;;  %v5972_v2 = vld [vmem:[#allocation5 + $0x28] sm:$0xff] }
 0x4d6   : > { %6113 = vst.msk [vmem:[#allocation5 + $0x8] sm:$0xff] %vm516_vm4, %v6107_v52  ;;  %v5977_v33 = vadd.f32 %v5971_v56, %v5960_v55 }
 0x4d7   : > { %v8079_v61 = vpop.f32.mrf.mxu1  ;;  %v6085_v63 = vpop.f32.mrf.mxu0  ;;  %v6102_v13 = vld [vmem:[#allocation5 + $0x10] sm:$0xff] }
 0x4d8   : > { %5983 = vst.msk [vmem:[#allocation5 + $0x20] sm:$0xff] %vm516_vm4, %v5977_v33  ;;  %v6108_v0 = vadd.f32 %v6102_v13, %v6085_v63 }
 0x4d9   : > { %v5963_v1 = vpop.f32.mrf.mxu1  ;;  %v8091_v3 = vpop.f32.mrf.mxu0  ;;  %v6261_v8 = vld [vmem:[#allocation5] sm:$0xff] }
 0x4da   : > { %6114 = vst.msk [vmem:[#allocation5 + $0x10] sm:$0xff] %vm516_vm4, %v6108_v0  ;;  %v5978_v4 = vadd.f32 %v5972_v2, %v5963_v1 }
 0x4db   : > { %v8080_v5 = vpop.f32.mrf.mxu1  ;;  %v6088_v35 = vpop.f32.mrf.mxu0  ;;  %v6103_v53 = vld [vmem:[#allocation5 + $0x18] sm:$0xff] }
 0x4dc   : > { %5984 = vst.msk [vmem:[#allocation5 + $0x28] sm:$0xff] %vm516_vm4, %v5978_v4  ;;  %v6109_v6 = vadd.f32 %v6103_v53, %v6088_v35 }
 0x4dd   : > { %v6238_v7 = vpop.f32.mrf.mxu1  ;;  %v8092_v9 = vpop.f32.mrf.mxu0  ;;  %v6262_v19 = vld [vmem:[#allocation5 + $0x8] sm:$0xff] }
 0x4de   : > { %6115 = vst.msk [vmem:[#allocation5 + $0x18] sm:$0xff] %vm516_vm4, %v6109_v6  ;;  %v6267_v10 = vadd.f32 %v6261_v8, %v6238_v7 }
 0x4df   : > { %v8103_v11 = vpop.f32.mrf.mxu1  ;;  %v6093_v16 = vpop.f32.mrf.mxu0  ;;  %v6104_v39 = vld [vmem:[#allocation5 + $0x20] sm:$0xff] }
 0x4e0   : > { %6273 = vst.msk [vmem:[#allocation5] sm:$0xff] %vm516_vm4, %v6267_v10  ;;  %v6110_v17 = vadd.f32 %v6104_v39, %v6093_v16 }
 0x4e1   : > { %v6241_v18 = vpop.f32.mrf.mxu1  ;;  %v8095_v20 = vpop.f32.mrf.mxu0  ;;  %v6263_v62 = vld [vmem:[#allocation5 + $0x10] sm:$0xff] }
 0x4e2   : > { %6116 = vst.msk [vmem:[#allocation5 + $0x20] sm:$0xff] %vm516_vm4, %v6110_v17  ;;  %v6268_v54 = vadd.f32 %v6262_v19, %v6241_v18 }
 0x4e3   : > { %v8104_v21 = vpop.f32.mrf.mxu1  ;;  %v6096_v22 = vpop.f32.mrf.mxu0  ;;  %v6105_v23 = vld [vmem:[#allocation5 + $0x28] sm:$0xff] }
 0x4e4   : > { %6274 = vst.msk [vmem:[#allocation5 + $0x8] sm:$0xff] %vm516_vm4, %v6268_v54  ;;  %v6111_v57 = vadd.f32 %v6105_v23, %v6096_v22 }
 0x4e5   : > { %v6246_v24 = vpop.f32.mrf.mxu1  ;;  %v8096_v25 = vpop.f32.mrf.mxu0  ;;  %v6264_v15 = vld [vmem:[#allocation5 + $0x18] sm:$0xff] }
 0x4e6   : > { %6117 = vst.msk [vmem:[#allocation5 + $0x28] sm:$0xff] %vm516_vm4, %v6111_v57  ;;  %v6269_v26 = vadd.f32 %v6263_v62, %v6246_v24 }
 0x4e7   : > { %v8107_v60 = vpop.f32.mrf.mxu1  ;;  %v6371_v27 = vpop.f32.mrf.mxu0  ;;  %v6394_v59 = vld [vmem:[#allocation5] sm:$0xff] }
 0x4e8   : > { %6275 = vst.msk [vmem:[#allocation5 + $0x10] sm:$0xff] %vm516_vm4, %v6269_v26  ;;  %v6400_v29 = vadd.f32 %v6394_v59, %v6371_v27  ;;  %v7329_v60 = vld [vmem:[%s9666_s8] ss:$0 sm:$0xff] }
 0x4e9   : > { %v6249_v30 = vpop.f32.mrf.mxu1  ;;  %v8119_v31 = vpop.f32.mrf.mxu0  ;;  %v6265_v40 = vld [vmem:[#allocation5 + $0x20] sm:$0xff] }
 0x4ea   : > { %6406 = vst.msk [vmem:[#allocation5] sm:$0xff] %vm516_vm4, %v6400_v29  ;;  %v6270_v32 = vadd.f32 %v6264_v15, %v6249_v30  ;;  %v7330_v15 = vld [vmem:[%s9666_s8 + $0x1] ss:$0 sm:$0xff] }
 0x4eb   : > { %v8108_v34 = vpop.f32.mrf.mxu1  ;;  %v6374_v36 = vpop.f32.mrf.mxu0  ;;  %v6395_v37 = vld [vmem:[#allocation5 + $0x8] sm:$0xff] }
 0x4ec   : > { %6276 = vst.msk [vmem:[#allocation5 + $0x18] sm:$0xff] %vm516_vm4, %v6270_v32  ;;  %v6401_v28 = vadd.f32 %v6395_v37, %v6374_v36 }
 0x4ed   : > { %v6254_v38 = vpop.f32.mrf.mxu1  ;;  %v8120_v41 = vpop.f32.mrf.mxu0  ;;  %v6266_v46 = vld [vmem:[#allocation5 + $0x28] sm:$0xff] }
 0x4ee   : > { %6407 = vst.msk [vmem:[#allocation5 + $0x8] sm:$0xff] %vm516_vm4, %v6401_v28  ;;  %v6271_v42 = vadd.f32 %v6265_v40, %v6254_v38 }
 0x4ef   : > { %v8111_v43 = vpop.f32.mrf.mxu1  ;;  %v6379_v12 = vpop.f32.mrf.mxu0  ;;  %v6396_v14 = vld [vmem:[#allocation5 + $0x10] sm:$0xff] }
 0x4f0   : > { %6277 = vst.msk [vmem:[#allocation5 + $0x20] sm:$0xff] %vm516_vm4, %v6271_v42  ;;  %v6402_v44 = vadd.f32 %v6396_v14, %v6379_v12 }
 0x4f1   : > { %v6257_v45 = vpop.f32.mrf.mxu1  ;;  %v8123_v47 = vpop.f32.mrf.mxu0  ;;  %v6555_v56 = vld [vmem:[#allocation5] sm:$0xff] }
 0x4f2   : > { %6408 = vst.msk [vmem:[#allocation5 + $0x10] sm:$0xff] %vm516_vm4, %v6402_v44  ;;  %v6272_v48 = vadd.f32 %v6266_v46, %v6257_v45 }
 0x4f3   : > { %v8112_v49 = vpop.f32.mrf.mxu1  ;;  %v6382_v50 = vpop.f32.mrf.mxu0  ;;  %v6397_v51 = vld [vmem:[#allocation5 + $0x18] sm:$0xff] }
 0x4f4   : > { %6278 = vst.msk [vmem:[#allocation5 + $0x28] sm:$0xff] %vm516_vm4, %v6272_v48  ;;  %v6403_v52 = vadd.f32 %v6397_v51, %v6382_v50 }
 0x4f5   : > { %v6532_v55 = vpop.f32.mrf.mxu1  ;;  %v8124_v58 = vpop.f32.mrf.mxu0  ;;  %v6556_v2 = vld [vmem:[#allocation5 + $0x8] sm:$0xff] }
 0x4f6   : > { %6409 = vst.msk [vmem:[#allocation5 + $0x18] sm:$0xff] %vm516_vm4, %v6403_v52  ;;  %v6561_v33 = vadd.f32 %v6555_v56, %v6532_v55 }
 0x4f7   : > { %v8135_v61 = vpop.f32.mrf.mxu1  ;;  %v6387_v63 = vpop.f32.mrf.mxu0  ;;  %v6398_v13 = vld [vmem:[#allocation5 + $0x20] sm:$0xff] }
 0x4f8   : > { %6567 = vst.msk [vmem:[#allocation5] sm:$0xff] %vm516_vm4, %v6561_v33  ;;  %v6404_v0 = vadd.f32 %v6398_v13, %v6387_v63 }
 0x4f9   : > { %v6535_v1 = vpop.f32.mrf.mxu1  ;;  %v8127_v3 = vpop.f32.mrf.mxu0  ;;  %v6557_v8 = vld [vmem:[#allocation5 + $0x10] sm:$0xff] }
 0x4fa   : > { %6410 = vst.msk [vmem:[#allocation5 + $0x20] sm:$0xff] %vm516_vm4, %v6404_v0  ;;  %v6562_v4 = vadd.f32 %v6556_v2, %v6535_v1 }
 0x4fb   : > { %v8136_v5 = vpop.f32.mrf.mxu1  ;;  %v6390_v35 = vpop.f32.mrf.mxu0  ;;  %v6399_v53 = vld [vmem:[#allocation5 + $0x28] sm:$0xff] }
 0x4fc   : > { %6568 = vst.msk [vmem:[#allocation5 + $0x8] sm:$0xff] %vm516_vm4, %v6562_v4  ;;  %v6405_v6 = vadd.f32 %v6399_v53, %v6390_v35 }
 0x4fd   : > { %v6540_v7 = vpop.f32.mrf.mxu1  ;;  %v8128_v9 = vpop.f32.mrf.mxu0  ;;  %v6558_v19 = vld [vmem:[#allocation5 + $0x18] sm:$0xff] }
 0x4fe   : > { %6411 = vst.msk [vmem:[#allocation5 + $0x28] sm:$0xff] %vm516_vm4, %v6405_v6  ;;  %v6563_v10 = vadd.f32 %v6557_v8, %v6540_v7 }
 0x4ff   : > { %v8139_v11 = vpop.f32.mrf.mxu1  ;;  %v6654_v16 = vpop.f32.mrf.mxu0  ;;  %v6677_v39 = vld [vmem:[#allocation5] sm:$0xff] }
 0x500   : > { %6569 = vst.msk [vmem:[#allocation5 + $0x10] sm:$0xff] %vm516_vm4, %v6563_v10  ;;  %v6683_v17 = vadd.f32 %v6677_v39, %v6654_v16 }
 0x501   : > { %v6543_v18 = vpop.f32.mrf.mxu1  ;;  %v8151_v20 = vpop.f32.mrf.mxu0  ;;  %v6559_v62 = vld [vmem:[#allocation5 + $0x20] sm:$0xff] }
 0x502   : > { %6689 = vst.msk [vmem:[#allocation5] sm:$0xff] %vm516_vm4, %v6683_v17  ;;  %v6564_v54 = vadd.f32 %v6558_v19, %v6543_v18 }
 0x503   : > { %v8140_v21 = vpop.f32.mrf.mxu1  ;;  %v6657_v22 = vpop.f32.mrf.mxu0  ;;  %v6678_v23 = vld [vmem:[#allocation5 + $0x8] sm:$0xff] }
 0x504   : > { %6570 = vst.msk [vmem:[#allocation5 + $0x18] sm:$0xff] %vm516_vm4, %v6564_v54  ;;  %v6684_v57 = vadd.f32 %v6678_v23, %v6657_v22 }
 0x505   : > { %v6548_v24 = vpop.f32.mrf.mxu1  ;;  %v8152_v25 = vpop.f32.mrf.mxu0  ;;  %v6560_v34 = vld [vmem:[#allocation5 + $0x28] sm:$0xff] }
 0x506   : > { %6690 = vst.msk [vmem:[#allocation5 + $0x8] sm:$0xff] %vm516_vm4, %v6684_v57  ;;  %v6565_v26 = vadd.f32 %v6559_v62, %v6548_v24 }
 0x507   : > { %v8143_v27 = vpop.f32.mrf.mxu1  ;;  %v6662_v59 = vpop.f32.mrf.mxu0  ;;  %v6679_v29 = vld [vmem:[#allocation5 + $0x10] sm:$0xff] }
 0x508   : > { %6571 = vst.msk [vmem:[#allocation5 + $0x20] sm:$0xff] %vm516_vm4, %v6565_v26  ;;  %v6685_v30 = vadd.f32 %v6679_v29, %v6662_v59 }
 0x509   : > { %v6697_v31 = vld [vmem:[#allocation5] sm:$0xff]  ;;  %v6551_v32 = vpop.f32.mrf.mxu1  ;;  %v8155_v36 = vpop.f32.mrf.mxu0 }
 0x50a   : > { %v6707_v37 = vmul.f32 %v7329_v60, %v6697_v31  ;;  %6691 = vst.msk [vmem:[#allocation5 + $0x10] sm:$0xff] %vm516_vm4, %v6685_v30  ;;  %v6566_v28 = vadd.f32 %v6560_v34, %v6551_v32 }
 0x50b   : > { %v8144_v38 = vpop.f32.mrf.mxu1  ;;  %v6665_v40 = vpop.f32.mrf.mxu0  ;;  %v6680_v41 = vld [vmem:[#allocation5 + $0x18] sm:$0xff] }
 0x50c   : > { %v6717_v42 = vadd.f32 %v7330_v15, %v6707_v37  ;;  %6572 = vst.msk [vmem:[#allocation5 + $0x28] sm:$0xff] %vm516_vm4, %v6566_v28  ;;  %v6686_v43 = vadd.f32 %v6680_v41, %v6665_v40 }
 0x50d   : > { %v6698_v12 = vld [vmem:[#allocation5 + $0x8] sm:$0xff]  ;;  %v8156_v14 = vpop.f32.mrf.mxu0 }
 0x50e   : > { %v6723_v44 = vmax.f32 %v6717_v42, 0.0  ;;  %v6708_v45 = vmul.f32 %v7329_v60, %v6698_v12  ;;  %6692 = vst.msk [vmem:[#allocation5 + $0x18] sm:$0xff] %vm516_vm4, %v6686_v43 }
 0x50f   : > { %v6670_v46 = vpop.f32.mrf.mxu0  ;;  %v6681_v47 = vld [vmem:[#allocation5 + $0x20] sm:$0xff] }
 0x510   : > { %6729 = vst.msk [vmem:[%s9638_s16] sm:$0xff] %vm516_vm4, %v6723_v44  ;;  %v6718_v48 = vadd.f32 %v7330_v15, %v6708_v45  ;;  %v6687_v49 = vadd.f32 %v6681_v47, %v6670_v46 }
 0x511   : > { %v6699_v50 = vld [vmem:[#allocation5 + $0x10] sm:$0xff]  ;;  %v8159_v51 = vpop.f32.mrf.mxu0 }
 0x512   : > { %v6724_v52 = vmax.f32 %v6718_v48, 0.0  ;;  %v6709_v55 = vmul.f32 %v7329_v60, %v6699_v50  ;;  %6693 = vst.msk [vmem:[#allocation5 + $0x20] sm:$0xff] %vm516_vm4, %v6687_v49 }
 0x513   : > { %v6673_v56 = vpop.f32.mrf.mxu0  ;;  %v6682_v58 = vld [vmem:[#allocation5 + $0x28] sm:$0xff] }
 0x514   : > { %6730 = vst.msk [vmem:[%s9638_s16 + $0x8] sm:$0xff] %vm516_vm4, %v6724_v52  ;;  %v6719_v33 = vadd.f32 %v7330_v15, %v6709_v55  ;;  %v6688_v61 = vadd.f32 %v6682_v58, %v6673_v56 }
 0x515   : > { %v6700_v63 = vld [vmem:[#allocation5 + $0x18] sm:$0xff]  ;;  %v8160_v13 = vpop.f32.mrf.mxu0 }
 0x516   : > { %v6725_v0 = vmax.f32 %v6719_v33, 0.0  ;;  %v6710_v1 = vmul.f32 %v7329_v60, %v6700_v63  ;;  %6694 = vst.msk [vmem:[#allocation5 + $0x28] sm:$0xff] %vm516_vm4, %v6688_v61 }
 0x518   : > { %6731 = vst.msk [vmem:[%s9638_s16 + $0x10] sm:$0xff] %vm516_vm4, %v6725_v0  ;;  %v6720_v2 = vadd.f32 %v7330_v15, %v6710_v1 }
 0x519   : > { %v6701_v3 = vld [vmem:[#allocation5 + $0x20] sm:$0xff] }
 0x51a   : > { %v6726_v4 = vmax.f32 %v6720_v2, 0.0  ;;  %v6711_v5 = vmul.f32 %v7329_v60, %v6701_v3 }
 0x51c   : > { %6732 = vst.msk [vmem:[%s9638_s16 + $0x18] sm:$0xff] %vm516_vm4, %v6726_v4  ;;  %v6721_v35 = vadd.f32 %v7330_v15, %v6711_v5 }
 0x51d   : > { %v6702_v53 = vld [vmem:[#allocation5 + $0x28] sm:$0xff] }
 0x51e   : > { %v6727_v6 = vmax.f32 %v6721_v35, 0.0  ;;  %v6712_v7 = vmul.f32 %v7329_v60, %v6702_v53 }
 0x520   : > { %6733 = vst.msk [vmem:[%s9638_s16 + $0x20] sm:$0xff] %vm516_vm4, %v6727_v6  ;;  %v6722_v8 = vadd.f32 %v7330_v15, %v6712_v7 }
 0x522   : > { %v6728_v9 = vmax.f32 %v6722_v8, 0.0 }
 0x524   : > { %6734 = vst.msk [vmem:[%s9638_s16 + $0x28] sm:$0xff] %vm516_vm4, %v6728_v9 }
 0x525 PF: > { %s19_s30 = sadd.s32 1, %s8409_s30  }
 0x526   : > { %p16_p4 = scmp.ge.s32.totalorder %s19_s30, 4  }
 0x528   :  { %18 = sbr.rel (!%p16_p4) target bundleno = 1 (0x1), region = 113 }

</bundles_post_ra>
